<compile_context>
chip_gen: v7x
topology: tpu7x:2x2x1
jax: 0.10.0
libtpu: 0.0.40
codegen_flags: <defaults>
</compile_context>

<pallas_src>
from functools import partial

import jax
import jax.numpy as jnp
from jax import lax
from jax.experimental import pallas as pl
from jax.experimental.pallas import tpu as pltpu


# ---------------- helpers ----------------

def _pick_tile(dim, target, align):
    """Largest tile <= target that divides dim and respects TPU (8,128) tiling.

    Falls back to the full dimension (always legal for a BlockSpec) if no
    aligned divisor exists.
    """
    if dim <= target:
        return dim
    t = (target // align) * align
    while t >= align:
        if dim % t == 0:
            return t
        t -= align
    return dim


def _vmem_limit(bytes_needed):
    # explicit VMEM budget: 2x headroom for double-buffered pipelining, clamped
    # so it also fits v7x's 64 MiB physical VMEM per TensorCore.
    return int(min(max(2 * bytes_needed, 16 * 1024 * 1024), 48 * 1024 * 1024))


# ---------------- tiled matmul (+bias) kernels ----------------

def _matmul_kernel(x_ref, w_ref, o_ref, acc_ref):
    @pl.when(pl.program_id(2) == 0)
    def _():
        acc_ref[...] = jnp.zeros_like(acc_ref)

    acc_ref[...] += jnp.dot(x_ref[...], w_ref[...],
                            preferred_element_type=jnp.float32)

    @pl.when(pl.program_id(2) == pl.num_programs(2) - 1)
    def _():
        o_ref[...] = acc_ref[...].astype(o_ref.dtype)


def _matmul_bias_kernel(x_ref, w_ref, b_ref, o_ref, acc_ref):
    @pl.when(pl.program_id(2) == 0)
    def _():
        acc_ref[...] = jnp.zeros_like(acc_ref)

    acc_ref[...] += jnp.dot(x_ref[...], w_ref[...],
                            preferred_element_type=jnp.float32)

    @pl.when(pl.program_id(2) == pl.num_programs(2) - 1)
    def _():
        o_ref[...] = (acc_ref[...] + b_ref[...].astype(jnp.float32)
                      ).astype(o_ref.dtype)


def pallas_matmul(x, w, b=None, *, tm=256, tn=256, tk=512):
    """x:(M,K) @ w:(K,N) [+ b:(N,)] -> (M,N), MXU-tiled and software-pipelined."""
    M, K = x.shape
    Kw, N = w.shape
    assert K == Kw
    btm = _pick_tile(M, tm, 8)
    btn = _pick_tile(N, tn, 128)
    btk = _pick_tile(K, tk, 128)
    grid = (M // btm, N // btn, K // btk)

    in_specs = [
        pl.BlockSpec((btm, btk), lambda i, j, k: (i, k)),
        pl.BlockSpec((btk, btn), lambda i, j, k: (k, j)),
    ]
    args = [x, w]
    if b is None:
        kernel = _matmul_kernel
    else:
        kernel = _matmul_bias_kernel
        in_specs.append(pl.BlockSpec((1, btn), lambda i, j, k: (0, j)))
        args.append(b.reshape(1, N))

    itemsize = x.dtype.itemsize
    vmem_need = (2 * (btm * btk + btk * btn + btm * btn) * itemsize
                 + btm * btn * 4 + 2 * btn * 4)
    return pl.pallas_call(
        kernel,
        grid=grid,
        in_specs=in_specs,
        out_specs=pl.BlockSpec((btm, btn), lambda i, j, k: (i, j)),
        out_shape=jax.ShapeDtypeStruct((M, N), x.dtype),
        scratch_shapes=[pltpu.VMEM((btm, btn), jnp.float32)],
        compiler_params=pltpu.CompilerParams(
            dimension_semantics=("parallel", "parallel", "arbitrary"),
            vmem_limit_bytes=_vmem_limit(vmem_need)),
        cost_estimate=pl.CostEstimate(
            flops=2 * M * N * K,
            transcendentals=0,
            bytes_accessed=(M * K + K * N + M * N) * itemsize),
    )(*args)


# ---------------- fused multi-head attention kernel ----------------

def _attention_kernel(qkv_ref, o_ref, *, num_heads, head_dim, scale):
    # qkv_ref: (1, N, 3C) packed qkv for one batch element (C = H * head_dim),
    # laid out as [q_h0..q_h{H-1} | k_h0..k_h{H-1} | v_h0..v_h{H-1}].
    # o_ref: (1, N, C) in (B, N, C) layout (lane-dense).
    C = num_heads * head_dim
    qkv = qkv_ref[0]                      # (N, 3C); native dtype into the MXU
    head_outs = []
    for h in range(num_heads):
        q = qkv[:, h * head_dim:(h + 1) * head_dim]
        k = qkv[:, C + h * head_dim:C + (h + 1) * head_dim]
        v = qkv[:, 2 * C + h * head_dim:2 * C + (h + 1) * head_dim]
        # contract on the shared last dim -> no k.T relayout before the MXU
        s = lax.dot_general(q, k, (((1,), (1,)), ((), ())),
                            preferred_element_type=jnp.float32) * scale
        m = jnp.max(s, axis=-1, keepdims=True)
        p = jnp.exp(s - m)
        denom = jnp.sum(p, axis=-1, keepdims=True)
        o = jnp.dot(p.astype(v.dtype), v, preferred_element_type=jnp.float32)
        # deferred softmax normalization: O(N*hd) multiply by an EUP approx
        # reciprocal instead of dividing the O(N*N) probability matrix.
        o = o * pl.reciprocal(denom, approx=True)
        head_outs.append(o)
    # single lane-dense (N, C) store, already in (B, N, C) layout
    o_ref[0] = jnp.concatenate(head_outs, axis=-1).astype(o_ref.dtype)


def pallas_attention(qkv, num_heads, head_dim, scale):
    """qkv: (B, N, 3C) packed -> softmax(q k^T * scale) v, output (B, N, C)."""
    B, N, C3 = qkv.shape
    C = num_heads * head_dim
    assert C3 == 3 * C
    itemsize = qkv.dtype.itemsize
    vmem_need = (2 * N * C3 * itemsize + 2 * N * C * itemsize
                 + 4 * N * N * 4 + 4 * N * C * 4)
    # TODO(synk): for long sequences switch to flash-style KV tiling with
    # online-softmax VMEM scratch; at these sizes a single (N, N) score tile
    # per head fits v7x's 64 MiB VMEM with plenty of headroom.
    return pl.pallas_call(
        partial(_attention_kernel, num_heads=num_heads, head_dim=head_dim,
                scale=scale),
        grid=(B,),
        in_specs=[pl.BlockSpec((1, N, C3), lambda b: (b, 0, 0))],
        out_specs=pl.BlockSpec((1, N, C), lambda b: (b, 0, 0)),
        out_shape=jax.ShapeDtypeStruct((B, N, C), qkv.dtype),
        compiler_params=pltpu.CompilerParams(
            dimension_semantics=("parallel",),
            vmem_limit_bytes=_vmem_limit(vmem_need)),
        cost_estimate=pl.CostEstimate(
            flops=4 * B * num_heads * N * N * head_dim,
            transcendentals=B * num_heads * N * N,
            bytes_accessed=(B * N * C3 + B * N * C) * itemsize),
    )(qkv)


# ---------------- Attention module forward ----------------

def attention_forward(x, params, num_heads, qk_scale=None):
    """Equivalent of Attention.forward in eval mode (dropouts are identity).

    x: (B, N, C); params: qkv_w (C, 3C), optional qkv_b (3C,), proj_w (C, C),
    proj_b (C,).
    """
    B, N, C = x.shape
    head_dim = C // num_heads
    scale = qk_scale if qk_scale is not None else head_dim ** (-0.5)
    # TODO(synk): use_mask=True (sigmoid att_mask) branch not implemented;
    # module default is use_mask=False.
    qkv = pallas_matmul(x.reshape(B * N, C), params['qkv_w'],
                        params.get('qkv_b'))
    qkv = qkv.reshape(B, N, 3 * C)          # contiguous reshape, no HBM shuffle
    o = pallas_attention(qkv, num_heads, head_dim, scale)   # (B, N, C)
    o = pallas_matmul(o.reshape(B * N, C), params['proj_w'], params['proj_b'])
    return o.reshape(B, N, C)


def attention_reference(x, params, num_heads, qk_scale=None):
    """Pure-JAX reference mirroring the PyTorch module exactly."""
    B, N, C = x.shape
    hd = C // num_heads
    scale = qk_scale if qk_scale is not None else hd ** (-0.5)
    qkv = x @ params['qkv_w']
    if params.get('qkv_b') is not None:
        qkv = qkv + params['qkv_b']
    qkv = qkv.reshape(B, N, 3, num_heads, hd).transpose(2, 0, 3, 1, 4)
    q, k, v = qkv[0], qkv[1], qkv[2]
    attn = jnp.einsum('bhnd,bhmd->bhnm', q, k) * scale
    attn = jax.nn.softmax(attn, axis=-1)
    o = jnp.einsum('bhnm,bhmd->bhnd', attn, v)
    o = o.transpose(0, 2, 1, 3).reshape(B, N, C)
    return o @ params['proj_w'] + params['proj_b']


if __name__ == "__main__":
    key = jax.random.PRNGKey(0)
    kx, kq, kp, kb = jax.random.split(key, 4)

    # small config consistent with the module: dim=128, num_heads=8 (head_dim=16)
    B, N, C, H = 2, 64, 128, 8
    x = jax.random.normal(kx, (B, N, C), dtype=jnp.float32)
    params = dict(
        qkv_w=0.02 * jax.random.normal(kq, (C, 3 * C), dtype=jnp.float32),
        qkv_b=None,                        # qkv_bias=False (module default)
        proj_w=0.02 * jax.random.normal(kp, (C, C), dtype=jnp.float32),
        proj_b=0.02 * jax.random.normal(kb, (C,), dtype=jnp.float32),
    )

    fwd = jax.jit(partial(attention_forward, num_heads=H))
    out = fwd(x, params)
    jax.block_until_ready(out)

    ref = attention_reference(x, params, H)
    assert out.shape == (B, N, C), out.shape
    assert bool(jnp.all(jnp.isfinite(out)))
    max_err = float(jnp.max(jnp.abs(out - ref)))
    assert bool(jnp.allclose(out, ref, rtol=2e-2, atol=2e-2)), max_err
    print("KERNEL_OK")
</pallas_src>

<mosaic_0001>
module attributes {stable_mosaic.version = 11 : i64} {
  func.func @_matmul_kernel(%arg0: i32, %arg1: i32, %arg2: i32, %arg3: memref<128x128xf32, #tpu.memory_space<vmem>>, %arg4: memref<128x128xf32, #tpu.memory_space<vmem>>, %arg5: memref<128x128xf32, #tpu.memory_space<vmem>>, %arg6: memref<128x128xf32, #tpu.memory_space<vmem>>) attributes {dimension_semantics = [#tpu.dimension_semantics<parallel>, #tpu.dimension_semantics<parallel>, #tpu.dimension_semantics<arbitrary>], iteration_bounds = array<i64: 1, 3, 1>, scalar_prefetch = 0 : i64, scratch_operands = 1 : i64, tpu.core_type = #tpu.core_type<tc>, window_params = [{transform_indices = @transform_0, window_bounds = array<i64: 128, 128>}, {transform_indices = @transform_1, window_bounds = array<i64: 128, 128>}, {transform_indices = @transform_2, window_bounds = array<i64: 128, 128>}]} {
    %c0_i32 = arith.constant 0 : i32
    %0 = arith.cmpi eq, %arg2, %c0_i32 : i32
    %1 = arith.extui %0 : i1 to i32
    %c0_i32_0 = arith.constant 0 : i32
    %2 = arith.cmpi ne, %1, %c0_i32_0 : i32
    scf.if %2 {
      %cst_10 = arith.constant 0.000000e+00 : f32
      %12 = vector.broadcast %cst_10 : f32 to vector<128x128xf32>
      %c0_11 = arith.constant 0 : index
      %c0_12 = arith.constant 0 : index
      %13 = vector.load %arg6[%c0_11, %c0_12] : memref<128x128xf32, #tpu.memory_space<vmem>>, vector<128x128xf32>
      tpu.vector_store %arg6[%c0_11, %c0_12], %12 {strides = array<i32>} : memref<128x128xf32, #tpu.memory_space<vmem>>, vector<128x128xf32>,
    } else {
    }
    %c0 = arith.constant 0 : index
    %c0_1 = arith.constant 0 : index
    %3 = vector.load %arg6[%c0, %c0_1] : memref<128x128xf32, #tpu.memory_space<vmem>>, vector<128x128xf32>
    %c0_2 = arith.constant 0 : index
    %c0_3 = arith.constant 0 : index
    %4 = vector.load %arg3[%c0_2, %c0_3] : memref<128x128xf32, #tpu.memory_space<vmem>>, vector<128x128xf32>
    %c0_4 = arith.constant 0 : index
    %c0_5 = arith.constant 0 : index
    %5 = vector.load %arg4[%c0_4, %c0_5] : memref<128x128xf32, #tpu.memory_space<vmem>>, vector<128x128xf32>
    %cst = arith.constant dense<0.000000e+00> : vector<128x128xf32>
    %6 = tpu.matmul %4, %5, %cst {dimension_numbers = #tpu.dot_dimension_numbers<[1], [0], [0], [1], [0, 0, 1, 1], [], []>} : vector<128x128xf32>, vector<128x128xf32>, vector<128x128xf32> -> vector<128x128xf32>
    %7 = arith.addf %3, %6 : vector<128x128xf32>
    %c0_6 = arith.constant 0 : index
    %c0_7 = arith.constant 0 : index
    %8 = vector.load %arg6[%c0_6, %c0_7] : memref<128x128xf32, #tpu.memory_space<vmem>>, vector<128x128xf32>
    tpu.vector_store %arg6[%c0_6, %c0_7], %7 {strides = array<i32>} : memref<128x128xf32, #tpu.memory_space<vmem>>, vector<128x128xf32>,
    %c0_i32_8 = arith.constant 0 : i32
    %9 = arith.cmpi eq, %arg2, %c0_i32_8 : i32
    %10 = arith.extui %9 : i1 to i32
    %c0_i32_9 = arith.constant 0 : i32
    %11 = arith.cmpi ne, %10, %c0_i32_9 : i32
    scf.if %11 {
      %c0_10 = arith.constant 0 : index
      %c0_11 = arith.constant 0 : index
      %12 = vector.load %arg6[%c0_10, %c0_11] : memref<128x128xf32, #tpu.memory_space<vmem>>, vector<128x128xf32>
      %c0_12 = arith.constant 0 : index
      %c0_13 = arith.constant 0 : index
      %13 = vector.load %arg5[%c0_12, %c0_13] : memref<128x128xf32, #tpu.memory_space<vmem>>, vector<128x128xf32>
      tpu.vector_store %arg5[%c0_12, %c0_13], %12 {strides = array<i32>} : memref<128x128xf32, #tpu.memory_space<vmem>>, vector<128x128xf32>,
    } else {
    }
    return
  }
  func.func @transform_0(%arg0: i32, %arg1: i32, %arg2: i32) -> (i32, i32) {
    %c0_i32 = arith.constant 0 : i32
    return %arg0, %arg2 : i32, i32
  }
  func.func @transform_1(%arg0: i32, %arg1: i32, %arg2: i32) -> (i32, i32) {
    %c0_i32 = arith.constant 0 : i32
    return %arg2, %arg1 : i32, i32
  }
  func.func @transform_2(%arg0: i32, %arg1: i32, %arg2: i32) -> (i32, i32) {
    %c0_i32 = arith.constant 0 : i32
    return %arg0, %arg1 : i32, i32
  }
}

module attributes {stable_mosaic.version = 11 : i64} {
  func.func @_matmul_bias_kernel(%arg0: i32, %arg1: i32, %arg2: i32, %arg3: memref<128x128xf32, #tpu.memory_space<vmem>>, %arg4: memref<128x128xf32, #tpu.memory_space<vmem>>, %arg5: memref<1x128xf32, #tpu.memory_space<vmem>>, %arg6: memref<128x128xf32, #tpu.memory_space<vmem>>, %arg7: memref<128x128xf32, #tpu.memory_space<vmem>>) attributes {dimension_semantics = [#tpu.dimension_semantics<parallel>, #tpu.dimension_semantics<parallel>, #tpu.dimension_semantics<arbitrary>], iteration_bounds = array<i64: 1, 1, 1>, scalar_prefetch = 0 : i64, scratch_operands = 1 : i64, tpu.core_type = #tpu.core_type<tc>, window_params = [{transform_indices = @transform_0, window_bounds = array<i64: 128, 128>}, {transform_indices = @transform_1, window_bounds = array<i64: 128, 128>}, {transform_indices = @transform_2, window_bounds = array<i64: 1, 128>}, {transform_indices = @transform_3, window_bounds = array<i64: 128, 128>}]} {
    %c0_i32 = arith.constant 0 : i32
    %0 = arith.cmpi eq, %arg2, %c0_i32 : i32
    %1 = arith.extui %0 : i1 to i32
    %c0_i32_0 = arith.constant 0 : i32
    %2 = arith.cmpi ne, %1, %c0_i32_0 : i32
    scf.if %2 {
      %cst_10 = arith.constant 0.000000e+00 : f32
      %12 = vector.broadcast %cst_10 : f32 to vector<128x128xf32>
      %c0_11 = arith.constant 0 : index
      %c0_12 = arith.constant 0 : index
      %13 = vector.load %arg7[%c0_11, %c0_12] : memref<128x128xf32, #tpu.memory_space<vmem>>, vector<128x128xf32>
      tpu.vector_store %arg7[%c0_11, %c0_12], %12 {strides = array<i32>} : memref<128x128xf32, #tpu.memory_space<vmem>>, vector<128x128xf32>,
    } else {
    }
    %c0 = arith.constant 0 : index
    %c0_1 = arith.constant 0 : index
    %3 = vector.load %arg7[%c0, %c0_1] : memref<128x128xf32, #tpu.memory_space<vmem>>, vector<128x128xf32>
    %c0_2 = arith.constant 0 : index
    %c0_3 = arith.constant 0 : index
    %4 = vector.load %arg3[%c0_2, %c0_3] : memref<128x128xf32, #tpu.memory_space<vmem>>, vector<128x128xf32>
    %c0_4 = arith.constant 0 : index
    %c0_5 = arith.constant 0 : index
    %5 = vector.load %arg4[%c0_4, %c0_5] : memref<128x128xf32, #tpu.memory_space<vmem>>, vector<128x128xf32>
    %cst = arith.constant dense<0.000000e+00> : vector<128x128xf32>
    %6 = tpu.matmul %4, %5, %cst {dimension_numbers = #tpu.dot_dimension_numbers<[1], [0], [0], [1], [0, 0, 1, 1], [], []>} : vector<128x128xf32>, vector<128x128xf32>, vector<128x128xf32> -> vector<128x128xf32>
    %7 = arith.addf %3, %6 : vector<128x128xf32>
    %c0_6 = arith.constant 0 : index
    %c0_7 = arith.constant 0 : index
    %8 = vector.load %arg7[%c0_6, %c0_7] : memref<128x128xf32, #tpu.memory_space<vmem>>, vector<128x128xf32>
    tpu.vector_store %arg7[%c0_6, %c0_7], %7 {strides = array<i32>} : memref<128x128xf32, #tpu.memory_space<vmem>>, vector<128x128xf32>,
    %c0_i32_8 = arith.constant 0 : i32
    %9 = arith.cmpi eq, %arg2, %c0_i32_8 : i32
    %10 = arith.extui %9 : i1 to i32
    %c0_i32_9 = arith.constant 0 : i32
    %11 = arith.cmpi ne, %10, %c0_i32_9 : i32
    scf.if %11 {
      %c0_10 = arith.constant 0 : index
      %c0_11 = arith.constant 0 : index
      %12 = vector.load %arg7[%c0_10, %c0_11] : memref<128x128xf32, #tpu.memory_space<vmem>>, vector<128x128xf32>
      %c0_12 = arith.constant 0 : index
      %c0_13 = arith.constant 0 : index
      %13 = vector.load %arg5[%c0_12, %c0_13] : memref<1x128xf32, #tpu.memory_space<vmem>>, vector<1x128xf32>
      %14 = vector.broadcast %13 : vector<1x128xf32> to vector<128x128xf32>
      %15 = arith.addf %12, %14 : vector<128x128xf32>
      %c0_14 = arith.constant 0 : index
      %c0_15 = arith.constant 0 : index
      %16 = vector.load %arg6[%c0_14, %c0_15] : memref<128x128xf32, #tpu.memory_space<vmem>>, vector<128x128xf32>
      tpu.vector_store %arg6[%c0_14, %c0_15], %15 {strides = array<i32>} : memref<128x128xf32, #tpu.memory_space<vmem>>, vector<128x128xf32>,
    } else {
    }
    return
  }
  func.func @transform_0(%arg0: i32, %arg1: i32, %arg2: i32) -> (i32, i32) {
    %c0_i32 = arith.constant 0 : i32
    return %arg0, %arg2 : i32, i32
  }
  func.func @transform_1(%arg0: i32, %arg1: i32, %arg2: i32) -> (i32, i32) {
    %c0_i32 = arith.constant 0 : i32
    return %arg2, %arg1 : i32, i32
  }
  func.func @transform_2(%arg0: i32, %arg1: i32, %arg2: i32) -> (i32, i32) {
    %c0_i32 = arith.constant 0 : i32
    %c0_i32_0 = arith.constant 0 : i32
    return %c0_i32, %arg1 : i32, i32
  }
  func.func @transform_3(%arg0: i32, %arg1: i32, %arg2: i32) -> (i32, i32) {
    %c0_i32 = arith.constant 0 : i32
    return %arg0, %arg1 : i32, i32
  }
}

module attributes {stable_mosaic.version = 11 : i64} {
  func.func @_attention_kernel(%arg0: i32, %arg1: memref<1x64x384xf32, #tpu.memory_space<vmem>>, %arg2: memref<1x64x128xf32, #tpu.memory_space<vmem>>) attributes {dimension_semantics = [#tpu.dimension_semantics<parallel>], iteration_bounds = array<i64: 2>, scalar_prefetch = 0 : i64, scratch_operands = 0 : i64, tpu.core_type = #tpu.core_type<tc>, window_params = [{transform_indices = @transform_0, window_bounds = array<i64: 1, 64, 384>}, {transform_indices = @transform_1, window_bounds = array<i64: 1, 64, 128>}]} {
    %c0 = arith.constant 0 : index
    %c0_0 = arith.constant 0 : index
    %c0_1 = arith.constant 0 : index
    %0 = vector.load %arg1[%c0, %c0_0, %c0_1] : memref<1x64x384xf32, #tpu.memory_space<vmem>>, vector<1x64x384xf32>
    %1 = vector.shape_cast %0 : vector<1x64x384xf32> to vector<64x384xf32>
    %2 = vector.extract_strided_slice %1 {offsets = [0, 0], sizes = [64, 16], strides = [1, 1]} : vector<64x384xf32> to vector<64x16xf32>
    %3 = vector.extract_strided_slice %1 {offsets = [0, 128], sizes = [64, 16], strides = [1, 1]} : vector<64x384xf32> to vector<64x16xf32>
    %4 = vector.extract_strided_slice %1 {offsets = [0, 256], sizes = [64, 16], strides = [1, 1]} : vector<64x384xf32> to vector<64x16xf32>
    %cst = arith.constant dense<0.000000e+00> : vector<64x64xf32>
    %5 = tpu.matmul %2, %3, %cst {dimension_numbers = #tpu.dot_dimension_numbers<[1], [1], [0], [0], [0, 0, 1, 0], [], []>} : vector<64x16xf32>, vector<64x16xf32>, vector<64x64xf32> -> vector<64x64xf32>
    %cst_2 = arith.constant 2.500000e-01 : f32
    %6 = vector.broadcast %cst_2 : f32 to vector<64x64xf32>
    %7 = arith.mulf %5, %6 : vector<64x64xf32>
    %cst_3 = arith.constant dense<0xFF800000> : vector<64xf32>
    %8 = vector.multi_reduction <maximumf>, %7, %cst_3 [1] : vector<64x64xf32> to vector<64xf32>
    %9 = vector.shape_cast %8 : vector<64xf32> to vector<64x1xf32>
    %10 = vector.broadcast %9 : vector<64x1xf32> to vector<64x64xf32>
    %11 = arith.subf %7, %10 : vector<64x64xf32>
    %12 = math.exp %11 : vector<64x64xf32>
    %cst_4 = arith.constant dense<0.000000e+00> : vector<64xf32>
    %13 = vector.multi_reduction <add>, %12, %cst_4 [1] : vector<64x64xf32> to vector<64xf32>
    %14 = vector.shape_cast %13 : vector<64xf32> to vector<64x1xf32>
    %cst_5 = arith.constant dense<0.000000e+00> : vector<64x16xf32>
    %15 = tpu.matmul %12, %4, %cst_5 {dimension_numbers = #tpu.dot_dimension_numbers<[1], [0], [0], [1], [0, 0, 1, 1], [], []>} : vector<64x64xf32>, vector<64x16xf32>, vector<64x16xf32> -> vector<64x16xf32>
    %16 = tpu.reciprocal %14 {approx = true} : vector<64x1xf32> -> vector<64x1xf32>
    %17 = vector.broadcast %16 : vector<64x1xf32> to vector<64x16xf32>
    %18 = arith.mulf %15, %17 : vector<64x16xf32>
    %19 = vector.extract_strided_slice %1 {offsets = [0, 16], sizes = [64, 16], strides = [1, 1]} : vector<64x384xf32> to vector<64x16xf32>
    %20 = vector.extract_strided_slice %1 {offsets = [0, 144], sizes = [64, 16], strides = [1, 1]} : vector<64x384xf32> to vector<64x16xf32>
    %21 = vector.extract_strided_slice %1 {offsets = [0, 272], sizes = [64, 16], strides = [1, 1]} : vector<64x384xf32> to vector<64x16xf32>
    %cst_6 = arith.constant dense<0.000000e+00> : vector<64x64xf32>
    %22 = tpu.matmul %19, %20, %cst_6 {dimension_numbers = #tpu.dot_dimension_numbers<[1], [1], [0], [0], [0, 0, 1, 0], [], []>} : vector<64x16xf32>, vector<64x16xf32>, vector<64x64xf32> -> vector<64x64xf32>
    %cst_7 = arith.constant 2.500000e-01 : f32
    %23 = vector.broadcast %cst_7 : f32 to vector<64x64xf32>
    %24 = arith.mulf %22, %23 : vector<64x64xf32>
    %cst_8 = arith.constant dense<0xFF800000> : vector<64xf32>
    %25 = vector.multi_reduction <maximumf>, %24, %cst_8 [1] : vector<64x64xf32> to vector<64xf32>
    %26 = vector.shape_cast %25 : vector<64xf32> to vector<64x1xf32>
    %27 = vector.broadcast %26 : vector<64x1xf32> to vector<64x64xf32>
    %28 = arith.subf %24, %27 : vector<64x64xf32>
    %29 = math.exp %28 : vector<64x64xf32>
    %cst_9 = arith.constant dense<0.000000e+00> : vector<64xf32>
    %30 = vector.multi_reduction <add>, %29, %cst_9 [1] : vector<64x64xf32> to vector<64xf32>
    %31 = vector.shape_cast %30 : vector<64xf32> to vector<64x1xf32>
    %cst_10 = arith.constant dense<0.000000e+00> : vector<64x16xf32>
    %32 = tpu.matmul %29, %21, %cst_10 {dimension_numbers = #tpu.dot_dimension_numbers<[1], [0], [0], [1], [0, 0, 1, 1], [], []>} : vector<64x64xf32>, vector<64x16xf32>, vector<64x16xf32> -> vector<64x16xf32>
    %33 = tpu.reciprocal %31 {approx = true} : vector<64x1xf32> -> vector<64x1xf32>
    %34 = vector.broadcast %33 : vector<64x1xf32> to vector<64x16xf32>
    %35 = arith.mulf %32, %34 : vector<64x16xf32>
    %36 = vector.extract_strided_slice %1 {offsets = [0, 32], sizes = [64, 16], strides = [1, 1]} : vector<64x384xf32> to vector<64x16xf32>
    %37 = vector.extract_strided_slice %1 {offsets = [0, 160], sizes = [64, 16], strides = [1, 1]} : vector<64x384xf32> to vector<64x16xf32>
    %38 = vector.extract_strided_slice %1 {offsets = [0, 288], sizes = [64, 16], strides = [1, 1]} : vector<64x384xf32> to vector<64x16xf32>
    %cst_11 = arith.constant dense<0.000000e+00> : vector<64x64xf32>
    %39 = tpu.matmul %36, %37, %cst_11 {dimension_numbers = #tpu.dot_dimension_numbers<[1], [1], [0], [0], [0, 0, 1, 0], [], []>} : vector<64x16xf32>, vector<64x16xf32>, vector<64x64xf32> -> vector<64x64xf32>
    %cst_12 = arith.constant 2.500000e-01 : f32
    %40 = vector.broadcast %cst_12 : f32 to vector<64x64xf32>
    %41 = arith.mulf %39, %40 : vector<64x64xf32>
    %cst_13 = arith.constant dense<0xFF800000> : vector<64xf32>
    %42 = vector.multi_reduction <maximumf>, %41, %cst_13 [1] : vector<64x64xf32> to vector<64xf32>
    %43 = vector.shape_cast %42 : vector<64xf32> to vector<64x1xf32>
    %44 = vector.broadcast %43 : vector<64x1xf32> to vector<64x64xf32>
    %45 = arith.subf %41, %44 : vector<64x64xf32>
    %46 = math.exp %45 : vector<64x64xf32>
    %cst_14 = arith.constant dense<0.000000e+00> : vector<64xf32>
    %47 = vector.multi_reduction <add>, %46, %cst_14 [1] : vector<64x64xf32> to vector<64xf32>
    %48 = vector.shape_cast %47 : vector<64xf32> to vector<64x1xf32>
    %cst_15 = arith.constant dense<0.000000e+00> : vector<64x16xf32>
    %49 = tpu.matmul %46, %38, %cst_15 {dimension_numbers = #tpu.dot_dimension_numbers<[1], [0], [0], [1], [0, 0, 1, 1], [], []>} : vector<64x64xf32>, vector<64x16xf32>, vector<64x16xf32> -> vector<64x16xf32>
    %50 = tpu.reciprocal %48 {approx = true} : vector<64x1xf32> -> vector<64x1xf32>
    %51 = vector.broadcast %50 : vector<64x1xf32> to vector<64x16xf32>
    %52 = arith.mulf %49, %51 : vector<64x16xf32>
    %53 = vector.extract_strided_slice %1 {offsets = [0, 48], sizes = [64, 16], strides = [1, 1]} : vector<64x384xf32> to vector<64x16xf32>
    %54 = vector.extract_strided_slice %1 {offsets = [0, 176], sizes = [64, 16], strides = [1, 1]} : vector<64x384xf32> to vector<64x16xf32>
    %55 = vector.extract_strided_slice %1 {offsets = [0, 304], sizes = [64, 16], strides = [1, 1]} : vector<64x384xf32> to vector<64x16xf32>
    %cst_16 = arith.constant dense<0.000000e+00> : vector<64x64xf32>
    %56 = tpu.matmul %53, %54, %cst_16 {dimension_numbers = #tpu.dot_dimension_numbers<[1], [1], [0], [0], [0, 0, 1, 0], [], []>} : vector<64x16xf32>, vector<64x16xf32>, vector<64x64xf32> -> vector<64x64xf32>
    %cst_17 = arith.constant 2.500000e-01 : f32
    %57 = vector.broadcast %cst_17 : f32 to vector<64x64xf32>
    %58 = arith.mulf %56, %57 : vector<64x64xf32>
    %cst_18 = arith.constant dense<0xFF800000> : vector<64xf32>
    %59 = vector.multi_reduction <maximumf>, %58, %cst_18 [1] : vector<64x64xf32> to vector<64xf32>
    %60 = vector.shape_cast %59 : vector<64xf32> to vector<64x1xf32>
    %61 = vector.broadcast %60 : vector<64x1xf32> to vector<64x64xf32>
    %62 = arith.subf %58, %61 : vector<64x64xf32>
    %63 = math.exp %62 : vector<64x64xf32>
    %cst_19 = arith.constant dense<0.000000e+00> : vector<64xf32>
    %64 = vector.multi_reduction <add>, %63, %cst_19 [1] : vector<64x64xf32> to vector<64xf32>
    %65 = vector.shape_cast %64 : vector<64xf32> to vector<64x1xf32>
    %cst_20 = arith.constant dense<0.000000e+00> : vector<64x16xf32>
    %66 = tpu.matmul %63, %55, %cst_20 {dimension_numbers = #tpu.dot_dimension_numbers<[1], [0], [0], [1], [0, 0, 1, 1], [], []>} : vector<64x64xf32>, vector<64x16xf32>, vector<64x16xf32> -> vector<64x16xf32>
    %67 = tpu.reciprocal %65 {approx = true} : vector<64x1xf32> -> vector<64x1xf32>
    %68 = vector.broadcast %67 : vector<64x1xf32> to vector<64x16xf32>
    %69 = arith.mulf %66, %68 : vector<64x16xf32>
    %70 = vector.extract_strided_slice %1 {offsets = [0, 64], sizes = [64, 16], strides = [1, 1]} : vector<64x384xf32> to vector<64x16xf32>
    %71 = vector.extract_strided_slice %1 {offsets = [0, 192], sizes = [64, 16], strides = [1, 1]} : vector<64x384xf32> to vector<64x16xf32>
    %72 = vector.extract_strided_slice %1 {offsets = [0, 320], sizes = [64, 16], strides = [1, 1]} : vector<64x384xf32> to vector<64x16xf32>
    %cst_21 = arith.constant dense<0.000000e+00> : vector<64x64xf32>
    %73 = tpu.matmul %70, %71, %cst_21 {dimension_numbers = #tpu.dot_dimension_numbers<[1], [1], [0], [0], [0, 0, 1, 0], [], []>} : vector<64x16xf32>, vector<64x16xf32>, vector<64x64xf32> -> vector<64x64xf32>
    %cst_22 = arith.constant 2.500000e-01 : f32
    %74 = vector.broadcast %cst_22 : f32 to vector<64x64xf32>
    %75 = arith.mulf %73, %74 : vector<64x64xf32>
    %cst_23 = arith.constant dense<0xFF800000> : vector<64xf32>
    %76 = vector.multi_reduction <maximumf>, %75, %cst_23 [1] : vector<64x64xf32> to vector<64xf32>
    %77 = vector.shape_cast %76 : vector<64xf32> to vector<64x1xf32>
    %78 = vector.broadcast %77 : vector<64x1xf32> to vector<64x64xf32>
    %79 = arith.subf %75, %78 : vector<64x64xf32>
    %80 = math.exp %79 : vector<64x64xf32>
    %cst_24 = arith.constant dense<0.000000e+00> : vector<64xf32>
    %81 = vector.multi_reduction <add>, %80, %cst_24 [1] : vector<64x64xf32> to vector<64xf32>
    %82 = vector.shape_cast %81 : vector<64xf32> to vector<64x1xf32>
    %cst_25 = arith.constant dense<0.000000e+00> : vector<64x16xf32>
    %83 = tpu.matmul %80, %72, %cst_25 {dimension_numbers = #tpu.dot_dimension_numbers<[1], [0], [0], [1], [0, 0, 1, 1], [], []>} : vector<64x64xf32>, vector<64x16xf32>, vector<64x16xf32> -> vector<64x16xf32>
    %84 = tpu.reciprocal %82 {approx = true} : vector<64x1xf32> -> vector<64x1xf32>
    %85 = vector.broadcast %84 : vector<64x1xf32> to vector<64x16xf32>
    %86 = arith.mulf %83, %85 : vector<64x16xf32>
    %87 = vector.extract_strided_slice %1 {offsets = [0, 80], sizes = [64, 16], strides = [1, 1]} : vector<64x384xf32> to vector<64x16xf32>
    %88 = vector.extract_strided_slice %1 {offsets = [0, 208], sizes = [64, 16], strides = [1, 1]} : vector<64x384xf32> to vector<64x16xf32>
    %89 = vector.extract_strided_slice %1 {offsets = [0, 336], sizes = [64, 16], strides = [1, 1]} : vector<64x384xf32> to vector<64x16xf32>
    %cst_26 = arith.constant dense<0.000000e+00> : vector<64x64xf32>
    %90 = tpu.matmul %87, %88, %cst_26 {dimension_numbers = #tpu.dot_dimension_numbers<[1], [1], [0], [0], [0, 0, 1, 0], [], []>} : vector<64x16xf32>, vector<64x16xf32>, vector<64x64xf32> -> vector<64x64xf32>
    %cst_27 = arith.constant 2.500000e-01 : f32
    %91 = vector.broadcast %cst_27 : f32 to vector<64x64xf32>
    %92 = arith.mulf %90, %91 : vector<64x64xf32>
    %cst_28 = arith.constant dense<0xFF800000> : vector<64xf32>
    %93 = vector.multi_reduction <maximumf>, %92, %cst_28 [1] : vector<64x64xf32> to vector<64xf32>
    %94 = vector.shape_cast %93 : vector<64xf32> to vector<64x1xf32>
    %95 = vector.broadcast %94 : vector<64x1xf32> to vector<64x64xf32>
    %96 = arith.subf %92, %95 : vector<64x64xf32>
    %97 = math.exp %96 : vector<64x64xf32>
    %cst_29 = arith.constant dense<0.000000e+00> : vector<64xf32>
    %98 = vector.multi_reduction <add>, %97, %cst_29 [1] : vector<64x64xf32> to vector<64xf32>
    %99 = vector.shape_cast %98 : vector<64xf32> to vector<64x1xf32>
    %cst_30 = arith.constant dense<0.000000e+00> : vector<64x16xf32>
    %100 = tpu.matmul %97, %89, %cst_30 {dimension_numbers = #tpu.dot_dimension_numbers<[1], [0], [0], [1], [0, 0, 1, 1], [], []>} : vector<64x64xf32>, vector<64x16xf32>, vector<64x16xf32> -> vector<64x16xf32>
    %101 = tpu.reciprocal %99 {approx = true} : vector<64x1xf32> -> vector<64x1xf32>
    %102 = vector.broadcast %101 : vector<64x1xf32> to vector<64x16xf32>
    %103 = arith.mulf %100, %102 : vector<64x16xf32>
    %104 = vector.extract_strided_slice %1 {offsets = [0, 96], sizes = [64, 16], strides = [1, 1]} : vector<64x384xf32> to vector<64x16xf32>
    %105 = vector.extract_strided_slice %1 {offsets = [0, 224], sizes = [64, 16], strides = [1, 1]} : vector<64x384xf32> to vector<64x16xf32>
    %106 = vector.extract_strided_slice %1 {offsets = [0, 352], sizes = [64, 16], strides = [1, 1]} : vector<64x384xf32> to vector<64x16xf32>
    %cst_31 = arith.constant dense<0.000000e+00> : vector<64x64xf32>
    %107 = tpu.matmul %104, %105, %cst_31 {dimension_numbers = #tpu.dot_dimension_numbers<[1], [1], [0], [0], [0, 0, 1, 0], [], []>} : vector<64x16xf32>, vector<64x16xf32>, vector<64x64xf32> -> vector<64x64xf32>
    %cst_32 = arith.constant 2.500000e-01 : f32
    %108 = vector.broadcast %cst_32 : f32 to vector<64x64xf32>
    %109 = arith.mulf %107, %108 : vector<64x64xf32>
    %cst_33 = arith.constant dense<0xFF800000> : vector<64xf32>
    %110 = vector.multi_reduction <maximumf>, %109, %cst_33 [1] : vector<64x64xf32> to vector<64xf32>
    %111 = vector.shape_cast %110 : vector<64xf32> to vector<64x1xf32>
    %112 = vector.broadcast %111 : vector<64x1xf32> to vector<64x64xf32>
    %113 = arith.subf %109, %112 : vector<64x64xf32>
    %114 = math.exp %113 : vector<64x64xf32>
    %cst_34 = arith.constant dense<0.000000e+00> : vector<64xf32>
    %115 = vector.multi_reduction <add>, %114, %cst_34 [1] : vector<64x64xf32> to vector<64xf32>
    %116 = vector.shape_cast %115 : vector<64xf32> to vector<64x1xf32>
    %cst_35 = arith.constant dense<0.000000e+00> : vector<64x16xf32>
    %117 = tpu.matmul %114, %106, %cst_35 {dimension_numbers = #tpu.dot_dimension_numbers<[1], [0], [0], [1], [0, 0, 1, 1], [], []>} : vector<64x64xf32>, vector<64x16xf32>, vector<64x16xf32> -> vector<64x16xf32>
    %118 = tpu.reciprocal %116 {approx = true} : vector<64x1xf32> -> vector<64x1xf32>
    %119 = vector.broadcast %118 : vector<64x1xf32> to vector<64x16xf32>
    %120 = arith.mulf %117, %119 : vector<64x16xf32>
    %121 = vector.extract_strided_slice %1 {offsets = [0, 112], sizes = [64, 16], strides = [1, 1]} : vector<64x384xf32> to vector<64x16xf32>
    %122 = vector.extract_strided_slice %1 {offsets = [0, 240], sizes = [64, 16], strides = [1, 1]} : vector<64x384xf32> to vector<64x16xf32>
    %123 = vector.extract_strided_slice %1 {offsets = [0, 368], sizes = [64, 16], strides = [1, 1]} : vector<64x384xf32> to vector<64x16xf32>
    %cst_36 = arith.constant dense<0.000000e+00> : vector<64x64xf32>
    %124 = tpu.matmul %121, %122, %cst_36 {dimension_numbers = #tpu.dot_dimension_numbers<[1], [1], [0], [0], [0, 0, 1, 0], [], []>} : vector<64x16xf32>, vector<64x16xf32>, vector<64x64xf32> -> vector<64x64xf32>
    %cst_37 = arith.constant 2.500000e-01 : f32
    %125 = vector.broadcast %cst_37 : f32 to vector<64x64xf32>
    %126 = arith.mulf %124, %125 : vector<64x64xf32>
    %cst_38 = arith.constant dense<0xFF800000> : vector<64xf32>
    %127 = vector.multi_reduction <maximumf>, %126, %cst_38 [1] : vector<64x64xf32> to vector<64xf32>
    %128 = vector.shape_cast %127 : vector<64xf32> to vector<64x1xf32>
    %129 = vector.broadcast %128 : vector<64x1xf32> to vector<64x64xf32>
    %130 = arith.subf %126, %129 : vector<64x64xf32>
    %131 = math.exp %130 : vector<64x64xf32>
    %cst_39 = arith.constant dense<0.000000e+00> : vector<64xf32>
    %132 = vector.multi_reduction <add>, %131, %cst_39 [1] : vector<64x64xf32> to vector<64xf32>
    %133 = vector.shape_cast %132 : vector<64xf32> to vector<64x1xf32>
    %cst_40 = arith.constant dense<0.000000e+00> : vector<64x16xf32>
    %134 = tpu.matmul %131, %123, %cst_40 {dimension_numbers = #tpu.dot_dimension_numbers<[1], [0], [0], [1], [0, 0, 1, 1], [], []>} : vector<64x64xf32>, vector<64x16xf32>, vector<64x16xf32> -> vector<64x16xf32>
    %135 = tpu.reciprocal %133 {approx = true} : vector<64x1xf32> -> vector<64x1xf32>
    %136 = vector.broadcast %135 : vector<64x1xf32> to vector<64x16xf32>
    %137 = arith.mulf %134, %136 : vector<64x16xf32>
    %138 = tpu.concatenate %18, %35, %52, %69, %86, %103, %120, %137 in 1 : vector<64x16xf32>, vector<64x16xf32>, vector<64x16xf32>, vector<64x16xf32>, vector<64x16xf32>, vector<64x16xf32>, vector<64x16xf32>, vector<64x16xf32> -> vector<64x128xf32>
    %c0_41 = arith.constant 0 : index
    %c0_42 = arith.constant 0 : index
    %c0_43 = arith.constant 0 : index
    %139 = vector.load %arg2[%c0_41, %c0_42, %c0_43] : memref<1x64x128xf32, #tpu.memory_space<vmem>>, vector<1x64x128xf32>
    %140 = vector.shape_cast %139 : vector<1x64x128xf32> to vector<64x128xf32>
    %141 = vector.shape_cast %138 : vector<64x128xf32> to vector<1x64x128xf32>
    tpu.vector_store %arg2[%c0_41, %c0_42, %c0_43], %141 {strides = array<i32>} : memref<1x64x128xf32, #tpu.memory_space<vmem>>, vector<1x64x128xf32>,
    return
  }
  func.func @transform_0(%arg0: i32) -> (i32, i32, i32) {
    %c0_i32 = arith.constant 0 : i32
    %c0_i32_0 = arith.constant 0 : i32
    %c0_i32_1 = arith.constant 0 : i32
    return %arg0, %c0_i32, %c0_i32_0 : i32, i32, i32
  }
  func.func @transform_1(%arg0: i32) -> (i32, i32, i32) {
    %c0_i32 = arith.constant 0 : i32
    %c0_i32_0 = arith.constant 0 : i32
    %c0_i32_1 = arith.constant 0 : i32
    return %arg0, %c0_i32, %c0_i32_0 : i32, i32, i32
  }
}

</mosaic_0001>

<bundles_post_ra>
// kernel: attention_forward.3
= control target key start
LH: loop header
LB: loop body
LE: loop exit
PB: predicated region body
PF: predicated region fallthrough
CT: control target
= control target key end

     0   :  { %7 = vsyncpa [#allocation4], 0  ;;  %s1280_s0 = inlined_call_operand.hbm [shape: f32[128,128], index: 0, kind: input, shape index: {}]   ;;  %s1281_s1 = inlined_call_operand.hbm [shape: f32[128,384], index: 1, kind: input, shape index: {}]   ;;  %s1282_s2 = inlined_call_operand.vmem [shape: f32[128,384], index: 2, kind: output, shape index: {}]  }
   0x1   :  { %8 = vsyncpa [#allocation6], 0 }
   0x2   :  { %10 = vsyncpa [#allocation6 + $0x1], 0  ;;  %s1043_s9 = smov 0   ;;  %s1045_s10 = smov 0  }
   0x3   :  { %s1047_s11 = smov 0   ;;  %s1049_s12 = smov 0  }
   0x4   :  { %s1051_s13 = smov 0   ;;  %s1053_s14 = smov 0  }
   0x5 LB: > { %s689_s15 = sadd.s32 4294967295, %s1021_s14   ;;  %p79_p0 = scmp.ne.s32.totalorder %s1009_s11, %s1005_s10  ;;  %s1021_s14 = sphi %s1053_s14, %s16_s14   ;;  %s1017_s13 = sphi %s1051_s13, %s1305_s13   ;;  %s1013_s12 = sphi %s1049_s12, %s1304_s12   ;;  %s1009_s11 = sphi %s1047_s11, %s1303_s11   ;;  %s1005_s10 = sphi %s1045_s10, %s1302_s10   ;;  %s1001_s9 = sphi %s1043_s9, %s1301_s9  }
   0x6   : > { %p80_p1 = scmp.eq.s32.totalorder %s1021_s14, 0  ;;  %p85_p2 = scmp.ne.s32.totalorder %s1005_s10, %s1001_s9 }
   0x7   : > { %p1076_p3 = scmp.eq.s32.totalorder %s689_s15, 0  ;;  %p111_p4 = scmp.eq.s32.totalorder %s689_s15, 2 }
   0x8   : > { %p81_p5 = por %p80_p1, %p79_p0  ;;  %p691_p6 = scmp.ge.s32.totalorder %s1021_s14, 1 }
   0x9   : > { %s1288_s16 = scalar_select %p1076_p3, 1, 0 }
   0xa   : > { %p1083_p7 = por %p1076_p3, %p85_p2  ;;  %p1087_p8 = por %p111_p4, %p79_p0 }
   0xb   : > { %p124_p9 = scmp.lt.s32.totalorder %s1021_s14, 4  ;;  %s1023_s20 = smov [#allocation3]  }
   0xc   : > { %s1289_s17 = scalar_select %p1083_p7, 1, 0 }
   0xd   : > { %s1290_s18 = scalar_select %p1087_p8, 1, 0 }
   0xe   : > { %p1092_p10 = pnand %p691_p6, %p124_p9  ;;  %s140_s21 = sshll.u32 %s1023_s20, 4  ;;  %s1096_s21 = int_to_ptr.vmem [resolvable:$true] %s140_s21 }
   0xf   : > { %p855_p12 = scmp.lt.s32.totalorder %s1021_s14, 3  ;;  %s31_s24 = sadd.s32 1, %s1017_s13 }
  0x10   : > { %s1291_s19 = scalar_select %p1092_p10, 1, 0 }
  0x11   : > { %p846_p11 = pneg %p1092_p10  ;;  %p1107_p0 = pnand %p855_p12, %p81_p5 }
  0x12   : > { %p1112_p1 = scmp.ge.s32.totalorder %s31_s24, 3  ;;  %s909_s28 = scalar_lea.hbm %s1280_s0, 2048 }
  0x13   : > { %p1103_p13 = pnand %p846_p11, %p1076_p3  ;;  %p910_p2 = scmp.ne.s32.totalorder %s1280_s0, %s909_s28 }
  0x14   : > { %s1293_s23 = scalar_select %p1107_p0, 1, 0 }
  0x15   : > { %s1294_s25 = scalar_select %p1112_p1, 1, 0 }
  0x16   : > { %p911_p4 = pneg %p1103_p13  ;;  %p916_p9 = scmp.lt.u32.totalorder %s909_s28, %s1280_s0 }
  0x18   : > { %p912_p6 = pnand %p911_p4, %p910_p2 }
  0x1a   : > { %p913_p5 = pneg %p912_p6 }
  0x1c   : > { %p918_p11 = pnand %p916_p9, %p913_p5 }
  0x1e   : > { %921 = shalt.err (!%p918_p11)
}
  0x1f   : > { %s922_s5 = scalar_lea.vmem %s1096_s21, 2048  ;;  %p930_p3 = scmp.lt.s32.totalorder %s1096_s21, %s1096_s21 }
  0x20   : > { %p923_p12 = scmp.ne.s32.totalorder %s1096_s21, %s922_s5  ;;  %p931_p10 = scmp.lt.s32.totalorder %s922_s5, %s922_s5 }
  0x22   : > { %p925_p8 = pnand %p923_p12, %p911_p4  ;;  %p932_p0 = por %p931_p10, %p930_p3 }
  0x24   : > { %p926_p7 = pneg %p925_p8 }
  0x26   : > { %p933_p1 = pnand %p932_p0, %p926_p7 }
  0x28   : > { %936 = shalt.err (!%p933_p1)
}
  0x29   : > { %s1024_s6 = smov 128   ;;  %s1025_s7 = smov 8  }
  0x2a   : > { %849 = dma.hbm_to_vmem [thread:$0]  (!%p1103_p13), %s1280_s0, 2048, %s1096_s21, [#allocation4], %s1024_s6, %s1024_s6, %s1025_s7  }
  0x2b   : > { %s72_s15 = sadd.s32 1, %s1009_s11  ;;  %p1295_p3 = scmp.ne.s32.totalorder %s1294_s25, 0 }
  0x2c   : > { %s154_s20 = sand.u32 1, %s1009_s11   ;;  %s695_s26 = sshll.u32 %s1017_s13, 7 }
  0x2d   : > { %s1307_s24 = smov (%p1295_p3, %s31_s24), 0  ;;  %s694_s28 = sshll.u32 %s154_s20, 7 }
  0x2e   : > { %s68_s27 = ssub.s32 %s1017_s13, %s1307_s24  ;;  %s1152_s30 = scalar_lea.hbm %s1281_s1, %s695_s26 }
  0x2f   : > { %p70_p7 = scmp.eq.s32.totalorder %s68_s27, 0  ;;  %s158_s25 = scalar_lea.vmem [#allocation5], %s694_s28 }
  0x30   : > { %s167_s3 = sshll.u32 %s158_s25, 4  ;;  %s1159_s4 = scalar_lea.sflag [#allocation6], %s154_s20  ;;  %s1157_s3 = int_to_ptr.vmem [resolvable:$true] %s167_s3 }
  0x31   : > { %s1155_s21 = scalar_select %p70_p7, %s1009_s11, %s72_s15  }
  0x32   : > { %s937_s5 = scalar_lea.hbm %s1152_s30, 2048  ;;  %p1296_p10 = scmp.ne.s32.totalorder %s1293_s23, 0 }
  0x33   : > { %p938_p8 = scmp.ne.s32.totalorder %s1152_s30, %s937_s5  ;;  %s942_s26 = scalar_lea.hbm %s1281_s1, 6144 }
  0x34   : > { %p939_p13 = pneg %p1296_p10  ;;  %p943_p2 = scmp.lt.u32.totalorder %s1152_s30, %s1281_s1 }
  0x35   : > { %p944_p4 = scmp.lt.u32.totalorder %s942_s26, %s937_s5  ;;  %p946_p5 = scmp.lt.u32.totalorder %s937_s5, %s1152_s30 }
  0x36   : > { %p940_p0 = pnand %p939_p13, %p938_p8 }
  0x37   : > { %p945_p6 = por %p944_p4, %p943_p2 }
  0x38   : > { %p941_p1 = pneg %p940_p0 }
  0x39   : > { %p947_p9 = por %p946_p5, %p945_p6 }
  0x3b   : > { %p948_p11 = pnand %p947_p9, %p941_p1 }
  0x3d   : > { %951 = shalt.err (!%p948_p11)
}
  0x3e   : > { %s952_s20 = scalar_lea.vmem %s1157_s3, 2048  ;;  %s1026_s28 = smov [#allocation5]  }
  0x3f   : > { %p953_p12 = scmp.ne.s32.totalorder %s1157_s3, %s952_s20  ;;  %s957_s22 = sshll.u32 %s1026_s28, 4  ;;  %s958_s22 = int_to_ptr.vmem [resolvable:$false] %s957_s22 }
  0x40   : > { %s959_s29 = scalar_lea.vmem %s958_s22, 4096  ;;  %p960_p8 = scmp.lt.s32.totalorder %s1157_s3, %s958_s22 }
  0x41   : > { %p955_p3 = pnand %p953_p12, %p939_p13  ;;  %p961_p0 = scmp.lt.s32.totalorder %s959_s29, %s952_s20 }
  0x43   : > { %p956_p7 = pneg %p955_p3  ;;  %p962_p2 = por %p961_p0, %p960_p8 }
  0x45   : > { %p963_p4 = pnand %p962_p2, %p956_p7 }
  0x47   : > { %966 = shalt.err (!%p963_p4)
}
  0x48   : > { %s1027_s25 = smov 384   ;;  %p1297_p13 = scmp.ne.s32.totalorder %s1291_s19, 0 }
  0x49   : > { %853 = dma.hbm_to_vmem [thread:$0]  (!%p1296_p10), %s1152_s30, 2048, %s1157_s3, %s1159_s4, %s1027_s25, %s1024_s6, %s1025_s7  }
  0x4a   : > { %179 = sbr.rel (%p1297_p13) target bundleno = 356 (0x164), region = 28  ;;  %p1298_p1 = scmp.ne.s32.totalorder (!%p1297_p13), %s1288_s16, 0 }
  0x51   : > { %992 = dma.done.wait (%p1298_p1), [#allocation4], 2048  }
  0x52   : > { %994 = vsyncadd (%p1298_p1), [#allocation4], 4294965248  ;;  %s185_s5 = sand.u32 1, %s1005_s10   ;;  %p1299_p6 = scmp.ne.s32.totalorder %s1289_s17, 0 }
  0x53   : > { %s1196_s8 = sshll.u32 %s185_s5, 7  ;;  %s186_s23 = scalar_lea.sflag [#allocation6], %s185_s5 }
  0x54   : > { %s1199_s9 = scalar_lea.vmem [#allocation5], %s1196_s8 }
  0x55   : > { %996 = dma.done.wait (%p1299_p6), %s186_s23, 2048  }
  0x56   : > { %998 = vsyncadd (%p1299_p6), %s186_s23, 4294965248  ;;  %v264_v0 = vld [vmem:[%s1199_s9] sm:$0xff]  ;;  %v265_v1 = vld [vmem:[%s1199_s9 + $0x8] sm:$0xff]  ;;  %s1222_s16 = scalar_lea.vmem [#allocation7], %s1196_s8  ;;  %p1300_p10 = scmp.ne.s32.totalorder %s1290_s18, 0 }
  0x57   : > { %v266_v2 = vld [vmem:[%s1199_s9 + $0x10] sm:$0xff]  ;;  %v792_v3 = vpack.c.bf16 %v265_v1, %v264_v0  ;;  %v267_v4 = vld [vmem:[%s1199_s9 + $0x18] sm:$0xff]  ;;  %v268_v6 = vld [vmem:[%s1199_s9 + $0x20] sm:$0xff]  ;;  %s701_s17 = sshll.u32 (%p1300_p10), %s1013_s12, 3 }
  0x58   : > { %v796_v5 = vpack.c.bf16 %v267_v4, %v266_v2  ;;  %v269_v7 = vld [vmem:[%s1199_s9 + $0x28] sm:$0xff]  ;;  %v248_v9 = vld [vmem:[#allocation3] sm:$0xff]  ;;  %v270_v11 = vld [vmem:[%s1199_s9 + $0x30] sm:$0xff]  ;;  %s503_s7 = scalar_lea.vmem (%p1300_p10), %s1282_s2, %s701_s17 }
  0x59   : > { %793 = vmatprep.subr.bf16.mxu0 %v792_v3  ;;  %824 = vmatprep.subr.bf16.mxu1 %v792_v3  ;;  %v800_v8 = vpack.c.bf16 %v269_v7, %v268_v6  ;;  %v256_v10 = vld [vmem:[#allocation3 + $0x40] sm:$0xff]  ;;  %v271_v12 = vld [vmem:[%s1199_s9 + $0x38] sm:$0xff]  ;;  %v273_v15 = vld [vmem:[%s1199_s9 + $0x48] sm:$0xff] }
  0x5a   : > { %795 = vmatpush3.bf16.msra.mxu0 %v792_v3  ;;  %832 = vmatpush3.bf16.msra.mxu1 %v792_v3  ;;  %v804_v13 = vpack.c.bf16 %v271_v12, %v270_v11  ;;  %v272_v14 = vld [vmem:[%s1199_s9 + $0x40] sm:$0xff]  ;;  %v274_v17 = vld [vmem:[%s1199_s9 + $0x50] sm:$0xff]  ;;  %v275_v18 = vld [vmem:[%s1199_s9 + $0x58] sm:$0xff] }
  0x5b   : > { %797 = vmatprep.subr.bf16.mxu0 %v796_v5  ;;  %825 = vmatprep.subr.bf16.mxu1 %v796_v5  ;;  %v808_v16 = vpack.c.bf16 %v273_v15, %v272_v14  ;;  %v812_v19 = vpack.c.bf16 %v275_v18, %v274_v17  ;;  %v276_v20 = vld [vmem:[%s1199_s9 + $0x60] sm:$0xff]  ;;  %v277_v21 = vld [vmem:[%s1199_s9 + $0x68] sm:$0xff]  ;;  %v278_v23 = vld [vmem:[%s1199_s9 + $0x70] sm:$0xff] }
  0x5c   : > { %768 = vmatprep.mubr.f32.mxu0 %v248_v9  ;;  %780 = vmatprep.mubr.f32.mxu1 %v256_v10  ;;  %v816_v22 = vpack.c.bf16 %v277_v21, %v276_v20  ;;  %v279_v24 = vld [vmem:[%s1199_s9 + $0x78] sm:$0xff]  ;;  %v249_v26 = vld [vmem:[#allocation3 + $0x8] sm:$0xff]  ;;  %v250_v28 = vld [vmem:[#allocation3 + $0x10] sm:$0xff] }
  0x5d   : > { %v820_v25 = vpack.c.bf16 %v279_v24, %v278_v23  ;;  %v257_v27 = vld [vmem:[#allocation3 + $0x48] sm:$0xff]  ;;  %v258_v29 = vld [vmem:[#allocation3 + $0x50] sm:$0xff]  ;;  %v251_v30 = vld [vmem:[#allocation3 + $0x18] sm:$0xff] }
  0x5e   : > { %799 = vmatpush3.bf16.msra.mxu0 %v796_v5  ;;  %833 = vmatpush3.bf16.msra.mxu1 %v796_v5  ;;  %v259_v31 = vld [vmem:[#allocation3 + $0x58] sm:$0xff]  ;;  %v252_v32 = vld [vmem:[#allocation3 + $0x20] sm:$0xff]  ;;  %v253_v34 = vld [vmem:[#allocation3 + $0x28] sm:$0xff] }
  0x5f   : > { %801 = vmatprep.subr.bf16.mxu0 %v800_v8  ;;  %826 = vmatprep.subr.bf16.mxu1 %v800_v8  ;;  %v260_v33 = vld [vmem:[#allocation3 + $0x60] sm:$0xff]  ;;  %v261_v35 = vld [vmem:[#allocation3 + $0x68] sm:$0xff]  ;;  %v254_v36 = vld [vmem:[#allocation3 + $0x30] sm:$0xff] }
  0x60   : > { %v262_v37 = vld [vmem:[#allocation3 + $0x70] sm:$0xff]  ;;  %v255_v38 = vld [vmem:[#allocation3 + $0x38] sm:$0xff] }
  0x61   : > { %v263_v39 = vld [vmem:[#allocation3 + $0x78] sm:$0xff] }
  0x62   : > { %803 = vmatpush3.bf16.msra.mxu0 %v800_v8  ;;  %834 = vmatpush3.bf16.msra.mxu1 %v800_v8 }
  0x63   : > { %805 = vmatprep.subr.bf16.mxu0 %v804_v13  ;;  %827 = vmatprep.subr.bf16.mxu1 %v804_v13 }
  0x66   : > { %807 = vmatpush3.bf16.msra.mxu0 %v804_v13  ;;  %835 = vmatpush3.bf16.msra.mxu1 %v804_v13 }
  0x67   : > { %809 = vmatprep.subr.bf16.mxu0 %v808_v16  ;;  %828 = vmatprep.subr.bf16.mxu1 %v808_v16 }
  0x6a   : > { %811 = vmatpush3.bf16.msra.mxu0 %v808_v16  ;;  %836 = vmatpush3.bf16.msra.mxu1 %v808_v16 }
  0x6b   : > { %813 = vmatprep.subr.bf16.mxu0 %v812_v19  ;;  %829 = vmatprep.subr.bf16.mxu1 %v812_v19 }
  0x6e   : > { %815 = vmatpush3.bf16.msra.mxu0 %v812_v19  ;;  %837 = vmatpush3.bf16.msra.mxu1 %v812_v19 }
  0x6f   : > { %817 = vmatprep.subr.bf16.mxu0 %v816_v22  ;;  %830 = vmatprep.subr.bf16.mxu1 %v816_v22 }
  0x72   : > { %819 = vmatpush3.bf16.msra.mxu0 %v816_v22  ;;  %838 = vmatpush3.bf16.msra.mxu1 %v816_v22 }
  0x73   : > { %821 = vmatprep.subr.bf16.mxu0 %v820_v25  ;;  %831 = vmatprep.subr.bf16.mxu1 %v820_v25 }
  0x76   : > { %823 = vmatpush3.bf16.msra.mxu0 %v820_v25  ;;  %839 = vmatpush3.bf16.msra.mxu1 %v820_v25 }
  0x79   : > { %769 = vmatmul.mubr.f32.vlgmr.msra.gmra.mrb[0].mxu0 %v249_v26  ;;  %781 = vmatmul.mubr.f32.vlgmr.msra.gmra.mrb[0].mxu1 %v257_v27 }
  0x7a   : > { %771 = vmatprep.mubr.f32.mxu0 %v250_v28  ;;  %783 = vmatprep.mubr.f32.mxu1 %v258_v29 }
  0x7d   : > { %772 = vmatmul.mubr.f32.gmra.mrb[2].mxu0 %v251_v30  ;;  %784 = vmatmul.mubr.f32.gmra.mrb[2].mxu1 %v259_v31 }
  0x7e   : > { %774 = vmatprep.mubr.f32.mxu0 %v252_v32  ;;  %786 = vmatprep.mubr.f32.mxu1 %v260_v33 }
  0x81   : > { %775 = vmatmul.mubr.f32.gmra.mrb[4].mxu0 %v253_v34  ;;  %787 = vmatmul.mubr.f32.gmra.mrb[4].mxu1 %v261_v35 }
  0x82   : > { %777 = vmatprep.mubr.f32.mxu0 %v254_v36  ;;  %789 = vmatprep.mubr.f32.mxu1 %v262_v37 }
  0x85   : > { %778 = vmatmul.mubr.f32.gmra.mrb[6].mxu0 %v255_v38  ;;  %790 = vmatmul.mubr.f32.gmra.mrb[6].mxu1 %v263_v39 }
 0x14c   : > { %v770_v40 = vpop.f32.mrb[0].mxu0  ;;  %v782_v41 = vpop.f32.mrb[0].mxu1 }
 0x14d   : > { %477 = vst [vmem:[%s1222_s16 + $0x8] sm:$0xff] %v770_v40  ;;  %485 = vst [vmem:[%s1222_s16 + $0x48] sm:$0xff] %v782_v41  ;;  %v346_v42 = vpop.f32.mrb[1].mxu0  ;;  %v386_v43 = vpop.f32.mrb[1].mxu1 }
 0x14e   : > { %476 = vst [vmem:[%s1222_s16] sm:$0xff] %v346_v42  ;;  %484 = vst [vmem:[%s1222_s16 + $0x40] sm:$0xff] %v386_v43 }
 0x150   : > { %v773_v44 = vpop.f32.mrb[2].mxu0  ;;  %v785_v45 = vpop.f32.mrb[2].mxu1 }
 0x151   : > { %479 = vst [vmem:[%s1222_s16 + $0x18] sm:$0xff] %v773_v44  ;;  %487 = vst [vmem:[%s1222_s16 + $0x58] sm:$0xff] %v785_v45  ;;  %v356_v46 = vpop.f32.mrb[3].mxu0  ;;  %v396_v47 = vpop.f32.mrb[3].mxu1 }
 0x152   : > { %478 = vst [vmem:[%s1222_s16 + $0x10] sm:$0xff] %v356_v46  ;;  %486 = vst [vmem:[%s1222_s16 + $0x50] sm:$0xff] %v396_v47 }
 0x154   : > { %v776_v48 = vpop.f32.mrb[4].mxu0  ;;  %v788_v49 = vpop.f32.mrb[4].mxu1  ;;  %498 = sbr.rel (!%p1300_p10) target bundleno = 356 (0x164), region = 48  ;;  %v563_v57 = vld [vmem:[%s1222_s16 + $0x8] sm:$0xff] (%p1300_p10) }
 0x155   : > { %481 = vst [vmem:[%s1222_s16 + $0x28] sm:$0xff] %v776_v48  ;;  %489 = vst [vmem:[%s1222_s16 + $0x68] sm:$0xff] %v788_v49  ;;  %v366_v50 = vpop.f32.mrb[5].mxu0  ;;  %v406_v51 = vpop.f32.mrb[5].mxu1  ;;  %v561_v56 = vld [vmem:[%s1222_s16] sm:$0xff] (%p1300_p10)  ;;  %v579_v1 = vld [vmem:[%s1222_s16 + $0x48] sm:$0xff] (%p1300_p10) }
 0x156   : > { %480 = vst [vmem:[%s1222_s16 + $0x20] sm:$0xff] %v366_v50  ;;  %488 = vst [vmem:[%s1222_s16 + $0x60] sm:$0xff] %v406_v51  ;;  %v577_v0 = vld [vmem:[%s1222_s16 + $0x40] sm:$0xff] (%p1300_p10) }
 0x157   : > { %562 = vst [vmem:[%s503_s7] sm:$0xff] (%p1300_p10), %v561_v56  ;;  %564 = vst [vmem:[%s503_s7 + $0x18] sm:$0xff] (%p1300_p10), %v563_v57 }
 0x158   : > { %v779_v52 = vpop.f32.mrb[6].mxu0  ;;  %v791_v53 = vpop.f32.mrb[6].mxu1  ;;  %v567_v59 = vld [vmem:[%s1222_s16 + $0x18] sm:$0xff] (%p1300_p10)  ;;  %578 = vst [vmem:[%s503_s7 + $0xc0] sm:$0xff] (%p1300_p10), %v577_v0  ;;  %580 = vst [vmem:[%s503_s7 + $0xd8] sm:$0xff] (%p1300_p10), %v579_v1 }
 0x159   : > { %483 = vst [vmem:[%s1222_s16 + $0x38] sm:$0xff] %v779_v52  ;;  %491 = vst [vmem:[%s1222_s16 + $0x78] sm:$0xff] %v791_v53  ;;  %v376_v54 = vpop.f32.mrb[7].mxu0  ;;  %v416_v55 = vpop.f32.mrb[7].mxu1  ;;  %v565_v58 = vld [vmem:[%s1222_s16 + $0x10] sm:$0xff] (%p1300_p10)  ;;  %v583_v3 = vld [vmem:[%s1222_s16 + $0x58] sm:$0xff] (%p1300_p10) }
 0x15a   : > { %482 = vst [vmem:[%s1222_s16 + $0x30] sm:$0xff] %v376_v54  ;;  %490 = vst [vmem:[%s1222_s16 + $0x70] sm:$0xff] %v416_v55  ;;  %v581_v2 = vld [vmem:[%s1222_s16 + $0x50] sm:$0xff] (%p1300_p10) }
 0x15b   : > { %566 = vst [vmem:[%s503_s7 + $0x30] sm:$0xff] %v565_v58  ;;  %568 = vst [vmem:[%s503_s7 + $0x48] sm:$0xff] %v567_v59 }
 0x15c   : > { %v571_v61 = vld [vmem:[%s1222_s16 + $0x28] sm:$0xff]  ;;  %582 = vst [vmem:[%s503_s7 + $0xf0] sm:$0xff] %v581_v2  ;;  %584 = vst [vmem:[%s503_s7 + $0x108] sm:$0xff] %v583_v3 }
 0x15d   : > { %v569_v60 = vld [vmem:[%s1222_s16 + $0x20] sm:$0xff]  ;;  %572 = vst [vmem:[%s503_s7 + $0x78] sm:$0xff] %v571_v61  ;;  %v587_v5 = vld [vmem:[%s1222_s16 + $0x68] sm:$0xff] }
 0x15e   : > { %570 = vst [vmem:[%s503_s7 + $0x60] sm:$0xff] %v569_v60  ;;  %v585_v4 = vld [vmem:[%s1222_s16 + $0x60] sm:$0xff]  ;;  %588 = vst [vmem:[%s503_s7 + $0x138] sm:$0xff] %v587_v5 }
 0x15f   : > { %586 = vst [vmem:[%s503_s7 + $0x120] sm:$0xff] %v585_v4 }
 0x160   : > { %v575_v63 = vld [vmem:[%s1222_s16 + $0x38] sm:$0xff] }
 0x161   : > { %v573_v62 = vld [vmem:[%s1222_s16 + $0x30] sm:$0xff]  ;;  %576 = vst [vmem:[%s503_s7 + $0xa8] sm:$0xff] %v575_v63  ;;  %v591_v7 = vld [vmem:[%s1222_s16 + $0x78] sm:$0xff] }
 0x162   : > { %574 = vst [vmem:[%s503_s7 + $0x90] sm:$0xff] %v573_v62  ;;  %v589_v6 = vld [vmem:[%s1222_s16 + $0x70] sm:$0xff]  ;;  %592 = vst [vmem:[%s503_s7 + $0x168] sm:$0xff] %v591_v7 }
 0x163   : > { %590 = vst [vmem:[%s503_s7 + $0x150] sm:$0xff] %v589_v6 }
 0x164 PF: > { %s16_s14 = sadd.s32 1, %s1021_s14   ;;  %s1301_s9 = smov %s1005_s10 }
 0x165   : > { %p13_p5 = scmp.ge.s32.totalorder %s16_s14, 5   ;;  %s1302_s10 = smov %s1009_s11 }
 0x166   : > { %s1303_s11 = smov %s1155_s21  ;;  %s1304_s12 = smov %s1017_s13 }
 0x167   : > { %s1305_s13 = smov %s1307_s24  ;;  %15 = sbr.rel (!%p13_p5) target bundleno = 5 (0x5), region = 120 }
 0x16e   :  { %608 = vsyncpa [#allocation4], 1 }
 0x16f   :  { %610 = vsyncpa [#allocation4 + $0x1], 1 }
 0x170   :  { %611 = vsyncpa [#allocation6], 1 }
 0x171   :  { %613 = vsyncpa [#allocation6 + $0x1], 1 }

// kernel: attention_forward.5
= control target key start
LH: loop header
LB: loop body
LE: loop exit
PB: predicated region body
PF: predicated region fallthrough
CT: control target
= control target key end

     0   :  { %s632_s0 = inlined_call_operand.vmem [shape: f32[128,128], index: 0, kind: input, shape index: {}]   ;;  %s633_s1 = inlined_call_operand.vmem [shape: f32[128,128], index: 1, kind: input, shape index: {}]   ;;  %s634_s2 = inlined_call_operand.vmem [shape: f32[1,128], index: 2, kind: input, shape index: {}]   ;;  %s635_s3 = inlined_call_operand.hbm [shape: f32[128,128], index: 3, kind: output, shape index: {}]  }
   0x1   :  { %v67_v0 = vld [vmem:[%s633_s1] sm:$0xff]  ;;  %v68_v1 = vld [vmem:[%s633_s1 + $0x8] sm:$0xff]  ;;  %v69_v2 = vld [vmem:[%s633_s1 + $0x10] sm:$0xff] }
   0x2   :  { %v423_v3 = vpack.c.bf16 %v68_v1, %v67_v0  ;;  %v70_v4 = vld [vmem:[%s633_s1 + $0x18] sm:$0xff]  ;;  %v71_v6 = vld [vmem:[%s633_s1 + $0x20] sm:$0xff]  ;;  %v72_v7 = vld [vmem:[%s633_s1 + $0x28] sm:$0xff] }
   0x3   :  { %v427_v5 = vpack.c.bf16 %v70_v4, %v69_v2  ;;  %v431_v8 = vpack.c.bf16 %v72_v7, %v71_v6  ;;  %v51_v9 = vld [vmem:[%s632_s0] sm:$0xff]  ;;  %v73_v11 = vld [vmem:[%s633_s1 + $0x30] sm:$0xff]  ;;  %v74_v12 = vld [vmem:[%s633_s1 + $0x38] sm:$0xff] }
   0x4   :  { %424 = vmatprep.subr.bf16.mxu0 %v423_v3  ;;  %455 = vmatprep.subr.bf16.mxu1 %v423_v3  ;;  %v59_v10 = vld [vmem:[%s632_s0 + $0x40] sm:$0xff]  ;;  %v435_v13 = vpack.c.bf16 %v74_v12, %v73_v11  ;;  %v76_v15 = vld [vmem:[%s633_s1 + $0x48] sm:$0xff] }
   0x5   :  { %426 = vmatpush3.bf16.msra.mxu0 %v423_v3  ;;  %463 = vmatpush3.bf16.msra.mxu1 %v423_v3  ;;  %v75_v14 = vld [vmem:[%s633_s1 + $0x40] sm:$0xff] }
   0x6   :  { %428 = vmatprep.subr.bf16.mxu0 %v427_v5  ;;  %456 = vmatprep.subr.bf16.mxu1 %v427_v5 }
   0x7   :  { %399 = vmatprep.mubr.f32.mxu0 %v51_v9  ;;  %411 = vmatprep.mubr.f32.mxu1 %v59_v10 }
   0x9   :  { %430 = vmatpush3.bf16.msra.mxu0 %v427_v5  ;;  %464 = vmatpush3.bf16.msra.mxu1 %v427_v5 }
   0xa   :  { %432 = vmatprep.subr.bf16.mxu0 %v431_v8  ;;  %457 = vmatprep.subr.bf16.mxu1 %v431_v8 }
   0xb   :  { %8 = vsyncpa [#allocation4], 0  ;;  %v439_v16 = vpack.c.bf16 %v76_v15, %v75_v14  ;;  %v77_v17 = vld [vmem:[%s633_s1 + $0x50] sm:$0xff]  ;;  %v78_v18 = vld [vmem:[%s633_s1 + $0x58] sm:$0xff] }
   0xc   :  { %v443_v19 = vpack.c.bf16 %v78_v18, %v77_v17  ;;  %v79_v20 = vld [vmem:[%s633_s1 + $0x60] sm:$0xff]  ;;  %v80_v21 = vld [vmem:[%s633_s1 + $0x68] sm:$0xff]  ;;  %v81_v23 = vld [vmem:[%s633_s1 + $0x70] sm:$0xff] }
   0xd   :  { %434 = vmatpush3.bf16.msra.mxu0 %v431_v8  ;;  %465 = vmatpush3.bf16.msra.mxu1 %v431_v8  ;;  %v447_v22 = vpack.c.bf16 %v80_v21, %v79_v20  ;;  %v82_v24 = vld [vmem:[%s633_s1 + $0x78] sm:$0xff]  ;;  %v52_v26 = vld [vmem:[%s632_s0 + $0x8] sm:$0xff]  ;;  %v53_v28 = vld [vmem:[%s632_s0 + $0x10] sm:$0xff] }
   0xe   :  { %436 = vmatprep.subr.bf16.mxu0 %v435_v13  ;;  %458 = vmatprep.subr.bf16.mxu1 %v435_v13  ;;  %v451_v25 = vpack.c.bf16 %v82_v24, %v81_v23  ;;  %v60_v27 = vld [vmem:[%s632_s0 + $0x48] sm:$0xff]  ;;  %v61_v29 = vld [vmem:[%s632_s0 + $0x50] sm:$0xff]  ;;  %v54_v30 = vld [vmem:[%s632_s0 + $0x18] sm:$0xff] }
   0xf   :  { %v62_v31 = vld [vmem:[%s632_s0 + $0x58] sm:$0xff]  ;;  %v55_v32 = vld [vmem:[%s632_s0 + $0x20] sm:$0xff]  ;;  %v56_v34 = vld [vmem:[%s632_s0 + $0x28] sm:$0xff] }
  0x10   :  { %v63_v33 = vld [vmem:[%s632_s0 + $0x60] sm:$0xff]  ;;  %v64_v35 = vld [vmem:[%s632_s0 + $0x68] sm:$0xff]  ;;  %v57_v36 = vld [vmem:[%s632_s0 + $0x30] sm:$0xff] }
  0x11   :  { %438 = vmatpush3.bf16.msra.mxu0 %v435_v13  ;;  %466 = vmatpush3.bf16.msra.mxu1 %v435_v13  ;;  %v65_v37 = vld [vmem:[%s632_s0 + $0x70] sm:$0xff]  ;;  %v58_v38 = vld [vmem:[%s632_s0 + $0x38] sm:$0xff]  ;;  %v334_v40 = vld [vmem:[%s634_s2] ss:$0 sm:$0xff] }
  0x12   :  { %440 = vmatprep.subr.bf16.mxu0 %v439_v16  ;;  %459 = vmatprep.subr.bf16.mxu1 %v439_v16  ;;  %v66_v39 = vld [vmem:[%s632_s0 + $0x78] sm:$0xff]  ;;  %s498_s0 = smov [#allocation3]  }
  0x13   :  { %s323_s2 = sshll.u32 %s498_s0, 4  ;;  %s324_s2 = int_to_ptr.vmem [resolvable:$true] %s323_s2 }
  0x14   :  { %s474_s23 = scalar_lea.vmem %s324_s2, 2048  ;;  %p479_p1 = scmp.lt.s32.totalorder %s324_s2, %s324_s2 }
  0x15   :  { %442 = vmatpush3.bf16.msra.mxu0 %v439_v16  ;;  %467 = vmatpush3.bf16.msra.mxu1 %v439_v16  ;;  %p475_p0 = scmp.ne.s32.totalorder %s324_s2, %s474_s23  ;;  %p480_p2 = scmp.lt.s32.totalorder %s474_s23, %s474_s23 }
  0x16   :  { %444 = vmatprep.subr.bf16.mxu0 %v443_v19  ;;  %460 = vmatprep.subr.bf16.mxu1 %v443_v19 }
  0x17   :  { %p481_p3 = por %p480_p2, %p479_p1 }
  0x19   :  { %446 = vmatpush3.bf16.msra.mxu0 %v443_v19  ;;  %468 = vmatpush3.bf16.msra.mxu1 %v443_v19  ;;  %p482_p4 = pnand %p481_p3, %p475_p0 }
  0x1a   :  { %448 = vmatprep.subr.bf16.mxu0 %v447_v22  ;;  %461 = vmatprep.subr.bf16.mxu1 %v447_v22 }
  0x1d   :  { %450 = vmatpush3.bf16.msra.mxu0 %v447_v22  ;;  %469 = vmatpush3.bf16.msra.mxu1 %v447_v22 }
  0x1e   :  { %452 = vmatprep.subr.bf16.mxu0 %v451_v25  ;;  %462 = vmatprep.subr.bf16.mxu1 %v451_v25 }
  0x21   :  { %454 = vmatpush3.bf16.msra.mxu0 %v451_v25  ;;  %470 = vmatpush3.bf16.msra.mxu1 %v451_v25 }
  0x24   :  { %400 = vmatmul.mubr.f32.vlgmr.msra.gmra.mrb[0].mxu0 %v52_v26  ;;  %412 = vmatmul.mubr.f32.vlgmr.msra.gmra.mrb[0].mxu1 %v60_v27 }
  0x25   :  { %402 = vmatprep.mubr.f32.mxu0 %v53_v28  ;;  %414 = vmatprep.mubr.f32.mxu1 %v61_v29 }
  0x28   :  { %403 = vmatmul.mubr.f32.gmra.mrb[2].mxu0 %v54_v30  ;;  %415 = vmatmul.mubr.f32.gmra.mrb[2].mxu1 %v62_v31 }
  0x29   :  { %405 = vmatprep.mubr.f32.mxu0 %v55_v32  ;;  %417 = vmatprep.mubr.f32.mxu1 %v63_v33 }
  0x2c   :  { %406 = vmatmul.mubr.f32.gmra.mrb[4].mxu0 %v56_v34  ;;  %418 = vmatmul.mubr.f32.gmra.mrb[4].mxu1 %v64_v35 }
  0x2d   :  { %408 = vmatprep.mubr.f32.mxu0 %v57_v36  ;;  %420 = vmatprep.mubr.f32.mxu1 %v65_v37 }
  0x30   :  { %409 = vmatmul.mubr.f32.gmra.mrb[6].mxu0 %v58_v38  ;;  %421 = vmatmul.mubr.f32.gmra.mrb[6].mxu1 %v66_v39 }
  0xf7   :  { %v401_v41 = vpop.f32.mrb[0].mxu0  ;;  %v413_v42 = vpop.f32.mrb[0].mxu1 }
  0xf8   :  { %v287_v43 = vadd.f32 %v401_v41, %v334_v40  ;;  %v295_v44 = vadd.f32 %v413_v42, %v334_v40  ;;  %v149_v45 = vpop.f32.mrb[1].mxu0  ;;  %v189_v46 = vpop.f32.mrb[1].mxu1 }
  0xf9   :  { %v286_v47 = vadd.f32 %v334_v40, %v149_v45  ;;  %v294_v48 = vadd.f32 %v334_v40, %v189_v46 }
  0xfa   :  { %303 = vst [vmem:[#allocation3 + $0x8] sm:$0xff] %v287_v43  ;;  %311 = vst [vmem:[#allocation3 + $0x48] sm:$0xff] %v295_v44 }
  0xfb   :  { %302 = vst [vmem:[#allocation3] sm:$0xff] %v286_v47  ;;  %310 = vst [vmem:[#allocation3 + $0x40] sm:$0xff] %v294_v48  ;;  %v404_v49 = vpop.f32.mrb[2].mxu0  ;;  %v416_v50 = vpop.f32.mrb[2].mxu1 }
  0xfc   :  { %v289_v51 = vadd.f32 %v404_v49, %v334_v40  ;;  %v297_v52 = vadd.f32 %v416_v50, %v334_v40  ;;  %v159_v53 = vpop.f32.mrb[3].mxu0  ;;  %v199_v54 = vpop.f32.mrb[3].mxu1 }
  0xfd   :  { %v288_v55 = vadd.f32 %v334_v40, %v159_v53  ;;  %v296_v56 = vadd.f32 %v334_v40, %v199_v54 }
  0xfe   :  { %305 = vst [vmem:[#allocation3 + $0x18] sm:$0xff] %v289_v51  ;;  %313 = vst [vmem:[#allocation3 + $0x58] sm:$0xff] %v297_v52 }
  0xff   :  { %304 = vst [vmem:[#allocation3 + $0x10] sm:$0xff] %v288_v55  ;;  %312 = vst [vmem:[#allocation3 + $0x50] sm:$0xff] %v296_v56  ;;  %v407_v57 = vpop.f32.mrb[4].mxu0  ;;  %v419_v58 = vpop.f32.mrb[4].mxu1 }
 0x100   :  { %v291_v59 = vadd.f32 %v407_v57, %v334_v40  ;;  %v299_v60 = vadd.f32 %v419_v58, %v334_v40  ;;  %v169_v61 = vpop.f32.mrb[5].mxu0  ;;  %v209_v62 = vpop.f32.mrb[5].mxu1 }
 0x101   :  { %v290_v63 = vadd.f32 %v334_v40, %v169_v61  ;;  %v298_v0 = vadd.f32 %v334_v40, %v209_v62 }
 0x102   :  { %307 = vst [vmem:[#allocation3 + $0x28] sm:$0xff] %v291_v59  ;;  %315 = vst [vmem:[#allocation3 + $0x68] sm:$0xff] %v299_v60 }
 0x103   :  { %306 = vst [vmem:[#allocation3 + $0x20] sm:$0xff] %v290_v63  ;;  %314 = vst [vmem:[#allocation3 + $0x60] sm:$0xff] %v298_v0  ;;  %v410_v1 = vpop.f32.mrb[6].mxu0  ;;  %v422_v2 = vpop.f32.mrb[6].mxu1 }
 0x104   :  { %v293_v3 = vadd.f32 %v410_v1, %v334_v40  ;;  %v301_v4 = vadd.f32 %v422_v2, %v334_v40  ;;  %v179_v5 = vpop.f32.mrb[7].mxu0  ;;  %v219_v6 = vpop.f32.mrb[7].mxu1 }
 0x105   :  { %v292_v7 = vadd.f32 %v334_v40, %v179_v5  ;;  %v300_v8 = vadd.f32 %v334_v40, %v219_v6 }
 0x106   :  { %309 = vst [vmem:[#allocation3 + $0x38] sm:$0xff] %v293_v3  ;;  %317 = vst [vmem:[#allocation3 + $0x78] sm:$0xff] %v301_v4 }
 0x107   :  { %308 = vst [vmem:[#allocation3 + $0x30] sm:$0xff] %v292_v7  ;;  %316 = vst [vmem:[#allocation3 + $0x70] sm:$0xff] %v300_v8 }
 0x108   :  { %485 = shalt.err (!%p482_p4)
}
 0x109   :  { %s486_s25 = scalar_lea.hbm %s635_s3, 2048 }
 0x10a   :  { %p487_p5 = scmp.ne.s32.totalorder %s635_s3, %s486_s25  ;;  %p490_p6 = scmp.lt.u32.totalorder %s486_s25, %s635_s3 }
 0x10c   :  { %p492_p7 = pnand %p490_p6, %p487_p5 }
 0x10e   :  { %495 = shalt.err (!%p492_p7)
}
 0x10f   :  { %s499_s30 = smov 128   ;;  %s500_s4 = smov 8  }
 0x110   :  { %329 = dma.vmem_to_hbm [thread:$0]  %s324_s2, 2048, %s635_s3, [#allocation4], %s499_s30, %s499_s30, %s500_s4  }
 0x111   :  { %496 = dma.done.wait [#allocation4], 2048  }
 0x112   :  { %497 = vsyncadd [#allocation4], 4294965248 }
 0x113   :  { %333 = vsyncpa [#allocation4], 1 }

// kernel: attention_forward.4
= control target key start
LH: loop header
LB: loop body
LE: loop exit
PB: predicated region body
PF: predicated region fallthrough
CT: control target
= control target key end

     0   :  { %s5647_s6 = smov 0   ;;  %s7279_s0 = inlined_call_operand.vmem [shape: f32[2,64,384], index: 0, kind: input, shape index: {}]   ;;  %s7280_s1 = inlined_call_operand.vmem [shape: f32[2,64,128], index: 1, kind: output, shape index: {}]  }
   0x1 LB: > { %s3803_s7 = sadd.s32 4294967295, %s5628_s6   ;;  %p3807_p0 = scmp.ge.s32.totalorder %s5628_s6, 1  ;;  %s5628_s6 = sphi %s5647_s6, %s11_s6  }
   0x2   : > { %p87_p1 = scmp.lt.s32.totalorder %s5628_s6, 3 }
   0x4   : > { %p88_p2 = pnand %p3807_p0, %p87_p1 }
   0x6   : > { %91 = sbr.rel (%p88_p2) target bundleno = 3849 (0xf09), region = 24 }
   0xd   : > { %p107_p3 = scmp.lt.s32.totalorder %s3803_s7, 1  ;;  %vm141_vm0 = vcmask 130048   ;;  %s5630_s12 = smov 112   ;;  %vm303_vm2 = vcmask 523264   ;;  %vm3687_vm3 = vcmask 261120   ;;  %vm3696_vm4 = vcmask 392192  }
   0xe   : > { %vm5665_vm1 = vmpackc.low %vm141_vm0, %vm141_vm0  ;;  %s5631_s13 = smov 96   ;;  %s5632_s14 = smov 80   ;;  %vm3713_vm5 = vcmask 654336   ;;  %vm3722_vm6 = vcmask 785408   ;;  %vm3731_vm7 = vcmask 916480  }
   0xf   : > { %s7418_s7 = smov (!%p107_p3, %s3803_s7), 1  ;;  %s5633_s15 = smov 64  }
  0x10   : > { %s5030_s8 = smul.u32 192, %s7418_s7  ;;  %s5634_s16 = smov 48  }
  0x11   : > { %s5635_s17 = smov 32   ;;  %s5636_s18 = smov 16  }
  0x12   : > { %s5661_s11 = scalar_lea.vmem %s7279_s0, %s5030_s8  ;;  %s4005_s19 = sshll.u32 %s7418_s7, 6 }
  0x13   : > { %v118_v1 = vld [vmem:[%s5661_s11 + $0x8] sm:$0xff]  ;;  %v121_v2 = vld [vmem:[%s5661_s11 + $0x20] sm:$0xff]  ;;  %v5672_v3 = vld [vmem:[%s5661_s11 + $0x38] sm:$0xff]  ;;  %s7230_s22 = scalar_lea.vmem %s7280_s1, %s4005_s19 }
  0x14   : > { %v4710_v4 = vpack.c.bf16 %v121_v2, %v118_v1  ;;  %v5675_v5 = vld [vmem:[%s5661_s11 + $0x50] sm:$0xff]  ;;  %v5677_v6 = vpack.i.bf16 %v121_v2, %v118_v1  ;;  %v5682_v8 = vld [vmem:[%s5661_s11] sm:$0xff]  ;;  %v5695_v9 = vld [vmem:[%s5661_s11 + $0x68] sm:$0xff] }
  0x15   : > { %v4716_v7 = vpack.c.bf16 %v5675_v5, %v5672_v3  ;;  %4278 = vmatprep.mubr.msk.f32.mxu0 %vm141_vm0, %v5682_v8  ;;  %v5698_v10 = vld [vmem:[%s5661_s11 + $0x80] sm:$0xff]  ;;  %v5707_v12 = vld [vmem:[%s5661_s11 + $0x98] sm:$0xff]  ;;  %v5710_v13 = vld [vmem:[%s5661_s11 + $0xb0] sm:$0xff]  ;;  %v5814_v1 = vpack.i.bf16 %v5675_v5, %v5672_v3 }
  0x16   : > { %4712 = vmatprep.subr.msk.bf16.mxu0 %vm5665_vm1, %v4710_v4  ;;  %5047 = vrot.lane.b32.xlu1 %v5677_v6, %s5630_s12  ;;  %v4722_v11 = vpack.c.bf16 %v5698_v10, %v5695_v9  ;;  %v4728_v14 = vpack.c.bf16 %v5710_v13, %v5707_v12  ;;  %v5721_v15 = vld [vmem:[%s5661_s11 + $0x18] sm:$0xff]  ;;  %v5724_v16 = vld [vmem:[%s5661_s11 + $0x30] sm:$0xff]  ;;  %v5731_v17 = vld [vmem:[%s5661_s11 + $0x48] sm:$0xff]  ;;  %v5802_v62 = vpack.i.bf16 %v5698_v10, %v5695_v9 }
  0x17   : > { %4715 = vmatpush3.bf16.xpose.msk.msra.mxu0 %vm5665_vm1, %v4710_v4  ;;  %v5734_v18 = vld [vmem:[%s5661_s11 + $0x60] sm:$0xff]  ;;  %v5741_v19 = vld [vmem:[%s5661_s11 + $0x78] sm:$0xff]  ;;  %v5744_v20 = vld [vmem:[%s5661_s11 + $0x90] sm:$0xff]  ;;  %v5808_v63 = vpack.i.bf16 %v5710_v13, %v5707_v12 }
  0x18   : > { %4718 = vmatprep.subr.msk.bf16.mxu0 %vm5665_vm1, %v4716_v7  ;;  %v5751_v21 = vld [vmem:[%s5661_s11 + $0xa8] sm:$0xff]  ;;  %v5756_v22 = vld [vmem:[%s5661_s11 + $0x10] sm:$0xff]  ;;  %v5762_v24 = vld [vmem:[%s5661_s11 + $0x40] sm:$0xff] }
  0x19   : > { %v5759_v23 = vld [vmem:[%s5661_s11 + $0x28] sm:$0xff]  ;;  %v5767_v26 = vld [vmem:[%s5661_s11 + $0x58] sm:$0xff]  ;;  %v5772_v28 = vld [vmem:[%s5661_s11 + $0x70] sm:$0xff] }
  0x1a   : > { %v4734_v25 = vpack.c.bf16 %v5759_v23, %v5756_v22  ;;  %v4738_v27 = vpack.c.bf16 %v5767_v26, %v5762_v24  ;;  %v5775_v29 = vld [vmem:[%s5661_s11 + $0x88] sm:$0xff]  ;;  %v5780_v32 = vld [vmem:[%s5661_s11 + $0xa0] sm:$0xff]  ;;  %v5783_v33 = vld [vmem:[%s5661_s11 + $0xb8] sm:$0xff]  ;;  %v5836_v2 = vpack.i.bf16 %v5759_v23, %v5756_v22  ;;  %v5840_v3 = vpack.i.bf16 %v5767_v26, %v5762_v24 }
  0x1b   : > { %v4742_v30 = vpack.c.bf16 %v5775_v29, %v5772_v28  ;;  %v4746_v36 = vpack.c.bf16 %v5783_v33, %v5780_v32  ;;  %v5848_v4 = vpack.i.bf16 %v5775_v29, %v5772_v28  ;;  %v5852_v5 = vpack.i.bf16 %v5783_v33, %v5780_v32 }
  0x1c   : > { %4735 = vmatprep.subr.bf16.mxu1 %v4734_v25 }
  0x1d   : > { %4737 = vmatpush3.bf16.msra.mxu1 %v4734_v25 }
  0x1e   : > { %4739 = vmatprep.subr.bf16.mxu1 %v4738_v27 }
  0x1f   : > { %4721 = vmatpush3.bf16.xpose.msk.msra.mxu0 %vm5665_vm1, %v4716_v7 }
  0x20   : > { %4724 = vmatprep.subr.msk.bf16.mxu0 %vm5665_vm1, %v4722_v11 }
  0x21   : > { %4741 = vmatpush3.bf16.msra.mxu1 %v4738_v27 }
  0x22   : > { %4743 = vmatprep.subr.bf16.mxu1 %v4742_v30 }
  0x25   : > { %4745 = vmatpush3.bf16.msra.mxu1 %v4742_v30 }
  0x26   : > { %4747 = vmatprep.subr.bf16.mxu1 %v4746_v36 }
  0x27   : > { %4727 = vmatpush3.bf16.xpose.msk.msra.mxu0 %vm5665_vm1, %v4722_v11 }
  0x28   : > { %4730 = vmatprep.subr.msk.bf16.mxu0 %vm5665_vm1, %v4728_v14 }
  0x29   : > { %4749 = vmatpush3.bf16.msra.mxu1 %v4746_v36 }
  0x2f   : > { %4733 = vmatpush3.bf16.xpose.msk.msra.mxu0 %vm5665_vm1, %v4728_v14 }
  0x36   : > { %4279 = vmatmul.mubr.msk.f32.vlgmr.msra.gmra.mrb[0].mxu0 %vm141_vm0, %v5721_v15 }
  0x37   : > { %4281 = vmatprep.mubr.msk.f32.mxu0 %vm141_vm0, %v5724_v16 }
  0x3a   : > { %4282 = vmatmul.mubr.msk.f32.gmra.mrb[2].mxu0 %vm141_vm0, %v5731_v17 }
  0x3b   : > { %4284 = vmatprep.mubr.msk.f32.mxu0 %vm141_vm0, %v5734_v18 }
  0x3e   : > { %4285 = vmatmul.mubr.msk.f32.gmra.mrb[4].mxu0 %vm141_vm0, %v5741_v19 }
  0x3f   : > { %4287 = vmatprep.mubr.msk.f32.mxu0 %vm141_vm0, %v5744_v20 }
  0x42   : > { %4288 = vmatmul.mubr.msk.f32.gmra.mrb[6].mxu0 %vm141_vm0, %v5751_v21 }
  0x88   : > { %v5048_v31 = vpop.permute.xlu1 %5047 }
  0x89   : > { %v5050_v34 = vunpack.i.h.bf16 %v5048_v31  ;;  %v5049_v35 = vunpack.i.l.bf16 %v5048_v31 }
  0x8b   : > { %v5787_v37 = vpack.c.bf16 %v5050_v34, %v5049_v35 }
  0x8d   : > { %4752 = vmatprep.subr.msk.bf16.mxu1 %vm5665_vm1, %v5787_v37 }
 0x109   : > { %v4280_v38 = vpop.f32.mrb[0].mxu0 }
 0x10a   : > { %v296_v39 = vmul.f32 0.25, %v4280_v38  ;;  %v256_v40 = vpop.f32.mrb[1].mxu0 }
 0x10b   : > { %v295_v41 = vmul.f32 0.25, %v256_v40 }
 0x10c   : > { %v307_v42 = vsel %vm303_vm2, %v296_v39, -inf }
 0x10d   : > { %308 = vmax.xlane.f32.xlu0 %v307_v42  ;;  %v4283_v43 = vpop.f32.mrb[2].mxu0  ;;  %v304_v47 = vsel %vm303_vm2, %v295_v41, -inf }
 0x10e   : > { %v298_v44 = vmul.f32 0.25, %v4283_v43  ;;  %v266_v45 = vpop.f32.mrb[3].mxu0 }
 0x10f   : > { %v297_v46 = vmul.f32 0.25, %v266_v45 }
 0x110   : > { %v313_v48 = vsel %vm303_vm2, %v298_v44, -inf }
 0x111   : > { %305 = vmax.xlane.f32.xlu0 %v304_v47  ;;  %314 = vmax.xlane.f32.xlu1 %v313_v48  ;;  %v4286_v49 = vpop.f32.mrb[4].mxu0  ;;  %v310_v53 = vsel %vm303_vm2, %v297_v46, -inf }
 0x112   : > { %v276_v50 = vpop.f32.mrb[5].mxu0  ;;  %v300_v52 = vmul.f32 0.25, %v4286_v49 }
 0x113   : > { %v299_v51 = vmul.f32 0.25, %v276_v50 }
 0x114   : > { %v319_v58 = vsel %vm303_vm2, %v300_v52, -inf }
 0x115   : > { %311 = vmax.xlane.f32.xlu1 %v310_v53  ;;  %v316_v54 = vsel %vm303_vm2, %v299_v51, -inf  ;;  %v4289_v55 = vpop.f32.mrb[6].mxu0 }
 0x116   : > { %317 = vmax.xlane.f32.xlu0 %v316_v54  ;;  %v302_v56 = vmul.f32 0.25, %v4289_v55  ;;  %v286_v57 = vpop.f32.mrb[7].mxu0 }
 0x117   : > { %v301_v60 = vmul.f32 0.25, %v286_v57 }
 0x118   : > { %v325_v59 = vsel %vm303_vm2, %v302_v56, -inf }
 0x119   : > { %320 = vmax.xlane.f32.xlu1 %v319_v58  ;;  %v322_v61 = vsel %vm303_vm2, %v301_v60, -inf }
 0x11a   : > { %326 = vmax.xlane.f32.xlu0 %v325_v59 }
 0x11e   : > { %323 = vmax.xlane.f32.xlu0 %v322_v61 }
 0x12a   : > { %5057 = vrot.lane.b32.xlu1 %v5802_v62, %s5630_s12 }
 0x12e   : > { %5062 = vrot.lane.b32.xlu1 %v5808_v63, %s5630_s12 }
 0x132   : > { %521 = vrot.lane.b32.xlu1 %v5682_v8, %s5630_s12 }
 0x134   : > { %5052 = vrot.lane.b32.xlu0 %v5814_v1, %s5630_s12 }
 0x136   : > { %523 = vrot.lane.b32.xlu1 %v5721_v15, %s5630_s12 }
 0x138   : > { %525 = vrot.lane.b32.xlu0 %v5724_v16, %s5630_s12 }
 0x13a   : > { %527 = vrot.lane.b32.xlu1 %v5731_v17, %s5630_s12 }
 0x13c   : > { %529 = vrot.lane.b32.xlu0 %v5734_v18, %s5630_s12 }
 0x13e   : > { %531 = vrot.lane.b32.xlu1 %v5741_v19, %s5630_s12 }
 0x140   : > { %533 = vrot.lane.b32.xlu0 %v5744_v20, %s5630_s12 }
 0x142   : > { %535 = vrot.lane.b32.xlu1 %v5751_v21, %s5630_s12 }
 0x144   : > { %5067 = vrot.lane.b32.xlu0 %v5836_v2, %s5630_s12 }
 0x146   : > { %5072 = vrot.lane.b32.xlu1 %v5840_v3, %s5630_s12 }
 0x148   : > { %5077 = vrot.lane.b32.xlu0 %v5848_v4, %s5630_s12 }
 0x14a   : > { %5082 = vrot.lane.b32.xlu1 %v5852_v5, %s5630_s12 }
 0x19a   : > { %v309_v7 = vpop.xlane.xlu0 %308 }
 0x19b   : > { %v329_v9 = vsub.f32 %v296_v39, %v309_v7 }
 0x19d   : > { %v338_v14 = vmul.f32 1.442695, %v329_v9 }
 0x19e   : > { %v306_v10 = vpop.xlane.xlu0 %305  ;;  %v315_v11 = vpop.xlane.xlu1 %314 }
 0x19f   : > { %v328_v12 = vsub.f32 %v295_v41, %v306_v10  ;;  %v331_v13 = vsub.f32 %v298_v44, %v315_v11 }
 0x1a1   : > { %v336_v22 = vmul.f32 1.442695, %v328_v12  ;;  %v342_v23 = vmul.f32 1.442695, %v331_v13 }
 0x1a2   : > { %v312_v24 = vpop.xlane.xlu1 %311 }
 0x1a3   : > { %5326 = vpow2.f32 %v336_v22  ;;  %v330_v25 = vsub.f32 %v297_v46, %v312_v24  ;;  %v318_v26 = vpop.xlane.xlu0 %317 }
 0x1a4   : > { %5328 = vpow2.f32 %v338_v14  ;;  %v332_v27 = vsub.f32 %v299_v51, %v318_v26 }
 0x1a5   : > { %v340_v28 = vmul.f32 1.442695, %v330_v25  ;;  %5330 = vpow2.f32 %v342_v23 }
 0x1a6   : > { %v344_v29 = vmul.f32 1.442695, %v332_v27  ;;  %v321_v30 = vpop.xlane.xlu1 %320 }
 0x1a7   : > { %5332 = vpow2.f32 %v340_v28  ;;  %v333_v31 = vsub.f32 %v300_v52, %v321_v30  ;;  %v327_v32 = vpop.xlane.xlu0 %326 }
 0x1a8   : > { %5334 = vpow2.f32 %v344_v29  ;;  %v335_v34 = vsub.f32 %v302_v56, %v327_v32 }
 0x1a9   : > { %v346_v33 = vmul.f32 1.442695, %v333_v31 }
 0x1aa   : > { %v350_v39 = vmul.f32 1.442695, %v335_v34  ;;  %v5058_v42 = vpop.permute.xlu1 %5057 }
 0x1ab   : > { %5336 = vpow2.f32 %v346_v33  ;;  %v324_v35 = vpop.xlane.xlu0 %323  ;;  %v5060_v48 = vunpack.i.h.bf16 %v5058_v42  ;;  %v5059_v49 = vunpack.i.l.bf16 %v5058_v42 }
 0x1ac   : > { %v334_v36 = vsub.f32 %v301_v60, %v324_v35 }
 0x1ad   : > { %v5858_v38 = vpop.eup %5326  ;;  %v4762_v52 = vpack.c.bf16 %v5060_v48, %v5059_v49 }
 0x1ae   : > { %7295 = vst [vmem:[#allocation2_spill] sm:$0xff] %v5858_v38  ;;  %v5860_v40 = vpop.eup %5328  ;;  %v348_v41 = vmul.f32 1.442695, %v334_v36  ;;  %4306 = vmatprep.mubr.msk.f32.mxu1 %vm303_vm2, %v5858_v38  ;;  %v5063_v53 = vpop.permute.xlu1 %5062 }
 0x1af   : > { %7296 = vst [vmem:[#allocation3_spill] sm:$0xff] %v5860_v40  ;;  %4307 = vmatmul.mubr.msk.f32.vlgmr.msra.gmra.mrb[0].mxu1 %vm303_vm2, %v5860_v40  ;;  %v5053_v43 = vpop.permute.xlu0 %5052  ;;  %v5866_v44 = vpop.eup %5330  ;;  %v5065_v54 = vunpack.i.h.bf16 %v5063_v53  ;;  %v5064_v55 = vunpack.i.l.bf16 %v5063_v53 }
 0x1b0   : > { %7297 = vst [vmem:[#allocation4_spill] sm:$0xff] %v5866_v44  ;;  %5338 = vpow2.f32 %v348_v41  ;;  %4755 = vmatpush3.bf16.xpose.msk.msra.mxu1 %vm5665_vm1, %v5787_v37  ;;  %v5055_v45 = vunpack.i.h.bf16 %v5053_v43  ;;  %v5054_v46 = vunpack.i.l.bf16 %v5053_v43 }
 0x1b1   : > { %v5871_v47 = vpop.eup %5332  ;;  %5340 = vpow2.f32 %v350_v39  ;;  %v4768_v59 = vpack.c.bf16 %v5065_v54, %v5064_v55 }
 0x1b2   : > { %7298 = vst [vmem:[#allocation5_spill] sm:$0xff] %v5871_v47  ;;  %v5873_v50 = vpop.eup %5334  ;;  %v4756_v51 = vpack.c.bf16 %v5055_v45, %v5054_v46  ;;  %4309 = vmatprep.mubr.msk.f32.mxu1 %vm303_vm2, %v5871_v47  ;;  %v522_v57 = vpop.permute.xlu1 %521 }
 0x1b3   : > { %7299 = vst [vmem:[#allocation6_spill] sm:$0xff] %v5873_v50  ;;  %4310 = vmatmul.mubr.msk.f32.gmra.mrb[2].mxu1 %vm303_vm2, %v5866_v44  ;;  %v526_v61 = vpop.permute.xlu0 %525 }
 0x1b4   : > { %4312 = vmatprep.mubr.msk.f32.mxu1 %vm303_vm2, %v5873_v50  ;;  %4758 = vmatprep.subr.msk.bf16.mxu1 %vm5665_vm1, %v4756_v51 }
 0x1b5   : > { %v5883_v37 = vpop.eup %5336 }
 0x1b6   : > { %7300 = vst [vmem:[#allocation7_spill] sm:$0xff] %v5883_v37  ;;  %v524_v60 = vpop.permute.xlu1 %523 }
 0x1b7   : > { %4313 = vmatmul.mubr.msk.f32.gmra.mrb[4].mxu1 %vm303_vm2, %v5883_v37  ;;  %v530_v9 = vpop.permute.xlu0 %529 }
 0x1b8   : > { %4761 = vmatpush3.bf16.xpose.msk.msra.mxu1 %vm5665_vm1, %v4756_v51 }
 0x1b9   : > { %4764 = vmatprep.subr.msk.bf16.mxu1 %vm5665_vm1, %v4762_v52 }
 0x1ba   : > { %v5891_v56 = vpop.eup %5338  ;;  %v528_v7 = vpop.permute.xlu1 %527 }
 0x1bb   : > { %7301 = vst [vmem:[#allocation8_spill] sm:$0xff] %v5891_v56  ;;  %v5893_v58 = vpop.eup %5340  ;;  %4315 = vmatprep.mubr.msk.f32.mxu1 %vm303_vm2, %v5891_v56  ;;  %v534_v11 = vpop.permute.xlu0 %533 }
 0x1bc   : > { %7302 = vst [vmem:[#allocation9_spill] sm:$0xff] %v5893_v58  ;;  %4316 = vmatmul.mubr.msk.f32.gmra.mrb[6].mxu1 %vm303_vm2, %v5893_v58 }
 0x1bd   : > { %4334 = vmatprep.mubr.msk.f32.mxu1 %vm141_vm0, %v522_v57 }
 0x1be   : > { %v532_v10 = vpop.permute.xlu1 %531 }
 0x1bf   : > { %v5068_v13 = vpop.permute.xlu0 %5067 }
 0x1c0   : > { %4767 = vmatpush3.bf16.xpose.msk.msra.mxu1 %vm5665_vm1, %v4762_v52  ;;  %v5070_v22 = vunpack.i.h.bf16 %v5068_v13  ;;  %v5069_v23 = vunpack.i.l.bf16 %v5068_v13 }
 0x1c1   : > { %4770 = vmatprep.subr.msk.bf16.mxu1 %vm5665_vm1, %v4768_v59 }
 0x1c2   : > { %v536_v12 = vpop.permute.xlu1 %535  ;;  %v4774_v26 = vpack.c.bf16 %v5070_v22, %v5069_v23 }
 0x1c3   : > { %v5078_v28 = vpop.permute.xlu0 %5077 }
 0x1c4   : > { %4775 = vmatprep.subr.bf16.mxu0 %v4774_v26  ;;  %v5080_v30 = vunpack.i.h.bf16 %v5078_v28  ;;  %v5079_v31 = vunpack.i.l.bf16 %v5078_v28 }
 0x1c5   : > { %4777 = vmatpush3.bf16.msra.mxu0 %v4774_v26 }
 0x1c6   : > { %v5073_v14 = vpop.permute.xlu1 %5072  ;;  %v4782_v34 = vpack.c.bf16 %v5080_v30, %v5079_v31 }
 0x1c7   : > { %v5075_v24 = vunpack.i.h.bf16 %v5073_v14  ;;  %v5074_v25 = vunpack.i.l.bf16 %v5073_v14 }
 0x1c8   : > { %4773 = vmatpush3.bf16.xpose.msk.msra.mxu1 %vm5665_vm1, %v4768_v59 }
 0x1c9   : > { %v4778_v27 = vpack.c.bf16 %v5075_v24, %v5074_v25 }
 0x1ca   : > { %v5083_v29 = vpop.permute.xlu1 %5082 }
 0x1cb   : > { %4779 = vmatprep.subr.bf16.mxu0 %v4778_v27  ;;  %v5085_v32 = vunpack.i.h.bf16 %v5083_v29  ;;  %v5084_v33 = vunpack.i.l.bf16 %v5083_v29 }
 0x1cc   : > { %4781 = vmatpush3.bf16.msra.mxu0 %v4778_v27 }
 0x1cd   : > { %4783 = vmatprep.subr.bf16.mxu0 %v4782_v34  ;;  %v4786_v35 = vpack.c.bf16 %v5085_v32, %v5084_v33 }
 0x1cf   : > { %4335 = vmatmul.mubr.msk.f32.vlgmr.msra.gmra.mrb[8].mxu1 %vm141_vm0, %v524_v60 }
 0x1d0   : > { %4337 = vmatprep.mubr.msk.f32.mxu1 %vm141_vm0, %v526_v61  ;;  %4785 = vmatpush3.bf16.msra.mxu0 %v4782_v34 }
 0x1d1   : > { %4787 = vmatprep.subr.bf16.mxu0 %v4786_v35 }
 0x1d3   : > { %4338 = vmatmul.mubr.msk.f32.gmra.mrb[10].mxu1 %vm141_vm0, %v528_v7 }
 0x1d4   : > { %4340 = vmatprep.mubr.msk.f32.mxu1 %vm141_vm0, %v530_v9  ;;  %4789 = vmatpush3.bf16.msra.mxu0 %v4786_v35 }
 0x1d7   : > { %4341 = vmatmul.mubr.msk.f32.gmra.mrb[12].mxu1 %vm141_vm0, %v532_v10 }
 0x1d8   : > { %4343 = vmatprep.mubr.msk.f32.mxu1 %vm141_vm0, %v534_v11 }
 0x1db   : > { %4344 = vmatmul.mubr.msk.f32.gmra.mrb[14].mxu1 %vm141_vm0, %v536_v12 }
 0x282   : > { %v5913_v36 = vpop.f32.mrb[0].mxu1 }
 0x283   : > { %7303 = vst [vmem:[#allocation10_spill] sm:$0xff] %v5913_v36  ;;  %v5915_v39 = vpop.f32.mrb[1].mxu1 }
 0x284   : > { %7304 = vst [vmem:[#allocation11_spill] sm:$0xff] %v5915_v39  ;;  %v5592_v39 = vld [vmem:[%s5661_s11 + $0xb0] sm:$0xff] }
 0x286   : > { %v5917_v41 = vpop.f32.mrb[2].mxu1 }
 0x287   : > { %7305 = vst [vmem:[#allocation12_spill] sm:$0xff] %v5917_v41  ;;  %v5919_v42 = vpop.f32.mrb[3].mxu1 }
 0x288   : > { %7306 = vst [vmem:[#allocation13_spill] sm:$0xff] %v5919_v42  ;;  %v5591_v42 = vld [vmem:[%s5661_s11 + $0x98] sm:$0xff] }
 0x28a   : > { %v5921_v43 = vpop.f32.mrb[4].mxu1 }
 0x28b   : > { %7307 = vst [vmem:[#allocation14_spill] sm:$0xff] %v5921_v43  ;;  %v5923_v45 = vpop.f32.mrb[5].mxu1  ;;  %v6262_v43 = vld [vmem:[%s5661_s11 + $0x18] sm:$0xff] }
 0x28c   : > { %7308 = vst [vmem:[#allocation15_spill] sm:$0xff] %v5923_v45 }
 0x28f   : > { %v5925_v46 = vpop.f32.mrb[6].mxu1 }
 0x290   : > { %7309 = vst [vmem:[#allocation16_spill] sm:$0xff] %v5925_v46  ;;  %v5927_v48 = vpop.f32.mrb[7].mxu1  ;;  %v6252_v46 = vpack.i.bf16 %v5592_v39, %v5591_v42  ;;  %v6272_v39 = vld [vmem:[%s5661_s11 + $0x78] sm:$0xff]  ;;  %v6277_v42 = vld [vmem:[%s5661_s11 + $0xa8] sm:$0xff] }
 0x291   : > { %7310 = vst [vmem:[#allocation17_spill] sm:$0xff] %v5927_v48 }
 0x2a2   : > { %v4336_v49 = vpop.f32.mrb[8].mxu1 }
 0x2a3   : > { %v691_v51 = vmul.f32 0.25, %v4336_v49  ;;  %v651_v52 = vpop.f32.mrb[9].mxu1 }
 0x2a4   : > { %v690_v53 = vmul.f32 0.25, %v651_v52 }
 0x2a5   : > { %v701_v54 = vsel %vm303_vm2, %v691_v51, -inf }
 0x2a6   : > { %702 = vmax.xlane.f32.xlu1 %v701_v54  ;;  %v4339_v55 = vpop.f32.mrb[10].mxu1  ;;  %v698_v57 = vsel %vm303_vm2, %v690_v53, -inf }
 0x2a7   : > { %699 = vmax.xlane.f32.xlu0 %v698_v57  ;;  %v661_v59 = vpop.f32.mrb[11].mxu1  ;;  %v693_v27 = vmul.f32 0.25, %v4339_v55 }
 0x2a8   : > { %v692_v60 = vmul.f32 0.25, %v661_v59 }
 0x2a9   : > { %v707_v28 = vsel %vm303_vm2, %v693_v27, -inf }
 0x2aa   : > { %v704_v61 = vsel %vm303_vm2, %v692_v60, -inf  ;;  %v4342_v7 = vpop.f32.mrb[12].mxu1 }
 0x2ab   : > { %705 = vmax.xlane.f32.xlu0 %v704_v61  ;;  %v5932_v9 = vmul.f32 0.25, %v4342_v7  ;;  %v671_v10 = vpop.f32.mrb[13].mxu1 }
 0x2ac   : > { %v5934_v11 = vmul.f32 0.25, %v671_v10 }
 0x2ad   : > { %v713_v12 = vsel %vm303_vm2, %v5932_v9, -inf }
 0x2ae   : > { %v4345_v13 = vpop.f32.mrb[14].mxu1  ;;  %v710_v22 = vsel %vm303_vm2, %v5934_v11, -inf }
 0x2af   : > { %714 = vmax.xlane.f32.xlu0 %v713_v12  ;;  %v681_v14 = vpop.f32.mrb[15].mxu1  ;;  %v5940_v23 = vmul.f32 0.25, %v4345_v13 }
 0x2b0   : > { %v5944_v25 = vmul.f32 0.25, %v681_v14 }
 0x2b1   : > { %v719_v24 = vsel %vm303_vm2, %v5940_v23, -inf }
 0x2b2   : > { %v716_v26 = vsel %vm303_vm2, %v5944_v25, -inf }
 0x2b3   : > { %711 = vmax.xlane.f32.xlu0 %v710_v22 }
 0x2b7   : > { %5087 = vrot.lane.b32.xlu1 %v5677_v6, %s5631_s13  ;;  %720 = vmax.xlane.f32.xlu0 %v719_v24 }
 0x2bb   : > { %717 = vmax.xlane.f32.xlu0 %v716_v26 }
 0x2d1   : > { %5092 = vrot.lane.b32.xlu0 %v5814_v1, %s5631_s13 }
 0x2d5   : > { %951 = vrot.lane.b32.xlu0 %v5724_v16, %s5631_s13 }
 0x2d9   : > { %955 = vrot.lane.b32.xlu0 %v5734_v18, %s5631_s13 }
 0x2db   : > { %708 = vmax.xlane.f32.xlu1 %v707_v28 }
 0x2dd   : > { %959 = vrot.lane.b32.xlu0 %v5744_v20, %s5631_s13 }
 0x2e1   : > { %5107 = vrot.lane.b32.xlu0 %v5836_v2, %s5631_s13 }
 0x2e5   : > { %5117 = vrot.lane.b32.xlu0 %v5848_v4, %s5631_s13 }
 0x2ec   : > { %5097 = vrot.lane.b32.xlu1 %v5802_v62, %s5631_s13 }
 0x2f0   : > { %5102 = vrot.lane.b32.xlu1 %v5808_v63, %s5631_s13 }
 0x2f4   : > { %947 = vrot.lane.b32.xlu1 %v5682_v8, %s5631_s13 }
 0x2f8   : > { %949 = vrot.lane.b32.xlu1 %v5721_v15, %s5631_s13 }
 0x2fc   : > { %953 = vrot.lane.b32.xlu1 %v5731_v17, %s5631_s13 }
 0x300   : > { %957 = vrot.lane.b32.xlu1 %v5741_v19, %s5631_s13 }
 0x304   : > { %961 = vrot.lane.b32.xlu1 %v5751_v21, %s5631_s13 }
 0x308   : > { %5112 = vrot.lane.b32.xlu1 %v5840_v3, %s5631_s13 }
 0x30c   : > { %5122 = vrot.lane.b32.xlu1 %v5852_v5, %s5631_s13 }
 0x333   : > { %v703_v29 = vpop.xlane.xlu1 %702 }
 0x334   : > { %v723_v30 = vsub.f32 %v691_v51, %v703_v29  ;;  %v700_v31 = vpop.xlane.xlu0 %699 }
 0x335   : > { %v722_v32 = vsub.f32 %v690_v53, %v700_v31 }
 0x336   : > { %v732_v33 = vmul.f32 1.442695, %v723_v30 }
 0x337   : > { %v730_v34 = vmul.f32 1.442695, %v722_v32  ;;  %v5088_v35 = vpop.permute.xlu1 %5087 }
 0x338   : > { %v5090_v49 = vunpack.i.h.bf16 %v5088_v35  ;;  %v5089_v52 = vunpack.i.l.bf16 %v5088_v35  ;;  %v706_v54 = vpop.xlane.xlu0 %705 }
 0x339   : > { %5342 = vpow2.f32 %v730_v34  ;;  %v724_v55 = vsub.f32 %v692_v60, %v706_v54 }
 0x33a   : > { %5344 = vpow2.f32 %v732_v33  ;;  %v4790_v57 = vpack.c.bf16 %v5090_v49, %v5089_v52 }
 0x33b   : > { %v734_v59 = vmul.f32 1.442695, %v724_v55 }
 0x33c   : > { %4792 = vmatprep.subr.msk.bf16.mxu0 %vm5665_vm1, %v4790_v57  ;;  %v715_v61 = vpop.xlane.xlu0 %714 }
 0x33d   : > { %5346 = vpow2.f32 %v734_v59  ;;  %v727_v28 = vsub.f32 %v5932_v9, %v715_v61 }
 0x33f   : > { %v740_v34 = vmul.f32 1.442695, %v727_v28 }
 0x340   : > { %v712_v7 = vpop.xlane.xlu0 %711 }
 0x341   : > { %v726_v26 = vsub.f32 %v5934_v11, %v712_v7 }
 0x343   : > { %v5975_v51 = vpop.eup %5342  ;;  %v738_v31 = vmul.f32 1.442695, %v726_v26 }
 0x344   : > { %v5977_v53 = vpop.eup %5344  ;;  %4362 = vmatprep.mubr.msk.f32.mxu0 %vm303_vm2, %v5975_v51  ;;  %v721_v10 = vpop.xlane.xlu0 %720 }
 0x345   : > { %4363 = vmatmul.mubr.msk.f32.vlgmr.msra.gmra.mrb[8].mxu0 %vm303_vm2, %v5977_v53  ;;  %v729_v49 = vsub.f32 %v5940_v23, %v721_v10 }
 0x346   : > { %4795 = vmatpush3.bf16.xpose.msk.msra.mxu0 %vm5665_vm1, %v4790_v57 }
 0x347   : > { %v5985_v60 = vpop.eup %5346  ;;  %v744_v11 = vmul.f32 1.442695, %v729_v49 }
 0x348   : > { %4365 = vmatprep.mubr.msk.f32.mxu0 %vm303_vm2, %v5985_v60  ;;  %v718_v12 = vpop.xlane.xlu0 %717 }
 0x349   : > { %v728_v32 = vsub.f32 %v5944_v25, %v718_v12 }
 0x34b   : > { %v742_v55 = vmul.f32 1.442695, %v728_v32 }
 0x34c   : > { %v5093_v13 = vpop.permute.xlu0 %5092 }
 0x34d   : > { %v5095_v14 = vunpack.i.h.bf16 %v5093_v13  ;;  %v5094_v22 = vunpack.i.l.bf16 %v5093_v13 }
 0x34f   : > { %v4796_v24 = vpack.c.bf16 %v5095_v14, %v5094_v22 }
 0x350   : > { %v952_v22 = vpop.permute.xlu0 %951 }
 0x351   : > { %4798 = vmatprep.subr.msk.bf16.mxu0 %vm5665_vm1, %v4796_v24 }
 0x352   : > { %4801 = vmatpush3.bf16.xpose.msk.msra.mxu0 %vm5665_vm1, %v4796_v24 }
 0x354   : > { %v956_v26 = vpop.permute.xlu0 %955 }
 0x368   : > { %v709_v29 = vpop.xlane.xlu1 %708 }
 0x369   : > { %v725_v30 = vsub.f32 %v693_v27, %v709_v29  ;;  %v960_v29 = vpop.permute.xlu0 %959 }
 0x36b   : > { %v736_v33 = vmul.f32 1.442695, %v725_v30 }
 0x36c   : > { %v5098_v35 = vpop.permute.xlu1 %5097 }
 0x36d   : > { %5348 = vpow2.f32 %v736_v33  ;;  %v5100_v52 = vunpack.i.h.bf16 %v5098_v35  ;;  %v5099_v54 = vunpack.i.l.bf16 %v5098_v35 }
 0x36e   : > { %5350 = vpow2.f32 %v738_v31  ;;  %v5108_v31 = vpop.permute.xlu0 %5107 }
 0x36f   : > { %v4802_v57 = vpack.c.bf16 %v5100_v52, %v5099_v54  ;;  %5352 = vpow2.f32 %v740_v34  ;;  %v5110_v33 = vunpack.i.h.bf16 %v5108_v31  ;;  %v5109_v34 = vunpack.i.l.bf16 %v5108_v31 }
 0x370   : > { %v5103_v59 = vpop.permute.xlu1 %5102  ;;  %5354 = vpow2.f32 %v742_v55 }
 0x371   : > { %4804 = vmatprep.subr.msk.bf16.mxu0 %vm5665_vm1, %v4802_v57  ;;  %v5105_v9 = vunpack.i.h.bf16 %v5103_v59  ;;  %v5104_v27 = vunpack.i.l.bf16 %v5103_v59  ;;  %5356 = vpow2.f32 %v744_v11  ;;  %v4814_v52 = vpack.c.bf16 %v5110_v33, %v5109_v34 }
 0x372   : > { %4807 = vmatpush3.bf16.xpose.msk.msra.mxu0 %vm5665_vm1, %v4802_v57  ;;  %v5118_v55 = vpop.permute.xlu0 %5117 }
 0x373   : > { %v4808_v25 = vpack.c.bf16 %v5105_v9, %v5104_v27  ;;  %4815 = vmatprep.subr.bf16.mxu1 %v4814_v52  ;;  %v5120_v59 = vunpack.i.h.bf16 %v5118_v55  ;;  %v5119_v11 = vunpack.i.l.bf16 %v5118_v55 }
 0x374   : > { %v948_v61 = vpop.permute.xlu1 %947  ;;  %4817 = vmatpush3.bf16.msra.mxu1 %v4814_v52 }
 0x375   : > { %4810 = vmatprep.subr.msk.bf16.mxu0 %vm5665_vm1, %v4808_v25 }
 0x377   : > { %v6003_v23 = vpop.eup %5348 }
 0x378   : > { %v6005_v7 = vpop.eup %5350  ;;  %4366 = vmatmul.mubr.msk.f32.gmra.mrb[10].mxu0 %vm303_vm2, %v6003_v23  ;;  %v950_v13 = vpop.permute.xlu1 %949 }
 0x379   : > { %4368 = vmatprep.mubr.msk.f32.mxu0 %vm303_vm2, %v6005_v7  ;;  %v6013_v10 = vpop.eup %5352 }
 0x37a   : > { %4813 = vmatpush3.bf16.xpose.msk.msra.mxu0 %vm5665_vm1, %v4808_v25  ;;  %v6015_v12 = vpop.eup %5354  ;;  %v4822_v25 = vpack.c.bf16 %v5120_v59, %v5119_v11 }
 0x37b   : > { %v6021_v14 = vpop.eup %5356 }
 0x37c   : > { %4369 = vmatmul.mubr.msk.f32.gmra.mrb[12].mxu0 %vm303_vm2, %v6013_v10  ;;  %v954_v24 = vpop.permute.xlu1 %953 }
 0x37d   : > { %4371 = vmatprep.mubr.msk.f32.mxu0 %vm303_vm2, %v6015_v12 }
 0x380   : > { %4372 = vmatmul.mubr.msk.f32.gmra.mrb[14].mxu0 %vm303_vm2, %v6021_v14  ;;  %v958_v28 = vpop.permute.xlu1 %957 }
 0x381   : > { %4390 = vmatprep.mubr.msk.f32.mxu0 %vm141_vm0, %v948_v61 }
 0x384   : > { %4391 = vmatmul.mubr.msk.f32.vlgmr.msra.gmra.mrb[16].mxu0 %vm141_vm0, %v950_v13  ;;  %v962_v30 = vpop.permute.xlu1 %961 }
 0x385   : > { %4393 = vmatprep.mubr.msk.f32.mxu0 %vm141_vm0, %v952_v22 }
 0x388   : > { %4394 = vmatmul.mubr.msk.f32.gmra.mrb[18].mxu0 %vm141_vm0, %v954_v24  ;;  %v5113_v32 = vpop.permute.xlu1 %5112 }
 0x389   : > { %4396 = vmatprep.mubr.msk.f32.mxu0 %vm141_vm0, %v956_v26  ;;  %v5115_v35 = vunpack.i.h.bf16 %v5113_v32  ;;  %v5114_v49 = vunpack.i.l.bf16 %v5113_v32 }
 0x38b   : > { %v4818_v54 = vpack.c.bf16 %v5115_v35, %v5114_v49 }
 0x38c   : > { %4397 = vmatmul.mubr.msk.f32.gmra.mrb[20].mxu0 %vm141_vm0, %v958_v28  ;;  %v5123_v57 = vpop.permute.xlu1 %5122 }
 0x38d   : > { %4399 = vmatprep.mubr.msk.f32.mxu0 %vm141_vm0, %v960_v29  ;;  %4819 = vmatprep.subr.bf16.mxu1 %v4818_v54  ;;  %v5125_v9 = vunpack.i.h.bf16 %v5123_v57  ;;  %v5124_v27 = vunpack.i.l.bf16 %v5123_v57 }
 0x38e   : > { %4821 = vmatpush3.bf16.msra.mxu1 %v4818_v54 }
 0x38f   : > { %4823 = vmatprep.subr.bf16.mxu1 %v4822_v25  ;;  %v4826_v22 = vpack.c.bf16 %v5125_v9, %v5124_v27 }
 0x390   : > { %4400 = vmatmul.mubr.msk.f32.gmra.mrb[22].mxu0 %vm141_vm0, %v962_v30 }
 0x392   : > { %4825 = vmatpush3.bf16.msra.mxu1 %v4822_v25 }
 0x393   : > { %4827 = vmatprep.subr.bf16.mxu1 %v4826_v22 }
 0x396   : > { %4829 = vmatpush3.bf16.msra.mxu1 %v4826_v22 }
 0x418   : > { %v6041_v61 = vpop.f32.mrb[8].mxu0 }
 0x419   : > { %7311 = vst [vmem:[#allocation18_spill] sm:$0xff] %v6041_v61  ;;  %v6043_v13 = vpop.f32.mrb[9].mxu0 }
 0x41a   : > { %7312 = vst [vmem:[#allocation19_spill] sm:$0xff] %v6043_v13 }
 0x44b   : > { %v6045_v24 = vpop.f32.mrb[10].mxu0 }
 0x44c   : > { %7313 = vst [vmem:[#allocation20_spill] sm:$0xff] %v6045_v24  ;;  %v6047_v26 = vpop.f32.mrb[11].mxu0 }
 0x44d   : > { %7314 = vst [vmem:[#allocation21_spill] sm:$0xff] %v6047_v26 }
 0x44f   : > { %v6049_v28 = vpop.f32.mrb[12].mxu0 }
 0x450   : > { %7315 = vst [vmem:[#allocation22_spill] sm:$0xff] %v6049_v28  ;;  %v6051_v29 = vpop.f32.mrb[13].mxu0 }
 0x451   : > { %7316 = vst [vmem:[#allocation23_spill] sm:$0xff] %v6051_v29 }
 0x453   : > { %v6053_v30 = vpop.f32.mrb[14].mxu0 }
 0x454   : > { %7317 = vst [vmem:[#allocation24_spill] sm:$0xff] %v6053_v30  ;;  %v6055_v31 = vpop.f32.mrb[15].mxu0 }
 0x455   : > { %7318 = vst [vmem:[#allocation25_spill] sm:$0xff] %v6055_v31 }
 0x457   : > { %v4392_v32 = vpop.f32.mrb[16].mxu0 }
 0x458   : > { %v1117_v33 = vmul.f32 0.25, %v4392_v32  ;;  %v1077_v34 = vpop.f32.mrb[17].mxu0 }
 0x459   : > { %v1116_v35 = vmul.f32 0.25, %v1077_v34 }
 0x45a   : > { %v1127_v49 = vsel %vm303_vm2, %v1117_v33, -inf }
 0x45b   : > { %1128 = vmax.xlane.f32.xlu1 %v1127_v49  ;;  %v4395_v52 = vpop.f32.mrb[18].mxu0  ;;  %v1124_v54 = vsel %vm303_vm2, %v1116_v35, -inf }
 0x45c   : > { %1125 = vmax.xlane.f32.xlu0 %v1124_v54  ;;  %v1087_v55 = vpop.f32.mrb[19].mxu0 }
 0x45d   : > { %v1118_v57 = vmul.f32 0.25, %v1087_v55 }
 0x45f   : > { %v1130_v59 = vsel %vm303_vm2, %v1118_v57, -inf  ;;  %v4398_v11 = vpop.f32.mrb[20].mxu0 }
 0x460   : > { %1131 = vmax.xlane.f32.xlu0 %v1130_v59  ;;  %v6060_v9 = vmul.f32 0.25, %v4398_v11  ;;  %v1097_v27 = vpop.f32.mrb[21].mxu0 }
 0x461   : > { %v6062_v25 = vmul.f32 0.25, %v1097_v27  ;;  %v1119_v27 = vmul.f32 0.25, %v4395_v52 }
 0x462   : > { %v1139_v22 = vsel %vm303_vm2, %v6060_v9, -inf }
 0x463   : > { %v4401_v32 = vpop.f32.mrb[22].mxu0  ;;  %v1136_v49 = vsel %vm303_vm2, %v6062_v25, -inf }
 0x464   : > { %1140 = vmax.xlane.f32.xlu0 %v1139_v22  ;;  %v1107_v34 = vpop.f32.mrb[23].mxu0  ;;  %v6068_v54 = vmul.f32 0.25, %v4401_v32  ;;  %v1133_v22 = vsel %vm303_vm2, %v1119_v27, -inf }
 0x465   : > { %v6072_v59 = vmul.f32 0.25, %v1107_v34 }
 0x466   : > { %v1145_v55 = vsel %vm303_vm2, %v6068_v54, -inf }
 0x467   : > { %v1142_v11 = vsel %vm303_vm2, %v6072_v59, -inf }
 0x468   : > { %1137 = vmax.xlane.f32.xlu0 %v1136_v49 }
 0x46c   : > { %5127 = vrot.lane.b32.xlu1 %v5677_v6, %s5632_s14  ;;  %1146 = vmax.xlane.f32.xlu0 %v1145_v55 }
 0x470   : > { %1143 = vmax.xlane.f32.xlu0 %v1142_v11 }
 0x486   : > { %5132 = vrot.lane.b32.xlu0 %v5814_v1, %s5632_s14 }
 0x48a   : > { %1369 = vrot.lane.b32.xlu0 %v5724_v16, %s5632_s14 }
 0x48e   : > { %1373 = vrot.lane.b32.xlu0 %v5734_v18, %s5632_s14 }
 0x490   : > { %1134 = vmax.xlane.f32.xlu1 %v1133_v22 }
 0x492   : > { %1377 = vrot.lane.b32.xlu0 %v5744_v20, %s5632_s14 }
 0x496   : > { %5147 = vrot.lane.b32.xlu0 %v5836_v2, %s5632_s14 }
 0x49a   : > { %5157 = vrot.lane.b32.xlu0 %v5848_v4, %s5632_s14 }
 0x4a1   : > { %5137 = vrot.lane.b32.xlu1 %v5802_v62, %s5632_s14 }
 0x4a5   : > { %5142 = vrot.lane.b32.xlu1 %v5808_v63, %s5632_s14 }
 0x4a9   : > { %1365 = vrot.lane.b32.xlu1 %v5682_v8, %s5632_s14 }
 0x4ad   : > { %1367 = vrot.lane.b32.xlu1 %v5721_v15, %s5632_s14 }
 0x4b1   : > { %1371 = vrot.lane.b32.xlu1 %v5731_v17, %s5632_s14 }
 0x4b5   : > { %1375 = vrot.lane.b32.xlu1 %v5741_v19, %s5632_s14 }
 0x4b9   : > { %1379 = vrot.lane.b32.xlu1 %v5751_v21, %s5632_s14 }
 0x4bd   : > { %5152 = vrot.lane.b32.xlu1 %v5840_v3, %s5632_s14 }
 0x4c1   : > { %5162 = vrot.lane.b32.xlu1 %v5852_v5, %s5632_s14 }
 0x4e8   : > { %v1129_v6 = vpop.xlane.xlu1 %1128 }
 0x4e9   : > { %v1149_v16 = vsub.f32 %v1117_v33, %v1129_v6  ;;  %v1126_v18 = vpop.xlane.xlu0 %1125 }
 0x4ea   : > { %v1148_v20 = vsub.f32 %v1116_v35, %v1126_v18 }
 0x4eb   : > { %v1158_v62 = vmul.f32 1.442695, %v1149_v16 }
 0x4ec   : > { %v1156_v63 = vmul.f32 1.442695, %v1148_v20  ;;  %v5128_v1 = vpop.permute.xlu1 %5127 }
 0x4ed   : > { %v5130_v8 = vunpack.i.h.bf16 %v5128_v1  ;;  %v5129_v52 = vunpack.i.l.bf16 %v5128_v1  ;;  %v1132_v32 = vpop.xlane.xlu0 %1131 }
 0x4ee   : > { %5358 = vpow2.f32 %v1156_v63  ;;  %v1150_v15 = vsub.f32 %v1118_v57, %v1132_v32 }
 0x4ef   : > { %5360 = vpow2.f32 %v1158_v62  ;;  %v4830_v17 = vpack.c.bf16 %v5130_v8, %v5129_v52 }
 0x4f0   : > { %v1160_v34 = vmul.f32 1.442695, %v1150_v15 }
 0x4f1   : > { %4832 = vmatprep.subr.msk.bf16.mxu1 %vm5665_vm1, %v4830_v17  ;;  %v1141_v19 = vpop.xlane.xlu0 %1140 }
 0x4f2   : > { %5362 = vpow2.f32 %v1160_v34  ;;  %v1153_v20 = vsub.f32 %v6060_v9, %v1141_v19 }
 0x4f4   : > { %v1166_v32 = vmul.f32 1.442695, %v1153_v20 }
 0x4f5   : > { %v1138_v21 = vpop.xlane.xlu0 %1137 }
 0x4f6   : > { %v1152_v18 = vsub.f32 %v6062_v25, %v1138_v21 }
 0x4f8   : > { %v6103_v33 = vpop.eup %5358  ;;  %v1164_v1 = vmul.f32 1.442695, %v1152_v18 }
 0x4f9   : > { %v6105_v35 = vpop.eup %5360  ;;  %4418 = vmatprep.mubr.msk.f32.mxu1 %vm303_vm2, %v6103_v33  ;;  %v1147_v49 = vpop.xlane.xlu0 %1146 }
 0x4fa   : > { %4419 = vmatmul.mubr.msk.f32.vlgmr.msra.gmra.mrb[16].mxu1 %vm303_vm2, %v6105_v35 }
 0x4fb   : > { %4835 = vmatpush3.bf16.xpose.msk.msra.mxu1 %vm5665_vm1, %v4830_v17  ;;  %v1155_v17 = vsub.f32 %v6068_v54, %v1147_v49 }
 0x4fc   : > { %v6113_v57 = vpop.eup %5362 }
 0x4fd   : > { %4421 = vmatprep.mubr.msk.f32.mxu1 %vm303_vm2, %v6113_v57  ;;  %v1144_v55 = vpop.xlane.xlu0 %1143  ;;  %v1170_v25 = vmul.f32 1.442695, %v1155_v17 }
 0x4fe   : > { %v1154_v8 = vsub.f32 %v6072_v59, %v1144_v55 }
 0x501   : > { %v5133_v11 = vpop.permute.xlu0 %5132 }
 0x502   : > { %v5135_v22 = vunpack.i.h.bf16 %v5133_v11  ;;  %v5134_v6 = vunpack.i.l.bf16 %v5133_v11 }
 0x504   : > { %v4836_v16 = vpack.c.bf16 %v5135_v22, %v5134_v6  ;;  %v1168_v22 = vmul.f32 1.442695, %v1154_v8 }
 0x506   : > { %4838 = vmatprep.subr.msk.bf16.mxu1 %vm5665_vm1, %v4836_v16 }
 0x507   : > { %4841 = vmatpush3.bf16.xpose.msk.msra.mxu1 %vm5665_vm1, %v4836_v16 }
 0x51d   : > { %v1135_v62 = vpop.xlane.xlu1 %1134 }
 0x51e   : > { %v1151_v63 = vsub.f32 %v1119_v27, %v1135_v62  ;;  %v1370_v62 = vpop.permute.xlu0 %1369 }
 0x520   : > { %v1162_v52 = vmul.f32 1.442695, %v1151_v63 }
 0x521   : > { %v5138_v15 = vpop.permute.xlu1 %5137 }
 0x522   : > { %5364 = vpow2.f32 %v1162_v52  ;;  %v5140_v34 = vunpack.i.h.bf16 %v5138_v15  ;;  %v5139_v11 = vunpack.i.l.bf16 %v5138_v15 }
 0x523   : > { %5366 = vpow2.f32 %v1164_v1  ;;  %v1374_v1 = vpop.permute.xlu0 %1373 }
 0x524   : > { %v4842_v6 = vpack.c.bf16 %v5140_v34, %v5139_v11  ;;  %5368 = vpow2.f32 %v1166_v32 }
 0x525   : > { %v5143_v16 = vpop.permute.xlu1 %5142  ;;  %5370 = vpow2.f32 %v1168_v22 }
 0x526   : > { %4844 = vmatprep.subr.msk.bf16.mxu1 %vm5665_vm1, %v4842_v6  ;;  %v5145_v9 = vunpack.i.h.bf16 %v5143_v16  ;;  %v5144_v27 = vunpack.i.l.bf16 %v5143_v16  ;;  %5372 = vpow2.f32 %v1170_v25 }
 0x527   : > { %4847 = vmatpush3.bf16.xpose.msk.msra.mxu1 %vm5665_vm1, %v4842_v6  ;;  %v1378_v52 = vpop.permute.xlu0 %1377 }
 0x528   : > { %v4848_v59 = vpack.c.bf16 %v5145_v9, %v5144_v27 }
 0x529   : > { %v1366_v19 = vpop.permute.xlu1 %1365 }
 0x52a   : > { %4850 = vmatprep.subr.msk.bf16.mxu1 %vm5665_vm1, %v4848_v59 }
 0x52b   : > { %v5148_v15 = vpop.permute.xlu0 %5147 }
 0x52c   : > { %v6131_v54 = vpop.eup %5364  ;;  %v5150_v34 = vunpack.i.h.bf16 %v5148_v15  ;;  %v5149_v11 = vunpack.i.l.bf16 %v5148_v15 }
 0x52d   : > { %v6133_v21 = vpop.eup %5366  ;;  %4422 = vmatmul.mubr.msk.f32.gmra.mrb[18].mxu1 %vm303_vm2, %v6131_v54  ;;  %v1368_v18 = vpop.permute.xlu1 %1367 }
 0x52e   : > { %4424 = vmatprep.mubr.msk.f32.mxu1 %vm303_vm2, %v6133_v21  ;;  %v6141_v49 = vpop.eup %5368  ;;  %v4854_v16 = vpack.c.bf16 %v5150_v34, %v5149_v11 }
 0x52f   : > { %4853 = vmatpush3.bf16.xpose.msk.msra.mxu1 %vm5665_vm1, %v4848_v59  ;;  %v6143_v55 = vpop.eup %5370  ;;  %v5158_v9 = vpop.permute.xlu0 %5157 }
 0x530   : > { %v6149_v20 = vpop.eup %5372  ;;  %4855 = vmatprep.subr.bf16.mxu0 %v4854_v16  ;;  %v5160_v2 = vunpack.i.h.bf16 %v5158_v9  ;;  %v5159_v59 = vunpack.i.l.bf16 %v5158_v9 }
 0x531   : > { %4425 = vmatmul.mubr.msk.f32.gmra.mrb[20].mxu1 %vm303_vm2, %v6141_v49  ;;  %v1372_v63 = vpop.permute.xlu1 %1371  ;;  %4857 = vmatpush3.bf16.msra.mxu0 %v4854_v16 }
 0x532   : > { %4427 = vmatprep.mubr.msk.f32.mxu1 %vm303_vm2, %v6143_v55 }
 0x535   : > { %4428 = vmatmul.mubr.msk.f32.gmra.mrb[22].mxu1 %vm303_vm2, %v6149_v20  ;;  %v1376_v8 = vpop.permute.xlu1 %1375 }
 0x536   : > { %4446 = vmatprep.mubr.msk.f32.mxu1 %vm141_vm0, %v1366_v19  ;;  %v4862_v19 = vpack.c.bf16 %v5160_v2, %v5159_v59 }
 0x539   : > { %4447 = vmatmul.mubr.msk.f32.vlgmr.msra.gmra.mrb[24].mxu1 %vm141_vm0, %v1368_v18  ;;  %v1380_v32 = vpop.permute.xlu1 %1379 }
 0x53a   : > { %4449 = vmatprep.mubr.msk.f32.mxu1 %vm141_vm0, %v1370_v62 }
 0x53d   : > { %4450 = vmatmul.mubr.msk.f32.gmra.mrb[26].mxu1 %vm141_vm0, %v1372_v63  ;;  %v5153_v17 = vpop.permute.xlu1 %5152 }
 0x53e   : > { %4452 = vmatprep.mubr.msk.f32.mxu1 %vm141_vm0, %v1374_v1  ;;  %v5155_v22 = vunpack.i.h.bf16 %v5153_v17  ;;  %v5154_v6 = vunpack.i.l.bf16 %v5153_v17 }
 0x540   : > { %v4858_v25 = vpack.c.bf16 %v5155_v22, %v5154_v6 }
 0x541   : > { %4453 = vmatmul.mubr.msk.f32.gmra.mrb[28].mxu1 %vm141_vm0, %v1376_v8  ;;  %v5163_v27 = vpop.permute.xlu1 %5162 }
 0x542   : > { %4455 = vmatprep.mubr.msk.f32.mxu1 %vm141_vm0, %v1378_v52  ;;  %4859 = vmatprep.subr.bf16.mxu0 %v4858_v25  ;;  %v5165_v3 = vunpack.i.h.bf16 %v5163_v27  ;;  %v5164_v4 = vunpack.i.l.bf16 %v5163_v27 }
 0x543   : > { %4861 = vmatpush3.bf16.msra.mxu0 %v4858_v25 }
 0x544   : > { %4863 = vmatprep.subr.bf16.mxu0 %v4862_v19  ;;  %v4866_v62 = vpack.c.bf16 %v5165_v3, %v5164_v4 }
 0x545   : > { %4456 = vmatmul.mubr.msk.f32.gmra.mrb[30].mxu1 %vm141_vm0, %v1380_v32 }
 0x547   : > { %4865 = vmatpush3.bf16.msra.mxu0 %v4862_v19 }
 0x548   : > { %4867 = vmatprep.subr.bf16.mxu0 %v4866_v62 }
 0x54b   : > { %4869 = vmatpush3.bf16.msra.mxu0 %v4866_v62 }
 0x5cd   : > { %v6169_v18 = vpop.f32.mrb[16].mxu1 }
 0x5ce   : > { %7319 = vst [vmem:[#allocation26_spill] sm:$0xff] %v6169_v18  ;;  %v6171_v5 = vpop.f32.mrb[17].mxu1 }
 0x5cf   : > { %7320 = vst [vmem:[#allocation27_spill] sm:$0xff] %v6171_v5 }
 0x600   : > { %v6173_v63 = vpop.f32.mrb[18].mxu1 }
 0x601   : > { %7321 = vst [vmem:[#allocation28_spill] sm:$0xff] %v6173_v63  ;;  %v6175_v1 = vpop.f32.mrb[19].mxu1 }
 0x602   : > { %7322 = vst [vmem:[#allocation29_spill] sm:$0xff] %v6175_v1 }
 0x604   : > { %v6177_v8 = vpop.f32.mrb[20].mxu1 }
 0x605   : > { %7323 = vst [vmem:[#allocation30_spill] sm:$0xff] %v6177_v8  ;;  %v6179_v52 = vpop.f32.mrb[21].mxu1 }
 0x606   : > { %7324 = vst [vmem:[#allocation31_spill] sm:$0xff] %v6179_v52 }
 0x608   : > { %v6181_v32 = vpop.f32.mrb[22].mxu1 }
 0x609   : > { %7325 = vst [vmem:[#allocation32_spill] sm:$0xff] %v6181_v32  ;;  %v6183_v15 = vpop.f32.mrb[23].mxu1 }
 0x60a   : > { %7326 = vst [vmem:[#allocation33_spill] sm:$0xff] %v6183_v15 }
 0x60c   : > { %v4448_v17 = vpop.f32.mrb[24].mxu1 }
 0x60d   : > { %v6185_v34 = vmul.f32 0.25, %v4448_v17  ;;  %v1495_v11 = vpop.f32.mrb[25].mxu1 }
 0x60e   : > { %v6187_v22 = vmul.f32 0.25, %v1495_v11 }
 0x60f   : > { %v1545_v6 = vsel %vm303_vm2, %v6185_v34, -inf }
 0x610   : > { %1546 = vmax.xlane.f32.xlu1 %v1545_v6  ;;  %v4451_v16 = vpop.f32.mrb[26].mxu1  ;;  %v1542_v25 = vsel %vm303_vm2, %v6187_v22, -inf }
 0x611   : > { %1543 = vmax.xlane.f32.xlu0 %v1542_v25  ;;  %v1505_v9 = vpop.f32.mrb[27].mxu1 }
 0x612   : > { %v6193_v27 = vmul.f32 0.25, %v1505_v9  ;;  %v5582_v9 = vld [vmem:[%s5661_s11 + $0x8] sm:$0xff] }
 0x614   : > { %v1548_v2 = vsel %vm303_vm2, %v6193_v27, -inf  ;;  %v4454_v59 = vpop.f32.mrb[28].mxu1 }
 0x615   : > { %1549 = vmax.xlane.f32.xlu0 %v1548_v2  ;;  %v6197_v3 = vmul.f32 0.25, %v4454_v59  ;;  %v1515_v4 = vpop.f32.mrb[29].mxu1  ;;  %v5583_v2 = vld [vmem:[%s5661_s11 + $0x20] sm:$0xff] }
 0x616   : > { %v6199_v19 = vmul.f32 0.25, %v1515_v4  ;;  %v6209_v59 = vpack.i.bf16 %v5583_v2, %v5582_v9  ;;  %v6230_v2 = vmul.f32 0.25, %v4451_v16  ;;  %v5590_v16 = vld [vmem:[%s5661_s11 + $0x80] sm:$0xff] }
 0x617   : > { %v1557_v62 = vsel %vm303_vm2, %v6197_v3, -inf }
 0x618   : > { %v4457_v17 = vpop.f32.mrb[30].mxu1  ;;  %v1554_v6 = vsel %vm303_vm2, %v6199_v19, -inf }
 0x619   : > { %1558 = vmax.xlane.f32.xlu0 %v1557_v62  ;;  %v1525_v11 = vpop.f32.mrb[31].mxu1  ;;  %v6205_v25 = vmul.f32 0.25, %v4457_v17  ;;  %v5584_v17 = vld [vmem:[%s5661_s11 + $0x38] sm:$0xff] }
 0x61a   : > { %v6213_v48 = vmul.f32 0.25, %v1525_v11  ;;  %v6226_v11 = vld [vmem:[%s5661_s11 + $0x30] sm:$0xff] }
 0x61b   : > { %v1563_v4 = vsel %vm303_vm2, %v6205_v25, -inf }
 0x61c   : > { %v1560_v62 = vsel %vm303_vm2, %v6213_v48, -inf }
 0x61d   : > { %1555 = vmax.xlane.f32.xlu0 %v1554_v6  ;;  %v5585_v6 = vld [vmem:[%s5661_s11 + $0x50] sm:$0xff] }
 0x61e   : > { %v6221_v9 = vpack.i.bf16 %v5585_v6, %v5584_v17  ;;  %v6240_v17 = vld [vmem:[%s5661_s11 + $0x90] sm:$0xff]  ;;  %v5589_v6 = vld [vmem:[%s5661_s11 + $0x68] sm:$0xff] }
 0x61f   : > { %v6246_v45 = vpack.i.bf16 %v5590_v16, %v5589_v6  ;;  %v6267_v6 = vld [vmem:[%s5661_s11 + $0x48] sm:$0xff] }
 0x621   : > { %5167 = vrot.lane.b32.xlu1 %v6209_v59, %s5633_s15  ;;  %1564 = vmax.xlane.f32.xlu0 %v1563_v4  ;;  %v6233_v4 = vld [vmem:[%s5661_s11 + $0x60] sm:$0xff] }
 0x625   : > { %1561 = vmax.xlane.f32.xlu0 %v1560_v62  ;;  %v1551_v62 = vsel %vm303_vm2, %v6230_v2, -inf }
 0x63b   : > { %5172 = vrot.lane.b32.xlu0 %v6221_v9, %s5633_s15 }
 0x63f   : > { %1787 = vrot.lane.b32.xlu0 %v6226_v11, %s5633_s15 }
 0x643   : > { %1791 = vrot.lane.b32.xlu0 %v6233_v4, %s5633_s15 }
 0x645   : > { %1552 = vmax.xlane.f32.xlu1 %v1551_v62  ;;  %v6257_v62 = vld [vmem:[%s5661_s11] sm:$0xff] }
 0x647   : > { %1795 = vrot.lane.b32.xlu0 %v6240_v17, %s5633_s15 }
 0x656   : > { %5177 = vrot.lane.b32.xlu1 %v6246_v45, %s5633_s15 }
 0x65a   : > { %5182 = vrot.lane.b32.xlu1 %v6252_v46, %s5633_s15 }
 0x65e   : > { %1783 = vrot.lane.b32.xlu1 %v6257_v62, %s5633_s15 }
 0x662   : > { %1785 = vrot.lane.b32.xlu1 %v6262_v43, %s5633_s15 }
 0x666   : > { %1789 = vrot.lane.b32.xlu1 %v6267_v6, %s5633_s15 }
 0x66a   : > { %1793 = vrot.lane.b32.xlu1 %v6272_v39, %s5633_s15 }
 0x66e   : > { %1797 = vrot.lane.b32.xlu1 %v6277_v42, %s5633_s15 }
 0x69d   : > { %v1547_v16 = vpop.xlane.xlu1 %1546 }
 0x69e   : > { %v1567_v41 = vsub.f32 %v6185_v34, %v1547_v16  ;;  %v1544_v36 = vpop.xlane.xlu0 %1543 }
 0x69f   : > { %v1566_v32 = vsub.f32 %v6187_v22, %v1544_v36 }
 0x6a0   : > { %v1576_v8 = vmul.f32 1.442695, %v1567_v41 }
 0x6a1   : > { %v1574_v15 = vmul.f32 1.442695, %v1566_v32  ;;  %v5168_v63 = vpop.permute.xlu1 %5167 }
 0x6a2   : > { %v5170_v52 = vunpack.i.h.bf16 %v5168_v63  ;;  %v5169_v18 = vunpack.i.l.bf16 %v5168_v63  ;;  %v1550_v1 = vpop.xlane.xlu0 %1549 }
 0x6a3   : > { %5374 = vpow2.f32 %v1574_v15  ;;  %v1568_v30 = vsub.f32 %v6193_v27, %v1550_v1 }
 0x6a4   : > { %5376 = vpow2.f32 %v1576_v8  ;;  %v4870_v5 = vpack.c.bf16 %v5170_v52, %v5169_v18 }
 0x6a5   : > { %v1578_v28 = vmul.f32 1.442695, %v1568_v30 }
 0x6a6   : > { %4872 = vmatprep.subr.msk.bf16.mxu0 %vm5665_vm1, %v4870_v5  ;;  %v1559_v31 = vpop.xlane.xlu0 %1558 }
 0x6a7   : > { %5378 = vpow2.f32 %v1578_v28 }
 0x6aa   : > { %v1556_v34 = vpop.xlane.xlu0 %1555 }
 0x6ab   : > { %v1570_v52 = vsub.f32 %v6199_v19, %v1556_v34 }
 0x6ad   : > { %v6286_v16 = vpop.eup %5374  ;;  %v1582_v22 = vmul.f32 1.442695, %v1570_v52 }
 0x6ae   : > { %v6288_v36 = vpop.eup %5376  ;;  %4474 = vmatprep.mubr.msk.f32.mxu0 %vm303_vm2, %v6286_v16  ;;  %v1565_v41 = vpop.xlane.xlu0 %1564 }
 0x6af   : > { %4475 = vmatmul.mubr.msk.f32.vlgmr.msra.gmra.mrb[24].mxu0 %vm303_vm2, %v6288_v36 }
 0x6b0   : > { %4875 = vmatpush3.bf16.xpose.msk.msra.mxu0 %vm5665_vm1, %v4870_v5  ;;  %v1571_v5 = vsub.f32 %v6197_v3, %v1559_v31 }
 0x6b1   : > { %v6296_v30 = vpop.eup %5378 }
 0x6b2   : > { %4477 = vmatprep.mubr.msk.f32.mxu0 %vm303_vm2, %v6296_v30  ;;  %v1562_v28 = vpop.xlane.xlu0 %1561  ;;  %v1584_v29 = vmul.f32 1.442695, %v1571_v5 }
 0x6b3   : > { %v1572_v27 = vsub.f32 %v6213_v48, %v1562_v28 }
 0x6b6   : > { %v5173_v18 = vpop.permute.xlu0 %5172 }
 0x6b7   : > { %v5175_v63 = vunpack.i.h.bf16 %v5173_v18  ;;  %v5174_v1 = vunpack.i.l.bf16 %v5173_v18 }
 0x6b9   : > { %v4876_v8 = vpack.c.bf16 %v5175_v63, %v5174_v1  ;;  %v1573_v63 = vsub.f32 %v6205_v25, %v1565_v41 }
 0x6ba   : > { %v1788_v28 = vpop.permute.xlu0 %1787 }
 0x6bb   : > { %4878 = vmatprep.subr.msk.bf16.mxu0 %vm5665_vm1, %v4876_v8  ;;  %v1588_v31 = vmul.f32 1.442695, %v1573_v63 }
 0x6bc   : > { %4881 = vmatpush3.bf16.xpose.msk.msra.mxu0 %vm5665_vm1, %v4876_v8  ;;  %v1586_v8 = vmul.f32 1.442695, %v1572_v27  ;;  %v5598_v27 = vld [vmem:[%s5661_s11 + $0x10] sm:$0xff] }
 0x6be   : > { %v1792_v5 = vpop.permute.xlu0 %1791 }
 0x6d2   : > { %v1553_v32 = vpop.xlane.xlu1 %1552 }
 0x6d3   : > { %v1569_v15 = vsub.f32 %v6230_v2, %v1553_v32 }
 0x6d5   : > { %v1580_v24 = vmul.f32 1.442695, %v1569_v15  ;;  %v1796_v15 = vpop.permute.xlu0 %1795 }
 0x6d6   : > { %v5178_v18 = vpop.permute.xlu1 %5177 }
 0x6d7   : > { %5380 = vpow2.f32 %v1580_v24  ;;  %v5180_v1 = vunpack.i.h.bf16 %v5178_v18  ;;  %v5179_v26 = vunpack.i.l.bf16 %v5178_v18  ;;  %v5599_v18 = vld [vmem:[%s5661_s11 + $0x28] sm:$0xff] }
 0x6d8   : > { %5382 = vpow2.f32 %v1582_v22  ;;  %v6347_v63 = vpack.i.bf16 %v5599_v18, %v5598_v27 }
 0x6d9   : > { %v4882_v13 = vpack.c.bf16 %v5180_v1, %v5179_v26  ;;  %5384 = vpow2.f32 %v1584_v29  ;;  %v5600_v1 = vld [vmem:[%s5661_s11 + $0x40] sm:$0xff] }
 0x6da   : > { %v5183_v19 = vpop.permute.xlu1 %5182  ;;  %5386 = vpow2.f32 %v1586_v8  ;;  %v5601_v8 = vld [vmem:[%s5661_s11 + $0x58] sm:$0xff]  ;;  %5187 = vrot.lane.b32.xlu0 %v6347_v63, %s5633_s15 }
 0x6db   : > { %4884 = vmatprep.subr.msk.bf16.mxu0 %vm5665_vm1, %v4882_v13  ;;  %v5185_v3 = vunpack.i.h.bf16 %v5183_v19  ;;  %v5184_v2 = vunpack.i.l.bf16 %v5183_v19  ;;  %5388 = vpow2.f32 %v1588_v31  ;;  %v6351_v19 = vpack.i.bf16 %v5601_v8, %v5600_v1  ;;  %v5602_v31 = vld [vmem:[%s5661_s11 + $0x70] sm:$0xff] }
 0x6dc   : > { %4887 = vmatpush3.bf16.xpose.msk.msra.mxu0 %vm5665_vm1, %v4882_v13 }
 0x6dd   : > { %v4888_v48 = vpack.c.bf16 %v5185_v3, %v5184_v2  ;;  %5192 = vrot.lane.b32.xlu1 %v6351_v19, %s5633_s15  ;;  %v5603_v3 = vld [vmem:[%s5661_s11 + $0x88] sm:$0xff] }
 0x6de   : > { %v1784_v26 = vpop.permute.xlu1 %1783  ;;  %v6359_v2 = vpack.i.bf16 %v5603_v3, %v5602_v31 }
 0x6df   : > { %4890 = vmatprep.subr.msk.bf16.mxu0 %vm5665_vm1, %v4888_v48 }
 0x6e0   : > { %5197 = vrot.lane.b32.xlu0 %v6359_v2, %s5633_s15 }
 0x6e1   : > { %v6315_v24 = vpop.eup %5380 }
 0x6e2   : > { %v6317_v25 = vpop.eup %5382  ;;  %4478 = vmatmul.mubr.msk.f32.gmra.mrb[26].mxu0 %vm303_vm2, %v6315_v24  ;;  %v1786_v34 = vpop.permute.xlu1 %1785 }
 0x6e3   : > { %7327 = vst [vmem:[#allocation34_spill] sm:$0xff] %v6317_v25  ;;  %4480 = vmatprep.mubr.msk.f32.mxu0 %vm303_vm2, %v6317_v25  ;;  %v6325_v13 = vpop.eup %5384 }
 0x6e4   : > { %4893 = vmatpush3.bf16.xpose.msk.msra.mxu0 %vm5665_vm1, %v4888_v48  ;;  %v6327_v29 = vpop.eup %5386  ;;  %v5604_v48 = vld [vmem:[%s5661_s11 + $0xa0] sm:$0xff] }
 0x6e5   : > { %7328 = vst [vmem:[#allocation35_spill] sm:$0xff] %v6327_v29  ;;  %v6333_v41 = vpop.eup %5388 }
 0x6e6   : > { %4481 = vmatmul.mubr.msk.f32.gmra.mrb[28].mxu0 %vm303_vm2, %v6325_v13  ;;  %v1790_v52 = vpop.permute.xlu1 %1789 }
 0x6e7   : > { %4483 = vmatprep.mubr.msk.f32.mxu0 %vm303_vm2, %v6327_v29 }
 0x6ea   : > { %4484 = vmatmul.mubr.msk.f32.gmra.mrb[30].mxu0 %vm303_vm2, %v6333_v41  ;;  %v1794_v32 = vpop.permute.xlu1 %1793 }
 0x6eb   : > { %4502 = vmatprep.mubr.msk.f32.mxu0 %vm141_vm0, %v1784_v26  ;;  %v5605_v26 = vld [vmem:[%s5661_s11 + $0xb8] sm:$0xff] }
 0x6ee   : > { %4503 = vmatmul.mubr.msk.f32.vlgmr.msra.gmra.mrb[32].mxu0 %vm141_vm0, %v1786_v34  ;;  %v1798_v22 = vpop.permute.xlu1 %1797  ;;  %v6363_v34 = vpack.i.bf16 %v5605_v26, %v5604_v48 }
 0x6ef   : > { %4505 = vmatprep.mubr.msk.f32.mxu0 %vm141_vm0, %v1788_v28 }
 0x6f0   : > { %5202 = vrot.lane.b32.xlu1 %v6363_v34, %s5633_s15 }
 0x6f2   : > { %4506 = vmatmul.mubr.msk.f32.gmra.mrb[34].mxu0 %vm141_vm0, %v1790_v52 }
 0x6f3   : > { %4508 = vmatprep.mubr.msk.f32.mxu0 %vm141_vm0, %v1792_v5 }
 0x6f6   : > { %4509 = vmatmul.mubr.msk.f32.gmra.mrb[36].mxu0 %vm141_vm0, %v1794_v32 }
 0x6f7   : > { %4511 = vmatprep.mubr.msk.f32.mxu0 %vm141_vm0, %v1796_v15 }
 0x6fa   : > { %4512 = vmatmul.mubr.msk.f32.gmra.mrb[38].mxu0 %vm141_vm0, %v1798_v22 }
 0x74c   : > { %v5188_v28 = vpop.permute.xlu0 %5187 }
 0x74d   : > { %v5190_v5 = vunpack.i.h.bf16 %v5188_v28  ;;  %v5189_v32 = vunpack.i.l.bf16 %v5188_v28 }
 0x74f   : > { %v5193_v52 = vpop.permute.xlu1 %5192  ;;  %v4894_v27 = vpack.c.bf16 %v5190_v5, %v5189_v32 }
 0x750   : > { %v5195_v15 = vunpack.i.h.bf16 %v5193_v52  ;;  %v5194_v22 = vunpack.i.l.bf16 %v5193_v52 }
 0x751   : > { %4895 = vmatprep.subr.bf16.mxu1 %v4894_v27 }
 0x752   : > { %v4898_v18 = vpack.c.bf16 %v5195_v15, %v5194_v22  ;;  %v5198_v1 = vpop.permute.xlu0 %5197  ;;  %4897 = vmatpush3.bf16.msra.mxu1 %v4894_v27 }
 0x753   : > { %v5200_v31 = vunpack.i.h.bf16 %v5198_v1  ;;  %v5199_v3 = vunpack.i.l.bf16 %v5198_v1 }
 0x754   : > { %4899 = vmatprep.subr.bf16.mxu1 %v4898_v18 }
 0x755   : > { %v4902_v61 = vpack.c.bf16 %v5200_v31, %v5199_v3 }
 0x756   : > { %4901 = vmatpush3.bf16.msra.mxu1 %v4898_v18 }
 0x757   : > { %4903 = vmatprep.subr.bf16.mxu1 %v4902_v61 }
 0x75a   : > { %4905 = vmatpush3.bf16.msra.mxu1 %v4902_v61 }
 0x762   : > { %v5203_v8 = vpop.permute.xlu1 %5202 }
 0x763   : > { %v5205_v48 = vunpack.i.h.bf16 %v5203_v8  ;;  %v5204_v26 = vunpack.i.l.bf16 %v5203_v8 }
 0x765   : > { %v4906_v28 = vpack.c.bf16 %v5205_v48, %v5204_v26 }
 0x767   : > { %4907 = vmatprep.subr.bf16.mxu1 %v4906_v28 }
 0x768   : > { %4909 = vmatpush3.bf16.msra.mxu1 %v4906_v28 }
 0x782   : > { %v6369_v56 = vpop.f32.mrb[24].mxu0 }
 0x783   : > { %7329 = vst [vmem:[#allocation36_spill] sm:$0xff] %v6369_v56  ;;  %v6371_v50 = vpop.f32.mrb[25].mxu0 }
 0x784   : > { %7330 = vst [vmem:[#allocation37_spill] sm:$0xff] %v6371_v50 }
 0x7b5   : > { %v6373_v52 = vpop.f32.mrb[26].mxu0 }
 0x7b6   : > { %7331 = vst [vmem:[#allocation38_spill] sm:$0xff] %v6373_v52  ;;  %v6375_v5 = vpop.f32.mrb[27].mxu0 }
 0x7b7   : > { %7332 = vst [vmem:[#allocation39_spill] sm:$0xff] %v6375_v5 }
 0x7b9   : > { %v6377_v32 = vpop.f32.mrb[28].mxu0 }
 0x7ba   : > { %7333 = vst [vmem:[#allocation40_spill] sm:$0xff] %v6377_v32  ;;  %v6379_v15 = vpop.f32.mrb[29].mxu0 }
 0x7bb   : > { %7334 = vst [vmem:[#allocation41_spill] sm:$0xff] %v6379_v15 }
 0x7bd   : > { %v6381_v22 = vpop.f32.mrb[30].mxu0 }
 0x7be   : > { %7335 = vst [vmem:[#allocation42_spill] sm:$0xff] %v6381_v22  ;;  %v6383_v27 = vpop.f32.mrb[31].mxu0 }
 0x7bf   : > { %7336 = vst [vmem:[#allocation43_spill] sm:$0xff] %v6383_v27 }
 0x7c1   : > { %v4504_v1 = vpop.f32.mrb[32].mxu0 }
 0x7c2   : > { %v1953_v8 = vmul.f32 0.25, %v4504_v1  ;;  %v1913_v18 = vpop.f32.mrb[33].mxu0 }
 0x7c3   : > { %v1952_v31 = vmul.f32 0.25, %v1913_v18 }
 0x7c4   : > { %v1963_v61 = vsel %vm303_vm2, %v1953_v8, -inf }
 0x7c5   : > { %1964 = vmax.xlane.f32.xlu1 %v1963_v61  ;;  %v4507_v3 = vpop.f32.mrb[34].mxu0  ;;  %v1960_v48 = vsel %vm303_vm2, %v1952_v31, -inf }
 0x7c6   : > { %1961 = vmax.xlane.f32.xlu0 %v1960_v48  ;;  %v1923_v26 = vpop.f32.mrb[35].mxu0 }
 0x7c7   : > { %v1954_v28 = vmul.f32 0.25, %v1923_v26  ;;  %v1955_v26 = vmul.f32 0.25, %v4507_v3 }
 0x7c9   : > { %v1966_v32 = vsel %vm303_vm2, %v1954_v28, -inf  ;;  %v4510_v52 = vpop.f32.mrb[36].mxu0 }
 0x7ca   : > { %1967 = vmax.xlane.f32.xlu0 %v1966_v32  ;;  %v6388_v22 = vmul.f32 0.25, %v4510_v52  ;;  %v1933_v27 = vpop.f32.mrb[37].mxu0 }
 0x7cb   : > { %v6390_v15 = vmul.f32 0.25, %v1933_v27 }
 0x7cc   : > { %v1975_v1 = vsel %vm303_vm2, %v6388_v22, -inf }
 0x7cd   : > { %v4513_v18 = vpop.f32.mrb[38].mxu0  ;;  %v1972_v48 = vsel %vm303_vm2, %v6390_v15, -inf }
 0x7ce   : > { %1976 = vmax.xlane.f32.xlu0 %v1975_v1  ;;  %v1943_v61 = vpop.f32.mrb[39].mxu0  ;;  %v6396_v56 = vmul.f32 0.25, %v4513_v18  ;;  %v1969_v1 = vsel %vm303_vm2, %v1955_v26, -inf }
 0x7cf   : > { %v6400_v52 = vmul.f32 0.25, %v1943_v61 }
 0x7d0   : > { %v1981_v32 = vsel %vm303_vm2, %v6396_v56, -inf }
 0x7d1   : > { %v1978_v27 = vsel %vm303_vm2, %v6400_v52, -inf }
 0x7d2   : > { %1973 = vmax.xlane.f32.xlu0 %v1972_v48 }
 0x7d6   : > { %5207 = vrot.lane.b32.xlu1 %v6209_v59, %s5634_s16  ;;  %1982 = vmax.xlane.f32.xlu0 %v1981_v32 }
 0x7da   : > { %1979 = vmax.xlane.f32.xlu0 %v1978_v27 }
 0x7f0   : > { %5212 = vrot.lane.b32.xlu0 %v6221_v9, %s5634_s16 }
 0x7f4   : > { %2205 = vrot.lane.b32.xlu0 %v6226_v11, %s5634_s16 }
 0x7f8   : > { %2209 = vrot.lane.b32.xlu0 %v6233_v4, %s5634_s16 }
 0x7fa   : > { %1970 = vmax.xlane.f32.xlu1 %v1969_v1 }
 0x7fc   : > { %2213 = vrot.lane.b32.xlu0 %v6240_v17, %s5634_s16 }
 0x800   : > { %5227 = vrot.lane.b32.xlu0 %v6347_v63, %s5634_s16 }
 0x804   : > { %5237 = vrot.lane.b32.xlu0 %v6359_v2, %s5634_s16 }
 0x80b   : > { %5217 = vrot.lane.b32.xlu1 %v6246_v45, %s5634_s16 }
 0x80f   : > { %5222 = vrot.lane.b32.xlu1 %v6252_v46, %s5634_s16 }
 0x813   : > { %2201 = vrot.lane.b32.xlu1 %v6257_v62, %s5634_s16 }
 0x817   : > { %2203 = vrot.lane.b32.xlu1 %v6262_v43, %s5634_s16 }
 0x81b   : > { %2207 = vrot.lane.b32.xlu1 %v6267_v6, %s5634_s16 }
 0x81f   : > { %2211 = vrot.lane.b32.xlu1 %v6272_v39, %s5634_s16 }
 0x823   : > { %2215 = vrot.lane.b32.xlu1 %v6277_v42, %s5634_s16 }
 0x827   : > { %5232 = vrot.lane.b32.xlu1 %v6351_v19, %s5634_s16 }
 0x82b   : > { %5242 = vrot.lane.b32.xlu1 %v6363_v34, %s5634_s16 }
 0x852   : > { %v1965_v3 = vpop.xlane.xlu1 %1964 }
 0x853   : > { %v1985_v18 = vsub.f32 %v1953_v8, %v1965_v3  ;;  %v1962_v61 = vpop.xlane.xlu0 %1961 }
 0x854   : > { %v1984_v48 = vsub.f32 %v1952_v31, %v1962_v61 }
 0x855   : > { %v1994_v32 = vmul.f32 1.442695, %v1985_v18 }
 0x856   : > { %v1992_v27 = vmul.f32 1.442695, %v1984_v48  ;;  %v5208_v1 = vpop.permute.xlu1 %5207 }
 0x857   : > { %v5210_v5 = vunpack.i.h.bf16 %v5208_v1  ;;  %v5209_v50 = vunpack.i.l.bf16 %v5208_v1  ;;  %v1968_v47 = vpop.xlane.xlu0 %1967 }
 0x858   : > { %5390 = vpow2.f32 %v1992_v27  ;;  %v1986_v38 = vsub.f32 %v1954_v28, %v1968_v47 }
 0x859   : > { %5392 = vpow2.f32 %v1994_v32  ;;  %v4910_v58 = vpack.c.bf16 %v5210_v5, %v5209_v50 }
 0x85a   : > { %v1996_v37 = vmul.f32 1.442695, %v1986_v38 }
 0x85b   : > { %4912 = vmatprep.subr.msk.bf16.mxu1 %vm5665_vm1, %v4910_v58  ;;  %v1977_v44 = vpop.xlane.xlu0 %1976 }
 0x85c   : > { %5394 = vpow2.f32 %v1996_v37 }
 0x85f   : > { %v1974_v40 = vpop.xlane.xlu0 %1973 }
 0x860   : > { %v1988_v18 = vsub.f32 %v6390_v15, %v1974_v40 }
 0x862   : > { %v6431_v8 = vpop.eup %5390  ;;  %v2000_v32 = vmul.f32 1.442695, %v1988_v18 }
 0x863   : > { %7337 = vst [vmem:[#allocation44_spill] sm:$0xff] %v6431_v8  ;;  %v6433_v31 = vpop.eup %5392  ;;  %4530 = vmatprep.mubr.msk.f32.mxu1 %vm303_vm2, %v6431_v8  ;;  %v1983_v3 = vpop.xlane.xlu0 %1982 }
 0x864   : > { %4531 = vmatmul.mubr.msk.f32.vlgmr.msra.gmra.mrb[32].mxu1 %vm303_vm2, %v6433_v31 }
 0x865   : > { %4915 = vmatpush3.bf16.xpose.msk.msra.mxu1 %vm5665_vm1, %v4910_v58  ;;  %v1989_v58 = vsub.f32 %v6388_v22, %v1977_v44 }
 0x866   : > { %v6441_v38 = vpop.eup %5394 }
 0x867   : > { %7338 = vst [vmem:[#allocation45_spill] sm:$0xff] %v6441_v38  ;;  %4533 = vmatprep.mubr.msk.f32.mxu1 %vm303_vm2, %v6441_v38  ;;  %v1980_v47 = vpop.xlane.xlu0 %1979  ;;  %v2002_v38 = vmul.f32 1.442695, %v1989_v58 }
 0x868   : > { %v1990_v27 = vsub.f32 %v6400_v52, %v1980_v47 }
 0x86a   : > { %v2004_v29 = vmul.f32 1.442695, %v1990_v27 }
 0x86b   : > { %v5213_v50 = vpop.permute.xlu0 %5212 }
 0x86c   : > { %v5215_v37 = vunpack.i.h.bf16 %v5213_v50  ;;  %v5214_v5 = vunpack.i.l.bf16 %v5213_v50  ;;  %v1991_v50 = vsub.f32 %v6396_v56, %v1983_v3 }
 0x86e   : > { %v4916_v28 = vpack.c.bf16 %v5215_v37, %v5214_v5  ;;  %v2006_v40 = vmul.f32 1.442695, %v1991_v50 }
 0x870   : > { %4918 = vmatprep.subr.msk.bf16.mxu1 %vm5665_vm1, %v4916_v28 }
 0x871   : > { %4921 = vmatpush3.bf16.xpose.msk.msra.mxu1 %vm5665_vm1, %v4916_v28 }
 0x887   : > { %v1971_v61 = vpop.xlane.xlu1 %1970 }
 0x888   : > { %v1987_v48 = vsub.f32 %v1955_v26, %v1971_v61 }
 0x88a   : > { %v1998_v1 = vmul.f32 1.442695, %v1987_v48 }
 0x88b   : > { %v5218_v8 = vpop.permute.xlu1 %5217 }
 0x88c   : > { %5396 = vpow2.f32 %v1998_v1  ;;  %v5220_v37 = vunpack.i.h.bf16 %v5218_v8  ;;  %v5219_v5 = vunpack.i.l.bf16 %v5218_v8 }
 0x88d   : > { %5398 = vpow2.f32 %v2000_v32 }
 0x88e   : > { %v4922_v28 = vpack.c.bf16 %v5220_v37, %v5219_v5  ;;  %5400 = vpow2.f32 %v2002_v38  ;;  %v2206_v38 = vpop.permute.xlu0 %2205 }
 0x88f   : > { %v5223_v25 = vpop.permute.xlu1 %5222  ;;  %5402 = vpow2.f32 %v2004_v29 }
 0x890   : > { %4924 = vmatprep.subr.msk.bf16.mxu1 %vm5665_vm1, %v4922_v28  ;;  %v5225_v44 = vunpack.i.h.bf16 %v5223_v25  ;;  %v5224_v15 = vunpack.i.l.bf16 %v5223_v25  ;;  %5404 = vpow2.f32 %v2006_v40 }
 0x891   : > { %4927 = vmatpush3.bf16.xpose.msk.msra.mxu1 %vm5665_vm1, %v4922_v28 }
 0x892   : > { %v4928_v22 = vpack.c.bf16 %v5225_v44, %v5224_v15  ;;  %v2210_v18 = vpop.permute.xlu0 %2209 }
 0x893   : > { %v2202_v52 = vpop.permute.xlu1 %2201 }
 0x894   : > { %4930 = vmatprep.subr.msk.bf16.mxu1 %vm5665_vm1, %v4928_v22 }
 0x896   : > { %v6459_v56 = vpop.eup %5396  ;;  %v2214_v61 = vpop.permute.xlu0 %2213 }
 0x897   : > { %v6461_v26 = vpop.eup %5398  ;;  %4534 = vmatmul.mubr.msk.f32.gmra.mrb[34].mxu1 %vm303_vm2, %v6459_v56  ;;  %v2204_v8 = vpop.permute.xlu1 %2203 }
 0x898   : > { %4536 = vmatprep.mubr.msk.f32.mxu1 %vm303_vm2, %v6461_v26  ;;  %v6469_v25 = vpop.eup %5400 }
 0x899   : > { %4933 = vmatpush3.bf16.xpose.msk.msra.mxu1 %vm5665_vm1, %v4928_v22  ;;  %v6471_v29 = vpop.eup %5402 }
 0x89a   : > { %v6477_v3 = vpop.eup %5404  ;;  %v5228_v32 = vpop.permute.xlu0 %5227 }
 0x89b   : > { %4537 = vmatmul.mubr.msk.f32.gmra.mrb[36].mxu1 %vm303_vm2, %v6469_v25  ;;  %v2208_v47 = vpop.permute.xlu1 %2207  ;;  %v5230_v1 = vunpack.i.h.bf16 %v5228_v32  ;;  %v5229_v50 = vunpack.i.l.bf16 %v5228_v32 }
 0x89c   : > { %4539 = vmatprep.mubr.msk.f32.mxu1 %vm303_vm2, %v6471_v29 }
 0x89d   : > { %v4934_v28 = vpack.c.bf16 %v5230_v1, %v5229_v50 }
 0x89e   : > { %v5238_v44 = vpop.permute.xlu0 %5237 }
 0x89f   : > { %4540 = vmatmul.mubr.msk.f32.gmra.mrb[38].mxu1 %vm303_vm2, %v6477_v3  ;;  %v2212_v58 = vpop.permute.xlu1 %2211  ;;  %4935 = vmatprep.subr.bf16.mxu0 %v4934_v28  ;;  %v5240_v22 = vunpack.i.h.bf16 %v5238_v44 }
 0x8a0   : > { %4558 = vmatprep.mubr.msk.f32.mxu1 %vm141_vm0, %v2202_v52  ;;  %v5239_v52 = vunpack.i.l.bf16 %v5238_v44  ;;  %4937 = vmatpush3.bf16.msra.mxu0 %v4934_v28 }
 0x8a3   : > { %4559 = vmatmul.mubr.msk.f32.vlgmr.msra.gmra.mrb[40].mxu1 %vm141_vm0, %v2204_v8  ;;  %v2216_v48 = vpop.permute.xlu1 %2215 }
 0x8a4   : > { %4561 = vmatprep.mubr.msk.f32.mxu1 %vm141_vm0, %v2206_v38 }
 0x8a7   : > { %4562 = vmatmul.mubr.msk.f32.gmra.mrb[42].mxu1 %vm141_vm0, %v2208_v47  ;;  %v5233_v27 = vpop.permute.xlu1 %5232  ;;  %v4942_v47 = vpack.c.bf16 %v5240_v22, %v5239_v52 }
 0x8a8   : > { %4564 = vmatprep.mubr.msk.f32.mxu1 %vm141_vm0, %v2210_v18  ;;  %v5235_v37 = vunpack.i.h.bf16 %v5233_v27  ;;  %v5234_v5 = vunpack.i.l.bf16 %v5233_v27 }
 0x8aa   : > { %v4938_v40 = vpack.c.bf16 %v5235_v37, %v5234_v5 }
 0x8ab   : > { %4565 = vmatmul.mubr.msk.f32.gmra.mrb[44].mxu1 %vm141_vm0, %v2212_v58  ;;  %v5243_v15 = vpop.permute.xlu1 %5242 }
 0x8ac   : > { %4567 = vmatprep.mubr.msk.f32.mxu1 %vm141_vm0, %v2214_v61  ;;  %4939 = vmatprep.subr.bf16.mxu0 %v4938_v40  ;;  %v5245_v8 = vunpack.i.h.bf16 %v5243_v15  ;;  %v5244_v38 = vunpack.i.l.bf16 %v5243_v15 }
 0x8ad   : > { %4941 = vmatpush3.bf16.msra.mxu0 %v4938_v40 }
 0x8ae   : > { %4943 = vmatprep.subr.bf16.mxu0 %v4942_v47  ;;  %v4946_v61 = vpack.c.bf16 %v5245_v8, %v5244_v38 }
 0x8af   : > { %4568 = vmatmul.mubr.msk.f32.gmra.mrb[46].mxu1 %vm141_vm0, %v2216_v48 }
 0x8b1   : > { %4945 = vmatpush3.bf16.msra.mxu0 %v4942_v47 }
 0x8b2   : > { %4947 = vmatprep.subr.bf16.mxu0 %v4946_v61 }
 0x8b5   : > { %4949 = vmatpush3.bf16.msra.mxu0 %v4946_v61 }
 0x937   : > { %v6497_v18 = vpop.f32.mrb[32].mxu1 }
 0x938   : > { %v6499_v58 = vpop.f32.mrb[33].mxu1 }
 0x96a   : > { %v6501_v48 = vpop.f32.mrb[34].mxu1 }
 0x96b   : > { %7339 = vst [vmem:[#allocation46_spill] sm:$0xff] %v6501_v48  ;;  %v6503_v32 = vpop.f32.mrb[35].mxu1 }
 0x96e   : > { %v6505_v27 = vpop.f32.mrb[36].mxu1 }
 0x96f   : > { %7340 = vst [vmem:[#allocation47_spill] sm:$0xff] %v6505_v27  ;;  %v6507_v1 = vpop.f32.mrb[37].mxu1 }
 0x970   : > { %7341 = vst [vmem:[#allocation48_spill] sm:$0xff] %v6507_v1 }
 0x972   : > { %v6509_v50 = vpop.f32.mrb[38].mxu1 }
 0x973   : > { %7342 = vst [vmem:[#allocation49_spill] sm:$0xff] %v6509_v50  ;;  %v6511_v37 = vpop.f32.mrb[39].mxu1 }
 0x974   : > { %7343 = vst [vmem:[#allocation50_spill] sm:$0xff] %v6511_v37 }
 0x976   : > { %v4560_v5 = vpop.f32.mrb[40].mxu1 }
 0x977   : > { %v2371_v28 = vmul.f32 0.25, %v4560_v5  ;;  %v2331_v40 = vpop.f32.mrb[41].mxu1 }
 0x978   : > { %v2370_v44 = vmul.f32 0.25, %v2331_v40 }
 0x979   : > { %v2381_v15 = vsel %vm303_vm2, %v2371_v28, -inf }
 0x97a   : > { %2382 = vmax.xlane.f32.xlu1 %v2381_v15  ;;  %v4563_v22 = vpop.f32.mrb[42].mxu1  ;;  %v2378_v52 = vsel %vm303_vm2, %v2370_v44, -inf }
 0x97b   : > { %2379 = vmax.xlane.f32.xlu0 %v2378_v52  ;;  %v2341_v8 = vpop.f32.mrb[43].mxu1 }
 0x97c   : > { %v2372_v38 = vmul.f32 0.25, %v2341_v8 }
 0x97e   : > { %v2384_v47 = vsel %vm303_vm2, %v2372_v38, -inf  ;;  %v4566_v61 = vpop.f32.mrb[44].mxu1 }
 0x97f   : > { %2385 = vmax.xlane.f32.xlu0 %v2384_v47  ;;  %v6516_v50 = vmul.f32 0.25, %v4566_v61  ;;  %v2351_v27 = vpop.f32.mrb[45].mxu1  ;;  %v2373_v61 = vmul.f32 0.25, %v4563_v22 }
 0x980   : > { %v6518_v37 = vmul.f32 0.25, %v2351_v27 }
 0x981   : > { %v2393_v5 = vsel %vm303_vm2, %v6516_v50, -inf }
 0x982   : > { %v4569_v40 = vpop.f32.mrb[46].mxu1  ;;  %v2390_v52 = vsel %vm303_vm2, %v6518_v37, -inf }
 0x983   : > { %2394 = vmax.xlane.f32.xlu0 %v2393_v5  ;;  %v2361_v15 = vpop.f32.mrb[47].mxu1  ;;  %v6524_v48 = vmul.f32 0.25, %v4569_v40  ;;  %v2387_v5 = vsel %vm303_vm2, %v2373_v61, -inf }
 0x984   : > { %v6528_v47 = vmul.f32 0.25, %v2361_v15 }
 0x985   : > { %v2399_v8 = vsel %vm303_vm2, %v6524_v48, -inf }
 0x986   : > { %v2396_v27 = vsel %vm303_vm2, %v6528_v47, -inf }
 0x987   : > { %2391 = vmax.xlane.f32.xlu0 %v2390_v52 }
 0x98b   : > { %5247 = vrot.lane.b32.xlu1 %v6209_v59, %s5635_s17  ;;  %2400 = vmax.xlane.f32.xlu0 %v2399_v8 }
 0x98f   : > { %2397 = vmax.xlane.f32.xlu0 %v2396_v27 }
 0x9a5   : > { %5252 = vrot.lane.b32.xlu0 %v6221_v9, %s5635_s17 }
 0x9a9   : > { %2623 = vrot.lane.b32.xlu0 %v6226_v11, %s5635_s17 }
 0x9ad   : > { %2627 = vrot.lane.b32.xlu0 %v6233_v4, %s5635_s17 }
 0x9af   : > { %2388 = vmax.xlane.f32.xlu1 %v2387_v5 }
 0x9b1   : > { %2631 = vrot.lane.b32.xlu0 %v6240_v17, %s5635_s17 }
 0x9b5   : > { %5267 = vrot.lane.b32.xlu0 %v6347_v63, %s5635_s17 }
 0x9b9   : > { %5277 = vrot.lane.b32.xlu0 %v6359_v2, %s5635_s17 }
 0x9c0   : > { %5257 = vrot.lane.b32.xlu1 %v6246_v45, %s5635_s17 }
 0x9c4   : > { %5262 = vrot.lane.b32.xlu1 %v6252_v46, %s5635_s17 }
 0x9c8   : > { %2619 = vrot.lane.b32.xlu1 %v6257_v62, %s5635_s17 }
 0x9cc   : > { %2621 = vrot.lane.b32.xlu1 %v6262_v43, %s5635_s17 }
 0x9d0   : > { %2625 = vrot.lane.b32.xlu1 %v6267_v6, %s5635_s17 }
 0x9d4   : > { %2629 = vrot.lane.b32.xlu1 %v6272_v39, %s5635_s17 }
 0x9d8   : > { %2633 = vrot.lane.b32.xlu1 %v6277_v42, %s5635_s17 }
 0x9dc   : > { %5272 = vrot.lane.b32.xlu1 %v6351_v19, %s5635_s17 }
 0x9e0   : > { %5282 = vrot.lane.b32.xlu1 %v6363_v34, %s5635_s17 }
 0xa07   : > { %v2383_v59 = vpop.xlane.xlu1 %2382 }
 0xa08   : > { %v2403_v45 = vsub.f32 %v2371_v28, %v2383_v59  ;;  %v2380_v9 = vpop.xlane.xlu0 %2379 }
 0xa09   : > { %v2402_v11 = vsub.f32 %v2370_v44, %v2380_v9 }
 0xa0a   : > { %v2412_v46 = vmul.f32 1.442695, %v2403_v45 }
 0xa0b   : > { %v2410_v4 = vmul.f32 1.442695, %v2402_v11  ;;  %v5248_v17 = vpop.permute.xlu1 %5247 }
 0xa0c   : > { %v5250_v62 = vunpack.i.h.bf16 %v5248_v17  ;;  %v5249_v22 = vunpack.i.l.bf16 %v5248_v17  ;;  %v2386_v40 = vpop.xlane.xlu0 %2385 }
 0xa0d   : > { %5406 = vpow2.f32 %v2410_v4  ;;  %v2404_v43 = vsub.f32 %v2372_v38, %v2386_v40 }
 0xa0e   : > { %5408 = vpow2.f32 %v2412_v46  ;;  %v4950_v6 = vpack.c.bf16 %v5250_v62, %v5249_v22 }
 0xa0f   : > { %v2414_v15 = vmul.f32 1.442695, %v2404_v43 }
 0xa10   : > { %4952 = vmatprep.subr.msk.bf16.mxu0 %vm5665_vm1, %v4950_v6  ;;  %v2395_v39 = vpop.xlane.xlu0 %2394 }
 0xa11   : > { %5410 = vpow2.f32 %v2414_v15  ;;  %v2407_v11 = vsub.f32 %v6516_v50, %v2395_v39 }
 0xa13   : > { %v2420_v40 = vmul.f32 1.442695, %v2407_v11 }
 0xa14   : > { %v2392_v42 = vpop.xlane.xlu0 %2391 }
 0xa15   : > { %v2406_v9 = vsub.f32 %v6518_v37, %v2392_v42 }
 0xa17   : > { %v6559_v28 = vpop.eup %5406  ;;  %v2418_v17 = vmul.f32 1.442695, %v2406_v9 }
 0xa18   : > { %v6561_v44 = vpop.eup %5408  ;;  %4586 = vmatprep.mubr.msk.f32.mxu0 %vm303_vm2, %v6559_v28  ;;  %v2401_v52 = vpop.xlane.xlu0 %2400 }
 0xa19   : > { %4587 = vmatmul.mubr.msk.f32.vlgmr.msra.gmra.mrb[40].mxu0 %vm303_vm2, %v6561_v44 }
 0xa1a   : > { %4955 = vmatpush3.bf16.xpose.msk.msra.mxu0 %vm5665_vm1, %v4950_v6  ;;  %v2409_v6 = vsub.f32 %v6524_v48, %v2401_v52 }
 0xa1b   : > { %v6569_v38 = vpop.eup %5410 }
 0xa1c   : > { %4589 = vmatprep.mubr.msk.f32.mxu0 %vm303_vm2, %v6569_v38  ;;  %v2398_v8 = vpop.xlane.xlu0 %2397  ;;  %v2424_v37 = vmul.f32 1.442695, %v2409_v6 }
 0xa1d   : > { %v2408_v62 = vsub.f32 %v6528_v47, %v2398_v8 }
 0xa20   : > { %v5253_v27 = vpop.permute.xlu0 %5252 }
 0xa21   : > { %v5255_v5 = vunpack.i.h.bf16 %v5253_v27  ;;  %v5254_v59 = vunpack.i.l.bf16 %v5253_v27 }
 0xa23   : > { %v4956_v45 = vpack.c.bf16 %v5255_v5, %v5254_v59  ;;  %v2422_v5 = vmul.f32 1.442695, %v2408_v62 }
 0xa25   : > { %4958 = vmatprep.subr.msk.bf16.mxu0 %vm5665_vm1, %v4956_v45 }
 0xa26   : > { %4961 = vmatpush3.bf16.xpose.msk.msra.mxu0 %vm5665_vm1, %v4956_v45 }
 0xa3c   : > { %v2389_v46 = vpop.xlane.xlu1 %2388 }
 0xa3d   : > { %v2405_v4 = vsub.f32 %v2373_v61, %v2389_v46  ;;  %v2624_v46 = vpop.permute.xlu0 %2623 }
 0xa3f   : > { %v2416_v22 = vmul.f32 1.442695, %v2405_v4 }
 0xa40   : > { %v5258_v43 = vpop.permute.xlu1 %5257 }
 0xa41   : > { %5412 = vpow2.f32 %v2416_v22  ;;  %v5260_v15 = vunpack.i.h.bf16 %v5258_v43  ;;  %v5259_v27 = vunpack.i.l.bf16 %v5258_v43 }
 0xa42   : > { %5414 = vpow2.f32 %v2418_v17  ;;  %v2628_v17 = vpop.permute.xlu0 %2627 }
 0xa43   : > { %v4962_v59 = vpack.c.bf16 %v5260_v15, %v5259_v27  ;;  %5416 = vpow2.f32 %v2420_v40 }
 0xa44   : > { %v5263_v45 = vpop.permute.xlu1 %5262  ;;  %5418 = vpow2.f32 %v2422_v5 }
 0xa45   : > { %4964 = vmatprep.subr.msk.bf16.mxu0 %vm5665_vm1, %v4962_v59  ;;  %v5265_v50 = vunpack.i.h.bf16 %v5263_v45  ;;  %v5264_v61 = vunpack.i.l.bf16 %v5263_v45  ;;  %5420 = vpow2.f32 %v2424_v37 }
 0xa46   : > { %4967 = vmatpush3.bf16.xpose.msk.msra.mxu0 %vm5665_vm1, %v4962_v59  ;;  %v2632_v22 = vpop.permute.xlu0 %2631 }
 0xa47   : > { %v4968_v47 = vpack.c.bf16 %v5265_v50, %v5264_v61 }
 0xa48   : > { %v2620_v39 = vpop.permute.xlu1 %2619 }
 0xa49   : > { %4970 = vmatprep.subr.msk.bf16.mxu0 %vm5665_vm1, %v4968_v47 }
 0xa4a   : > { %v5268_v43 = vpop.permute.xlu0 %5267 }
 0xa4b   : > { %v6587_v48 = vpop.eup %5412  ;;  %v5270_v6 = vunpack.i.h.bf16 %v5268_v43  ;;  %v5269_v15 = vunpack.i.l.bf16 %v5268_v43 }
 0xa4c   : > { %v6589_v42 = vpop.eup %5414  ;;  %4590 = vmatmul.mubr.msk.f32.gmra.mrb[42].mxu0 %vm303_vm2, %v6587_v48  ;;  %v2622_v9 = vpop.permute.xlu1 %2621 }
 0xa4d   : > { %4592 = vmatprep.mubr.msk.f32.mxu0 %vm303_vm2, %v6589_v42  ;;  %v6597_v52 = vpop.eup %5416  ;;  %v4974_v59 = vpack.c.bf16 %v5270_v6, %v5269_v15 }
 0xa4e   : > { %4973 = vmatpush3.bf16.xpose.msk.msra.mxu0 %vm5665_vm1, %v4968_v47  ;;  %v6599_v8 = vpop.eup %5418  ;;  %v5278_v61 = vpop.permute.xlu0 %5277 }
 0xa4f   : > { %v6605_v11 = vpop.eup %5420  ;;  %4975 = vmatprep.subr.bf16.mxu1 %v4974_v59 }
 0xa50   : > { %4593 = vmatmul.mubr.msk.f32.gmra.mrb[44].mxu0 %vm303_vm2, %v6597_v52  ;;  %v2626_v4 = vpop.permute.xlu1 %2625  ;;  %4977 = vmatpush3.bf16.msra.mxu1 %v4974_v59 }
 0xa51   : > { %4595 = vmatprep.mubr.msk.f32.mxu0 %vm303_vm2, %v6599_v8 }
 0xa54   : > { %4596 = vmatmul.mubr.msk.f32.gmra.mrb[46].mxu0 %vm303_vm2, %v6605_v11  ;;  %v2630_v62 = vpop.permute.xlu1 %2629 }
 0xa55   : > { %4614 = vmatprep.mubr.msk.f32.mxu0 %vm141_vm0, %v2620_v39  ;;  %v5280_v39 = vunpack.i.h.bf16 %v5278_v61 }
 0xa58   : > { %4615 = vmatmul.mubr.msk.f32.vlgmr.msra.gmra.mrb[48].mxu0 %vm141_vm0, %v2622_v9  ;;  %v2634_v40 = vpop.permute.xlu1 %2633  ;;  %v5279_v9 = vunpack.i.l.bf16 %v5278_v61 }
 0xa59   : > { %4617 = vmatprep.mubr.msk.f32.mxu0 %vm141_vm0, %v2624_v46 }
 0xa5c   : > { %4618 = vmatmul.mubr.msk.f32.gmra.mrb[50].mxu0 %vm141_vm0, %v2626_v4  ;;  %v5273_v45 = vpop.permute.xlu1 %5272  ;;  %v4982_v4 = vpack.c.bf16 %v5280_v39, %v5279_v9 }
 0xa5d   : > { %4620 = vmatprep.mubr.msk.f32.mxu0 %vm141_vm0, %v2628_v17  ;;  %v5275_v37 = vunpack.i.h.bf16 %v5273_v45  ;;  %v5274_v50 = vunpack.i.l.bf16 %v5273_v45 }
 0xa5f   : > { %v4978_v47 = vpack.c.bf16 %v5275_v37, %v5274_v50 }
 0xa60   : > { %4621 = vmatmul.mubr.msk.f32.gmra.mrb[52].mxu0 %vm141_vm0, %v2630_v62  ;;  %v5283_v46 = vpop.permute.xlu1 %5282 }
 0xa61   : > { %4623 = vmatprep.mubr.msk.f32.mxu0 %vm141_vm0, %v2632_v22  ;;  %4979 = vmatprep.subr.bf16.mxu1 %v4978_v47  ;;  %v5285_v17 = vunpack.i.h.bf16 %v5283_v46  ;;  %v5284_v62 = vunpack.i.l.bf16 %v5283_v46 }
 0xa62   : > { %4981 = vmatpush3.bf16.msra.mxu1 %v4978_v47 }
 0xa63   : > { %4983 = vmatprep.subr.bf16.mxu1 %v4982_v4  ;;  %v4986_v22 = vpack.c.bf16 %v5285_v17, %v5284_v62 }
 0xa64   : > { %4624 = vmatmul.mubr.msk.f32.gmra.mrb[54].mxu0 %vm141_vm0, %v2634_v40 }
 0xa66   : > { %4985 = vmatpush3.bf16.msra.mxu1 %v4982_v4 }
 0xa67   : > { %4987 = vmatprep.subr.bf16.mxu1 %v4986_v22 }
 0xa6a   : > { %4989 = vmatpush3.bf16.msra.mxu1 %v4986_v22 }
 0xaec   : > { %v6625_v27 = vpop.f32.mrb[40].mxu0 }
 0xaed   : > { %7344 = vst [vmem:[#allocation51_spill] sm:$0xff] %v6625_v27  ;;  %v6627_v5 = vpop.f32.mrb[41].mxu0 }
 0xaee   : > { %7345 = vst [vmem:[#allocation52_spill] sm:$0xff] %v6627_v5 }
 0xb1f   : > { %v6629_v40 = vpop.f32.mrb[42].mxu0 }
 0xb20   : > { %7346 = vst [vmem:[#allocation53_spill] sm:$0xff] %v6629_v40  ;;  %v6631_v43 = vpop.f32.mrb[43].mxu0 }
 0xb21   : > { %7347 = vst [vmem:[#allocation54_spill] sm:$0xff] %v6631_v43 }
 0xb23   : > { %v6633_v6 = vpop.f32.mrb[44].mxu0 }
 0xb24   : > { %7348 = vst [vmem:[#allocation55_spill] sm:$0xff] %v6633_v6  ;;  %v6635_v15 = vpop.f32.mrb[45].mxu0 }
 0xb25   : > { %7349 = vst [vmem:[#allocation56_spill] sm:$0xff] %v6635_v15 }
 0xb27   : > { %v6637_v59 = vpop.f32.mrb[46].mxu0 }
 0xb28   : > { %7350 = vst [vmem:[#allocation57_spill] sm:$0xff] %v6637_v59  ;;  %v6639_v45 = vpop.f32.mrb[47].mxu0 }
 0xb29   : > { %7351 = vst [vmem:[#allocation58_spill] sm:$0xff] %v6639_v45 }
 0xb2b   : > { %v4616_v37 = vpop.f32.mrb[48].mxu0 }
 0xb2c   : > { %v6641_v50 = vmul.f32 0.25, %v4616_v37  ;;  %v2749_v61 = vpop.f32.mrb[49].mxu0 }
 0xb2d   : > { %v6643_v47 = vmul.f32 0.25, %v2749_v61 }
 0xb2e   : > { %v2799_v39 = vsel %vm303_vm2, %v6641_v50, -inf }
 0xb2f   : > { %2800 = vmax.xlane.f32.xlu1 %v2799_v39  ;;  %v4619_v9 = vpop.f32.mrb[50].mxu0  ;;  %v2796_v46 = vsel %vm303_vm2, %v6643_v47, -inf }
 0xb30   : > { %2797 = vmax.xlane.f32.xlu0 %v2796_v46  ;;  %v2759_v4 = vpop.f32.mrb[51].mxu0 }
 0xb31   : > { %v6649_v17 = vmul.f32 0.25, %v2759_v4 }
 0xb33   : > { %v2802_v62 = vsel %vm303_vm2, %v6649_v17, -inf  ;;  %v4622_v22 = vpop.f32.mrb[52].mxu0 }
 0xb34   : > { %2803 = vmax.xlane.f32.xlu0 %v2802_v62  ;;  %v6653_v37 = vmul.f32 0.25, %v4622_v22  ;;  %v2769_v61 = vpop.f32.mrb[53].mxu0  ;;  %v5606_v62 = vld [vmem:[%s5661_s11 + $0x8] sm:$0xff]  ;;  %v5607_v22 = vld [vmem:[%s5661_s11 + $0x20] sm:$0xff] }
 0xb35   : > { %v6655_v59 = vmul.f32 0.25, %v2769_v61  ;;  %v5286_v61 = vpack.i.bf16 %v5607_v22, %v5606_v62  ;;  %v6677_v62 = vmul.f32 0.25, %v4619_v9  ;;  %v5614_v9 = vld [vmem:[%s5661_s11 + $0x80] sm:$0xff] }
 0xb36   : > { %v2811_v39 = vsel %vm303_vm2, %v6653_v37, -inf }
 0xb37   : > { %v4625_v6 = vpop.f32.mrb[54].mxu0  ;;  %v2808_v4 = vsel %vm303_vm2, %v6655_v59, -inf  ;;  %v2805_v22 = vsel %vm303_vm2, %v6677_v62, -inf }
 0xb38   : > { %2812 = vmax.xlane.f32.xlu0 %v2811_v39  ;;  %v2779_v46 = vpop.f32.mrb[55].mxu0  ;;  %v6661_v45 = vmul.f32 0.25, %v4625_v6  ;;  %v5608_v39 = vld [vmem:[%s5661_s11 + $0x38] sm:$0xff] }
 0xb39   : > { %v6667_v15 = vmul.f32 0.25, %v2779_v46  ;;  %v5610_v46 = vld [vmem:[%s5661_s11 + $0x30] sm:$0xff] }
 0xb3a   : > { %v2817_v40 = vsel %vm303_vm2, %v6661_v45, -inf }
 0xb3b   : > { %v2814_v6 = vsel %vm303_vm2, %v6667_v15, -inf }
 0xb3c   : > { %2809 = vmax.xlane.f32.xlu0 %v2808_v4  ;;  %v5609_v4 = vld [vmem:[%s5661_s11 + $0x50] sm:$0xff] }
 0xb3d   : > { %v5291_v27 = vpack.i.bf16 %v5609_v4, %v5608_v39  ;;  %v5615_v39 = vld [vmem:[%s5661_s11 + $0x98] sm:$0xff]  ;;  %v5616_v4 = vld [vmem:[%s5661_s11 + $0xb0] sm:$0xff] }
 0xb40   : > { %5287 = vrot.lane.b32.xlu1 %v5286_v61, %s5636_s18  ;;  %2818 = vmax.xlane.f32.xlu0 %v2817_v40  ;;  %v5611_v40 = vld [vmem:[%s5661_s11 + $0x60] sm:$0xff]  ;;  %v5612_v61 = vld [vmem:[%s5661_s11 + $0x90] sm:$0xff] }
 0xb44   : > { %2815 = vmax.xlane.f32.xlu0 %v2814_v6 }
 0xb5a   : > { %5292 = vrot.lane.b32.xlu0 %v5291_v27, %s5636_s18  ;;  %v5613_v27 = vld [vmem:[%s5661_s11 + $0x68] sm:$0xff] }
 0xb5b   : > { %v5296_v6 = vpack.i.bf16 %v5614_v9, %v5613_v27  ;;  %v5620_v27 = vld [vmem:[%s5661_s11 + $0x78] sm:$0xff]  ;;  %v5621_v9 = vld [vmem:[%s5661_s11 + $0xa8] sm:$0xff] }
 0xb5e   : > { %3041 = vrot.lane.b32.xlu0 %v5610_v46, %s5636_s18  ;;  %v5301_v46 = vpack.i.bf16 %v5616_v4, %v5615_v39 }
 0xb62   : > { %3045 = vrot.lane.b32.xlu0 %v5611_v40, %s5636_s18  ;;  %v5617_v40 = vld [vmem:[%s5661_s11] sm:$0xff] }
 0xb64   : > { %2806 = vmax.xlane.f32.xlu1 %v2805_v22  ;;  %v5618_v22 = vld [vmem:[%s5661_s11 + $0x18] sm:$0xff] }
 0xb66   : > { %3049 = vrot.lane.b32.xlu0 %v5612_v61, %s5636_s18  ;;  %v5619_v61 = vld [vmem:[%s5661_s11 + $0x48] sm:$0xff] }
 0xb6a   : > { %5312 = vrot.lane.b32.xlu0 %v6351_v19, %s5636_s18  ;;  %v749_v19 = vsel %vm303_vm2, %v5977_v53, 0.0  ;;  %v746_v53 = vsel %vm303_vm2, %v5975_v51, 0.0 }
 0xb75   : > { %5297 = vrot.lane.b32.xlu1 %v5296_v6, %s5636_s18 }
 0xb79   : > { %5302 = vrot.lane.b32.xlu1 %v5301_v46, %s5636_s18 }
 0xb7d   : > { %3037 = vrot.lane.b32.xlu1 %v5617_v40, %s5636_s18 }
 0xb81   : > { %3039 = vrot.lane.b32.xlu1 %v5618_v22, %s5636_s18 }
 0xb85   : > { %3043 = vrot.lane.b32.xlu1 %v5619_v61, %s5636_s18 }
 0xb89   : > { %3047 = vrot.lane.b32.xlu1 %v5620_v27, %s5636_s18  ;;  %750 = vadd.xlane.f32.xlu0 %v749_v19 }
 0xb8d   : > { %3051 = vrot.lane.b32.xlu1 %v5621_v9, %s5636_s18 }
 0xb91   : > { %5307 = vrot.lane.b32.xlu1 %v6347_v63, %s5636_s18 }
 0xb95   : > { %5317 = vrot.lane.b32.xlu1 %v6359_v2, %s5636_s18 }
 0xb99   : > { %5322 = vrot.lane.b32.xlu1 %v6363_v34, %s5636_s18 }
 0xbbc   : > { %v2801_v6 = vpop.xlane.xlu1 %2800 }
 0xbbd   : > { %v2821_v39 = vsub.f32 %v6641_v50, %v2801_v6  ;;  %v2798_v4 = vpop.xlane.xlu0 %2797  ;;  %747 = vadd.xlane.f32.xlu1 %v746_v53 }
 0xbbe   : > { %v2820_v46 = vsub.f32 %v6643_v47, %v2798_v4 }
 0xbbf   : > { %v2830_v40 = vmul.f32 1.442695, %v2821_v39 }
 0xbc0   : > { %v2828_v22 = vmul.f32 1.442695, %v2820_v46  ;;  %v5288_v61 = vpop.permute.xlu1 %5287 }
 0xbc1   : > { %v5290_v63 = vunpack.i.h.bf16 %v5288_v61  ;;  %v5289_v19 = vunpack.i.l.bf16 %v5288_v61  ;;  %v2804_v27 = vpop.xlane.xlu0 %2803 }
 0xbc2   : > { %5422 = vpow2.f32 %v2828_v22  ;;  %v2822_v2 = vsub.f32 %v6649_v17, %v2804_v27 }
 0xbc3   : > { %5424 = vpow2.f32 %v2830_v40  ;;  %v4990_v34 = vpack.c.bf16 %v5290_v63, %v5289_v19 }
 0xbc4   : > { %v2832_v9 = vmul.f32 1.442695, %v2822_v2 }
 0xbc5   : > { %4992 = vmatprep.subr.msk.bf16.mxu1 %vm5665_vm1, %v4990_v34  ;;  %v2813_v51 = vpop.xlane.xlu0 %2812 }
 0xbc6   : > { %5426 = vpow2.f32 %v2832_v9  ;;  %v2825_v63 = vsub.f32 %v6653_v37, %v2813_v51 }
 0xbc8   : > { %v2838_v43 = vmul.f32 1.442695, %v2825_v63 }
 0xbc9   : > { %v2810_v50 = vpop.xlane.xlu0 %2809 }
 0xbca   : > { %v2824_v61 = vsub.f32 %v6655_v59, %v2810_v50 }
 0xbcc   : > { %v6718_v6 = vpop.eup %5422  ;;  %v2836_v2 = vmul.f32 1.442695, %v2824_v61 }
 0xbcd   : > { %v6720_v47 = vpop.eup %5424  ;;  %4642 = vmatprep.mubr.msk.f32.mxu1 %vm303_vm2, %v6718_v6  ;;  %v2819_v53 = vpop.xlane.xlu0 %2818 }
 0xbce   : > { %4643 = vmatmul.mubr.msk.f32.vlgmr.msra.gmra.mrb[48].mxu1 %vm303_vm2, %v6720_v47 }
 0xbcf   : > { %4995 = vmatpush3.bf16.xpose.msk.msra.mxu1 %vm5665_vm1, %v4990_v34 }
 0xbd0   : > { %v6728_v17 = vpop.eup %5426 }
 0xbd1   : > { %4645 = vmatprep.mubr.msk.f32.mxu1 %vm303_vm2, %v6728_v17  ;;  %v2816_v39 = vpop.xlane.xlu0 %2815 }
 0xbd2   : > { %v2826_v34 = vsub.f32 %v6667_v15, %v2816_v39 }
 0xbd5   : > { %v5293_v4 = vpop.permute.xlu0 %5292 }
 0xbd6   : > { %v5295_v46 = vunpack.i.h.bf16 %v5293_v4  ;;  %v5294_v40 = vunpack.i.l.bf16 %v5293_v4 }
 0xbd8   : > { %v4996_v22 = vpack.c.bf16 %v5295_v46, %v5294_v40  ;;  %v2827_v46 = vsub.f32 %v6661_v45, %v2819_v53 }
 0xbd9   : > { %v3042_v61 = vpop.permute.xlu0 %3041 }
 0xbda   : > { %4998 = vmatprep.subr.msk.bf16.mxu1 %vm5665_vm1, %v4996_v22  ;;  %v2842_v37 = vmul.f32 1.442695, %v2827_v46 }
 0xbdb   : > { %5001 = vmatpush3.bf16.xpose.msk.msra.mxu1 %vm5665_vm1, %v4996_v22  ;;  %v2840_v22 = vmul.f32 1.442695, %v2826_v34 }
 0xbdd   : > { %v3046_v63 = vpop.permute.xlu0 %3045 }
 0xbf1   : > { %v2807_v19 = vpop.xlane.xlu1 %2806 }
 0xbf2   : > { %v2823_v27 = vsub.f32 %v6677_v62, %v2807_v19 }
 0xbf4   : > { %v2834_v9 = vmul.f32 1.442695, %v2823_v27  ;;  %v3050_v27 = vpop.permute.xlu0 %3049 }
 0xbf5   : > { %v5298_v4 = vpop.permute.xlu1 %5297 }
 0xbf6   : > { %5428 = vpow2.f32 %v2834_v9  ;;  %v5300_v40 = vunpack.i.h.bf16 %v5298_v4  ;;  %v5299_v5 = vunpack.i.l.bf16 %v5298_v4 }
 0xbf7   : > { %5430 = vpow2.f32 %v2836_v2 }
 0xbf8   : > { %v5002_v1 = vpack.c.bf16 %v5300_v40, %v5299_v5  ;;  %5432 = vpow2.f32 %v2838_v43 }
 0xbf9   : > { %v5303_v59 = vpop.permute.xlu1 %5302  ;;  %5434 = vpow2.f32 %v2840_v22  ;;  %v5313_v22 = vpop.permute.xlu0 %5312 }
 0xbfa   : > { %5004 = vmatprep.subr.msk.bf16.mxu1 %vm5665_vm1, %v5002_v1  ;;  %v5305_v62 = vunpack.i.h.bf16 %v5303_v59  ;;  %v5304_v51 = vunpack.i.l.bf16 %v5303_v59  ;;  %5436 = vpow2.f32 %v2842_v37  ;;  %v5315_v59 = vunpack.i.h.bf16 %v5313_v22 }
 0xbfb   : > { %5007 = vmatpush3.bf16.xpose.msk.msra.mxu1 %vm5665_vm1, %v5002_v1  ;;  %v5314_v37 = vunpack.i.l.bf16 %v5313_v22 }
 0xbfc   : > { %v5008_v15 = vpack.c.bf16 %v5305_v62, %v5304_v51 }
 0xbfd   : > { %v3038_v5 = vpop.permute.xlu1 %3037  ;;  %v5018_v51 = vpack.c.bf16 %v5315_v59, %v5314_v37 }
 0xbfe   : > { %5010 = vmatprep.subr.msk.bf16.mxu1 %vm5665_vm1, %v5008_v15 }
 0xc00   : > { %v6747_v45 = vpop.eup %5428 }
 0xc01   : > { %v6749_v50 = vpop.eup %5430  ;;  %4646 = vmatmul.mubr.msk.f32.gmra.mrb[50].mxu1 %vm303_vm2, %v6747_v45  ;;  %v3040_v53 = vpop.permute.xlu1 %3039 }
 0xc02   : > { %4648 = vmatprep.mubr.msk.f32.mxu1 %vm303_vm2, %v6749_v50  ;;  %v6757_v1 = vpop.eup %5432 }
 0xc03   : > { %5013 = vmatpush3.bf16.xpose.msk.msra.mxu1 %vm5665_vm1, %v5008_v15  ;;  %v6759_v43 = vpop.eup %5434 }
 0xc04   : > { %v6765_v39 = vpop.eup %5436 }
 0xc05   : > { %4649 = vmatmul.mubr.msk.f32.gmra.mrb[52].mxu1 %vm303_vm2, %v6757_v1  ;;  %v3044_v0 = vpop.permute.xlu1 %3043 }
 0xc06   : > { %4651 = vmatprep.mubr.msk.f32.mxu1 %vm303_vm2, %v6759_v43 }
 0xc09   : > { %4652 = vmatmul.mubr.msk.f32.gmra.mrb[54].mxu1 %vm303_vm2, %v6765_v39  ;;  %v3048_v19 = vpop.permute.xlu1 %3047 }
 0xc0a   : > { %4670 = vmatprep.mubr.msk.f32.mxu1 %vm141_vm0, %v3038_v5 }
 0xc0d   : > { %4671 = vmatmul.mubr.msk.f32.vlgmr.msra.gmra.mrb[56].mxu1 %vm141_vm0, %v3040_v53  ;;  %v3052_v2 = vpop.permute.xlu1 %3051 }
 0xc0e   : > { %4673 = vmatprep.mubr.msk.f32.mxu1 %vm141_vm0, %v3042_v61 }
 0xc11   : > { %4674 = vmatmul.mubr.msk.f32.gmra.mrb[58].mxu1 %vm141_vm0, %v3044_v0  ;;  %v5308_v4 = vpop.permute.xlu1 %5307 }
 0xc12   : > { %4676 = vmatprep.mubr.msk.f32.mxu1 %vm141_vm0, %v3046_v63  ;;  %v5310_v46 = vunpack.i.h.bf16 %v5308_v4  ;;  %v5309_v40 = vunpack.i.l.bf16 %v5308_v4 }
 0xc14   : > { %v5014_v62 = vpack.c.bf16 %v5310_v46, %v5309_v40 }
 0xc15   : > { %4677 = vmatmul.mubr.msk.f32.gmra.mrb[60].mxu1 %vm141_vm0, %v3048_v19  ;;  %v5318_v15 = vpop.permute.xlu1 %5317 }
 0xc16   : > { %4679 = vmatprep.mubr.msk.f32.mxu1 %vm141_vm0, %v3050_v27  ;;  %5015 = vmatprep.subr.bf16.mxu0 %v5014_v62  ;;  %v5320_v5 = vunpack.i.h.bf16 %v5318_v15  ;;  %v5319_v53 = vunpack.i.l.bf16 %v5318_v15 }
 0xc17   : > { %5017 = vmatpush3.bf16.msra.mxu0 %v5014_v62 }
 0xc18   : > { %5019 = vmatprep.subr.bf16.mxu0 %v5018_v51  ;;  %v5022_v19 = vpack.c.bf16 %v5320_v5, %v5319_v53 }
 0xc19   : > { %4680 = vmatmul.mubr.msk.f32.gmra.mrb[62].mxu1 %vm141_vm0, %v3052_v2  ;;  %v5323_v61 = vpop.permute.xlu1 %5322 }
 0xc1a   : > { %v5325_v0 = vunpack.i.h.bf16 %v5323_v61  ;;  %v5324_v63 = vunpack.i.l.bf16 %v5323_v61 }
 0xc1b   : > { %5021 = vmatpush3.bf16.msra.mxu0 %v5018_v51 }
 0xc1c   : > { %5023 = vmatprep.subr.bf16.mxu0 %v5022_v19  ;;  %v5026_v27 = vpack.c.bf16 %v5325_v0, %v5324_v63 }
 0xc1f   : > { %5025 = vmatpush3.bf16.msra.mxu0 %v5022_v19 }
 0xc20   : > { %5027 = vmatprep.subr.bf16.mxu0 %v5026_v27 }
 0xc23   : > { %5029 = vmatpush3.bf16.msra.mxu0 %v5026_v27 }
 0xca1   : > { %v6777_v34 = vpop.f32.mrb[48].mxu1 }
 0xca2   : > { %v6779_v9 = vpop.f32.mrb[49].mxu1 }
 0xcd4   : > { %v6781_v2 = vpop.f32.mrb[50].mxu1 }
 0xcd5   : > { %7352 = vst [vmem:[#allocation59_spill] sm:$0xff] %v6781_v2  ;;  %v6783_v4 = vpop.f32.mrb[51].mxu1 }
 0xcd8   : > { %v6785_v46 = vpop.f32.mrb[52].mxu1 }
 0xcd9   : > { %7353 = vst [vmem:[#allocation60_spill] sm:$0xff] %v6785_v46  ;;  %v6787_v40 = vpop.f32.mrb[53].mxu1 }
 0xcdc   : > { %v6789_v22 = vpop.f32.mrb[54].mxu1 }
 0xcdd   : > { %7354 = vst [vmem:[#allocation61_spill] sm:$0xff] %v6789_v22  ;;  %v6791_v59 = vpop.f32.mrb[55].mxu1 }
 0xcde   : > { %7355 = vst [vmem:[#allocation62_spill] sm:$0xff] %v6791_v59 }
 0xce0   : > { %v4672_v37 = vpop.f32.mrb[56].mxu1 }
 0xce1   : > { %v6793_v62 = vmul.f32 0.25, %v4672_v37  ;;  %v3167_v51 = vpop.f32.mrb[57].mxu1 }
 0xce2   : > { %v6795_v15 = vmul.f32 0.25, %v3167_v51 }
 0xce3   : > { %v3217_v5 = vsel %vm303_vm2, %v6793_v62, -inf }
 0xce4   : > { %3218 = vmax.xlane.f32.xlu1 %v3217_v5  ;;  %v4675_v53 = vpop.f32.mrb[58].mxu1  ;;  %v3214_v61 = vsel %vm303_vm2, %v6795_v15, -inf }
 0xce5   : > { %v6801_v0 = vmul.f32 0.25, %v4675_v53  ;;  %3215 = vmax.xlane.f32.xlu0 %v3214_v61  ;;  %v3177_v63 = vpop.f32.mrb[59].mxu1 }
 0xce6   : > { %v6805_v27 = vmul.f32 0.25, %v3177_v63 }
 0xce7   : > { %v3223_v19 = vsel %vm303_vm2, %v6801_v0, -inf }
 0xce8   : > { %v4678_v37 = vpop.f32.mrb[60].mxu1  ;;  %v3220_v53 = vsel %vm303_vm2, %v6805_v27, -inf }
 0xce9   : > { %v6807_v51 = vmul.f32 0.25, %v4678_v37  ;;  %3224 = vmax.xlane.f32.xlu0 %v3223_v19  ;;  %v3187_v22 = vpop.f32.mrb[61].mxu1  ;;  %v755_v19 = vsel %vm303_vm2, %v6003_v23, 0.0  ;;  %v761_v37 = vsel %vm303_vm2, %v6013_v10, 0.0  ;;  %v1175_v23 = vsel %vm303_vm2, %v6105_v35, 0.0 }
 0xcea   : > { %v6809_v46 = vmul.f32 0.25, %v3187_v22  ;;  %v1181_v10 = vsel %vm303_vm2, %v6131_v54, 0.0  ;;  %v764_v35 = vsel %vm303_vm2, %v6015_v12, 0.0  ;;  %v1172_v54 = vsel %vm303_vm2, %v6103_v33, 0.0 }
 0xceb   : > { %v3229_v5 = vsel %vm303_vm2, %v6807_v51, -inf  ;;  %v1599_v12 = vsel %vm303_vm2, %v6315_v24, 0.0  ;;  %v1605_v33 = vsel %vm303_vm2, %v6325_v13, 0.0  ;;  %v1590_v24 = vsel %vm303_vm2, %v6286_v16, 0.0 }
 0xcec   : > { %3230 = vmax.xlane.f32.xlu1 %v3229_v5  ;;  %v4681_v61 = vpop.f32.mrb[62].mxu1  ;;  %v3226_v63 = vsel %vm303_vm2, %v6809_v46, -inf  ;;  %v1596_v13 = vsel %vm303_vm2, %v6296_v30, 0.0  ;;  %v2023_v16 = vsel %vm303_vm2, %v6469_v25, 0.0  ;;  %v2029_v30 = vsel %vm303_vm2, %v6477_v3, 0.0 }
 0xced   : > { %3221 = vmax.xlane.f32.xlu0 %v3220_v53  ;;  %v3197_v59 = vpop.f32.mrb[63].mxu1  ;;  %v6815_v2 = vmul.f32 0.25, %v4681_v61  ;;  %v767_v53 = vsel %vm303_vm2, %v6021_v14, 0.0  ;;  %v758_v14 = vsel %vm303_vm2, %v6005_v7, 0.0  ;;  %v1593_v7 = vsel %vm303_vm2, %v6288_v36, 0.0 }
 0xcee   : > { %v6825_v5 = vmul.f32 0.25, %v3197_v59  ;;  %v1187_v59 = vsel %vm303_vm2, %v6141_v49, 0.0  ;;  %v1178_v49 = vsel %vm303_vm2, %v6113_v57, 0.0  ;;  %v1190_v36 = vsel %vm303_vm2, %v6143_v55, 0.0 }
 0xcef   : > { %v3235_v22 = vsel %vm303_vm2, %v6815_v2, -inf  ;;  %v1611_v57 = vsel %vm303_vm2, %v6333_v41, 0.0  ;;  %v2017_v55 = vsel %vm303_vm2, %v6459_v56, 0.0  ;;  %v2020_v3 = vsel %vm303_vm2, %v6461_v26, 0.0 }
 0xcf0   : > { %756 = vadd.xlane.f32.xlu1 %v755_v19  ;;  %v3232_v61 = vsel %vm303_vm2, %v6825_v5, -inf  ;;  %v7356_v19 = vld [vmem:[#allocation34_spill] sm:$0xff]  ;;  %v2847_v26 = vsel %vm303_vm2, %v6720_v47, 0.0  ;;  %v2444_v47 = vsel %vm303_vm2, %v6599_v8, 0.0 }
 0xcf1   : > { %3227 = vmax.xlane.f32.xlu0 %v3226_v63  ;;  %v752_v63 = vsel %vm303_vm2, %v5985_v60, 0.0  ;;  %v1193_v60 = vsel %vm303_vm2, %v6149_v20, 0.0  ;;  %v1184_v20 = vsel %vm303_vm2, %v6133_v21, 0.0  ;;  %v2011_v21 = vsel %vm303_vm2, %v6433_v31, 0.0 }
 0xcf2   : > { %v1602_v41 = vsel %vm303_vm2, %v7356_v19, 0.0 }
 0xcf4   : > { %762 = vadd.xlane.f32.xlu1 %v761_v37  ;;  %v7358_v37 = vld [vmem:[#allocation44_spill] sm:$0xff] }
 0xcf5   : > { %3236 = vmax.xlane.f32.xlu0 %v3235_v22  ;;  %v7357_v22 = vld [vmem:[#allocation35_spill] sm:$0xff]  ;;  %v2008_v56 = vsel %vm303_vm2, %v7358_v37, 0.0 }
 0xcf6   : > { %v1608_v31 = vsel %vm303_vm2, %v7357_v22, 0.0 }
 0xcf8   : > { %768 = vadd.xlane.f32.xlu1 %v767_v53  ;;  %v2429_v53 = vsel %vm303_vm2, %v6561_v44, 0.0  ;;  %v2026_v44 = vsel %vm303_vm2, %v6471_v29, 0.0  ;;  %v2853_v29 = vsel %vm303_vm2, %v6747_v45, 0.0  ;;  %v2844_v45 = vsel %vm303_vm2, %v6718_v6, 0.0 }
 0xcf9   : > { %3233 = vmax.xlane.f32.xlu0 %v3232_v61  ;;  %v7359_v61 = vld [vmem:[#allocation45_spill] sm:$0xff] }
 0xcfa   : > { %v2014_v25 = vsel %vm303_vm2, %v7359_v61, 0.0 }
 0xcfc   : > { %1176 = vadd.xlane.f32.xlu1 %v1175_v23  ;;  %v2435_v23 = vsel %vm303_vm2, %v6587_v48, 0.0  ;;  %v2426_v48 = vsel %vm303_vm2, %v6559_v28, 0.0  ;;  %v2859_v28 = vsel %vm303_vm2, %v6757_v1, 0.0  ;;  %v2850_v1 = vsel %vm303_vm2, %v6728_v17, 0.0 }
 0xcfd   : > { %753 = vadd.xlane.f32.xlu0 %v752_v63  ;;  %v2441_v63 = vsel %vm303_vm2, %v6597_v52, 0.0  ;;  %v2432_v52 = vsel %vm303_vm2, %v6569_v38, 0.0  ;;  %v2865_v38 = vsel %vm303_vm2, %v6765_v39, 0.0  ;;  %v2856_v39 = vsel %vm303_vm2, %v6749_v50, 0.0  ;;  %v7365_v50 = vld [vmem:[#allocation5_spill] sm:$0xff] }
 0xd00   : > { %1182 = vadd.xlane.f32.xlu1 %v1181_v10  ;;  %v2447_v10 = vsel %vm303_vm2, %v6605_v11, 0.0  ;;  %v2438_v11 = vsel %vm303_vm2, %v6589_v42, 0.0 }
 0xd01   : > { %759 = vadd.xlane.f32.xlu0 %v758_v14  ;;  %v7360_v14 = vld [vmem:[#allocation3_spill] sm:$0xff] }
 0xd02   : > { %v355_v42 = vsel %vm303_vm2, %v7360_v14, 0.0 }
 0xd04   : > { %1188 = vadd.xlane.f32.xlu1 %v1187_v59  ;;  %v7361_v59 = vld [vmem:[#allocation4_spill] sm:$0xff] }
 0xd05   : > { %765 = vadd.xlane.f32.xlu0 %v764_v35  ;;  %v361_v8 = vsel %vm303_vm2, %v7361_v59, 0.0  ;;  %v7362_v35 = vld [vmem:[#allocation7_spill] sm:$0xff] }
 0xd06   : > { %v367_v6 = vsel %vm303_vm2, %v7362_v35, 0.0 }
 0xd08   : > { %1194 = vadd.xlane.f32.xlu1 %v1193_v60  ;;  %v2862_v60 = vsel %vm303_vm2, %v6759_v43, 0.0 }
 0xd09   : > { %1173 = vadd.xlane.f32.xlu0 %v1172_v54  ;;  %v751_v54 = vpop.xlane.xlu0 %750 }
 0xd0a   : > { %5438 = vrcp.f32 %v751_v54 }
 0xd0c   : > { %1594 = vadd.xlane.f32.xlu1 %v1593_v7  ;;  %v7363_v7 = vld [vmem:[#allocation9_spill] sm:$0xff] }
 0xd0d   : > { %1179 = vadd.xlane.f32.xlu0 %v1178_v49  ;;  %v373_v17 = vsel %vm303_vm2, %v7363_v7, 0.0  ;;  %v7364_v49 = vld [vmem:[#allocation2_spill] sm:$0xff] }
 0xd10   : > { %1600 = vadd.xlane.f32.xlu1 %v1599_v12  ;;  %v352_v12 = vsel %vm303_vm2, %v7364_v49, 0.0 }
 0xd11   : > { %1185 = vadd.xlane.f32.xlu0 %v1184_v20  ;;  %v358_v20 = vsel %vm303_vm2, %v7365_v50, 0.0  ;;  %v7370_v50 = vld [vmem:[#allocation21_spill] sm:$0xff] }
 0xd14   : > { %1606 = vadd.xlane.f32.xlu1 %v1605_v33  ;;  %v7366_v33 = vld [vmem:[#allocation6_spill] sm:$0xff]  ;;  %v5439_v43 = vpop.eup %5438 }
 0xd15   : > { %1191 = vadd.xlane.f32.xlu0 %v1190_v36  ;;  %v364_v36 = vsel %vm303_vm2, %v7366_v33, 0.0 }
 0xd18   : > { %1612 = vadd.xlane.f32.xlu1 %v1611_v57  ;;  %v7367_v57 = vld [vmem:[#allocation8_spill] sm:$0xff] }
 0xd19   : > { %1591 = vadd.xlane.f32.xlu0 %v1590_v24  ;;  %v370_v24 = vsel %vm303_vm2, %v7367_v57, 0.0 }
 0xd1c   : > { %2012 = vadd.xlane.f32.xlu1 %v2011_v21  ;;  %v7368_v21 = vld [vmem:[#allocation18_spill] sm:$0xff] }
 0xd1d   : > { %1597 = vadd.xlane.f32.xlu0 %v1596_v13  ;;  %v940_v13 = vmul.f32 %v5439_v43, %v7368_v21 }
 0xd20   : > { %2018 = vadd.xlane.f32.xlu1 %v2017_v55  ;;  %v748_v55 = vpop.xlane.xlu1 %747 }
 0xd21   : > { %1603 = vadd.xlane.f32.xlu0 %v1602_v41  ;;  %5440 = vrcp.f32 %v748_v55 }
 0xd24   : > { %2024 = vadd.xlane.f32.xlu1 %v2023_v16 }
 0xd25   : > { %1609 = vadd.xlane.f32.xlu0 %v1608_v31 }
 0xd28   : > { %2030 = vadd.xlane.f32.xlu1 %v2029_v30 }
 0xd29   : > { %2009 = vadd.xlane.f32.xlu0 %v2008_v56 }
 0xd2b   : > { %v5441_v37 = vpop.eup %5440 }
 0xd2c   : > { %2430 = vadd.xlane.f32.xlu1 %v2429_v53 }
 0xd2d   : > { %2015 = vadd.xlane.f32.xlu0 %v2014_v25  ;;  %v7369_v25 = vld [vmem:[#allocation19_spill] sm:$0xff] }
 0xd30   : > { %2436 = vadd.xlane.f32.xlu1 %v2435_v23  ;;  %v939_v23 = vmul.f32 %v5441_v37, %v7369_v25  ;;  %v7374_v37 = vld [vmem:[#allocation22_spill] sm:$0xff] }
 0xd31   : > { %2021 = vadd.xlane.f32.xlu0 %v2020_v3 }
 0xd34   : > { %2442 = vadd.xlane.f32.xlu1 %v2441_v63 }
 0xd35   : > { %2027 = vadd.xlane.f32.xlu0 %v2026_v44 }
 0xd38   : > { %2448 = vadd.xlane.f32.xlu1 %v2447_v10 }
 0xd39   : > { %2427 = vadd.xlane.f32.xlu0 %v2426_v48 }
 0xd3c   : > { %2848 = vadd.xlane.f32.xlu1 %v2847_v26 }
 0xd3d   : > { %2433 = vadd.xlane.f32.xlu0 %v2432_v52 }
 0xd40   : > { %2854 = vadd.xlane.f32.xlu1 %v2853_v29 }
 0xd41   : > { %2439 = vadd.xlane.f32.xlu0 %v2438_v11 }
 0xd44   : > { %2860 = vadd.xlane.f32.xlu1 %v2859_v28 }
 0xd45   : > { %2445 = vadd.xlane.f32.xlu0 %v2444_v47 }
 0xd48   : > { %2866 = vadd.xlane.f32.xlu1 %v2865_v38 }
 0xd49   : > { %2845 = vadd.xlane.f32.xlu0 %v2844_v45 }
 0xd4c   : > { %356 = vadd.xlane.f32.xlu1 %v355_v42 }
 0xd4d   : > { %2851 = vadd.xlane.f32.xlu0 %v2850_v1 }
 0xd50   : > { %362 = vadd.xlane.f32.xlu1 %v361_v8 }
 0xd51   : > { %2857 = vadd.xlane.f32.xlu0 %v2856_v39 }
 0xd54   : > { %368 = vadd.xlane.f32.xlu1 %v367_v6 }
 0xd55   : > { %2863 = vadd.xlane.f32.xlu0 %v2862_v60 }
 0xd58   : > { %374 = vadd.xlane.f32.xlu1 %v373_v17 }
 0xd59   : > { %353 = vadd.xlane.f32.xlu0 %v352_v12 }
 0xd5d   : > { %359 = vadd.xlane.f32.xlu0 %v358_v20 }
 0xd61   : > { %365 = vadd.xlane.f32.xlu0 %v364_v36 }
 0xd65   : > { %371 = vadd.xlane.f32.xlu0 %v370_v24  ;;  %v7371_v24 = vld [vmem:[#allocation23_spill] sm:$0xff] }
 0xd69   : > { %3465 = vrot.lane.b32.xlu1 %v940_v13, %s5636_s18  ;;  %v7372_v13 = vld [vmem:[#allocation20_spill] sm:$0xff] }
 0xd71   : > { %v3219_v19 = vpop.xlane.xlu1 %3218 }
 0xd72   : > { %v3239_v41 = vsub.f32 %v6793_v62, %v3219_v19  ;;  %v3216_v16 = vpop.xlane.xlu0 %3215 }
 0xd73   : > { %v3238_v22 = vsub.f32 %v6795_v15, %v3216_v16 }
 0xd74   : > { %v3248_v31 = vmul.f32 1.442695, %v3239_v41 }
 0xd75   : > { %v3246_v30 = vmul.f32 1.442695, %v3238_v22 }
 0xd76   : > { %v3225_v56 = vpop.xlane.xlu0 %3224 }
 0xd77   : > { %5442 = vpow2.f32 %v3246_v30  ;;  %v3241_v53 = vsub.f32 %v6801_v0, %v3225_v56 }
 0xd78   : > { %5444 = vpow2.f32 %v3248_v31  ;;  %v7373_v31 = vld [vmem:[#allocation25_spill] sm:$0xff] }
 0xd79   : > { %v3231_v61 = vpop.xlane.xlu1 %3230  ;;  %v3252_v62 = vmul.f32 1.442695, %v3241_v53 }
 0xd7a   : > { %v3222_v3 = vpop.xlane.xlu0 %3221  ;;  %v3243_v44 = vsub.f32 %v6807_v51, %v3231_v61 }
 0xd7b   : > { %v3240_v63 = vsub.f32 %v6805_v27, %v3222_v3  ;;  %3463 = vrot.lane.b32.xlu0 %v939_v23, %s5636_s18  ;;  %v7375_v3 = vld [vmem:[#allocation27_spill] sm:$0xff] }
 0xd7c   : > { %v3256_v52 = vmul.f32 1.442695, %v3243_v44 }
 0xd7d   : > { %v3250_v15 = vmul.f32 1.442695, %v3240_v63  ;;  %v757_v10 = vpop.xlane.xlu1 %756 }
 0xd7e   : > { %v3228_v48 = vpop.xlane.xlu0 %3227 }
 0xd7f   : > { %5446 = vpow2.f32 %v3250_v15  ;;  %v3242_v26 = vsub.f32 %v6809_v46, %v3228_v48 }
 0xd80   : > { %5448 = vpow2.f32 %v3252_v62  ;;  %v7376_v62 = vld [vmem:[#allocation24_spill] sm:$0xff] }
 0xd81   : > { %v6943_v0 = vpop.eup %5442  ;;  %v3254_v29 = vmul.f32 1.442695, %v3242_v26  ;;  %v763_v11 = vpop.xlane.xlu1 %762 }
 0xd82   : > { %v6945_v28 = vpop.eup %5444  ;;  %4698 = vmatprep.mubr.msk.f32.mxu0 %vm303_vm2, %v6943_v0  ;;  %v3237_v27 = vpop.xlane.xlu0 %3236 }
 0xd83   : > { %5450 = vpow2.f32 %v3254_v29  ;;  %v3245_v51 = vsub.f32 %v6815_v2, %v3237_v27  ;;  %4699 = vmatmul.mubr.msk.f32.vlgmr.msra.gmra.mrb[56].mxu0 %vm303_vm2, %v6945_v28 }
 0xd84   : > { %5452 = vpow2.f32 %v3256_v52  ;;  %v7377_v52 = vld [vmem:[#allocation29_spill] sm:$0xff] }
 0xd85   : > { %v769_v46 = vpop.xlane.xlu1 %768  ;;  %v3260_v47 = vmul.f32 1.442695, %v3245_v51 }
 0xd86   : > { %v3234_v38 = vpop.xlane.xlu0 %3233 }
 0xd87   : > { %v3244_v45 = vsub.f32 %v6825_v5, %v3234_v38  ;;  %5454 = vpow2.f32 %v3260_v47 }
 0xd89   : > { %v6953_v14 = vpop.eup %5446  ;;  %v3258_v42 = vmul.f32 1.442695, %v3244_v45  ;;  %v1177_v1 = vpop.xlane.xlu1 %1176  ;;  %v7379_v45 = vld [vmem:[#allocation31_spill] sm:$0xff] }
 0xd8a   : > { %v6955_v59 = vpop.eup %5448  ;;  %4701 = vmatprep.mubr.msk.f32.mxu0 %vm303_vm2, %v6953_v14  ;;  %v754_v2 = vpop.xlane.xlu0 %753 }
 0xd8b   : > { %5456 = vpow2.f32 %v3258_v42  ;;  %4702 = vmatmul.mubr.msk.f32.gmra.mrb[58].mxu0 %vm303_vm2, %v6955_v59 }
 0xd8c   : > { %5458 = vrcp.f32 %v754_v2 }
 0xd8d   : > { %v6961_v8 = vpop.eup %5450  ;;  %v1183_v39 = vpop.xlane.xlu1 %1182  ;;  %5460 = vrcp.f32 %v757_v10 }
 0xd8e   : > { %v6963_v5 = vpop.eup %5452  ;;  %4704 = vmatprep.mubr.msk.f32.mxu0 %vm303_vm2, %v6961_v8  ;;  %v760_v35 = vpop.xlane.xlu0 %759 }
 0xd8f   : > { %5462 = vrcp.f32 %v760_v35  ;;  %4705 = vmatmul.mubr.msk.f32.gmra.mrb[60].mxu0 %vm303_vm2, %v6963_v5 }
 0xd90   : > { %5464 = vrcp.f32 %v763_v11  ;;  %v7378_v11 = vld [vmem:[#allocation26_spill] sm:$0xff] }
 0xd91   : > { %v1189_v6 = vpop.xlane.xlu1 %1188  ;;  %v6969_v54 = vpop.eup %5454 }
 0xd92   : > { %v766_v60 = vpop.xlane.xlu0 %765 }
 0xd93   : > { %5466 = vrcp.f32 %v766_v60 }
 0xd94   : > { %5468 = vrcp.f32 %v769_v46 }
 0xd95   : > { %v6971_v7 = vpop.eup %5456  ;;  %v1195_v17 = vpop.xlane.xlu1 %1194 }
 0xd96   : > { %v5459_v49 = vpop.eup %5458  ;;  %4707 = vmatprep.mubr.msk.f32.mxu0 %vm303_vm2, %v6971_v7  ;;  %v1174_v12 = vpop.xlane.xlu0 %1173 }
 0xd97   : > { %5470 = vrcp.f32 %v1174_v12  ;;  %4708 = vmatmul.mubr.msk.f32.gmra.mrb[62].mxu0 %vm303_vm2, %v6969_v54  ;;  %v941_v20 = vmul.f32 %v5459_v49, %v7370_v50  ;;  %v5461_v33 = vpop.eup %5460  ;;  %v7382_v12 = vld [vmem:[#allocation30_spill] sm:$0xff] }
 0xd98   : > { %5472 = vrcp.f32 %v1177_v1  ;;  %v942_v55 = vmul.f32 %v5461_v33, %v7372_v13  ;;  %v7380_v1 = vld [vmem:[#allocation28_spill] sm:$0xff] }
 0xd99   : > { %v5463_v36 = vpop.eup %5462  ;;  %3467 = vrot.lane.b32.xlu1 %v941_v20, %s5636_s18  ;;  %v1595_v43 = vpop.xlane.xlu1 %1594 }
 0xd9a   : > { %v1180_v57 = vpop.xlane.xlu0 %1179  ;;  %v943_v21 = vmul.f32 %v5463_v36, %v7371_v24  ;;  %v5465_v19 = vpop.eup %5464 }
 0xd9b   : > { %5474 = vrcp.f32 %v1180_v57  ;;  %v944_v56 = vmul.f32 %v5465_v19, %v7374_v37  ;;  %v7383_v57 = vld [vmem:[#allocation37_spill] sm:$0xff] }
 0xd9c   : > { %3471 = vrot.lane.b32.xlu0 %v943_v21, %s5636_s18  ;;  %5476 = vrcp.f32 %v1183_v39  ;;  %v7384_v21 = vld [vmem:[#allocation32_spill] sm:$0xff] }
 0xd9d   : > { %v5467_v41 = vpop.eup %5466  ;;  %3469 = vrot.lane.b32.xlu1 %v942_v55, %s5636_s18  ;;  %v1601_v16 = vpop.xlane.xlu1 %1600 }
 0xd9e   : > { %v1186_v22 = vpop.xlane.xlu0 %1185  ;;  %v945_v30 = vmul.f32 %v5467_v41, %v7373_v31  ;;  %v5469_v53 = vpop.eup %5468 }
 0xd9f   : > { %5478 = vrcp.f32 %v1186_v22  ;;  %v946_v44 = vmul.f32 %v5469_v53, %v7376_v62  ;;  %v7385_v22 = vld [vmem:[#allocation39_spill] sm:$0xff] }
 0xda0   : > { %3475 = vrot.lane.b32.xlu0 %v945_v30, %s5636_s18  ;;  %5480 = vrcp.f32 %v1189_v6  ;;  %v7386_v30 = vld [vmem:[#allocation36_spill] sm:$0xff] }
 0xda1   : > { %v5471_v61 = vpop.eup %5470  ;;  %3473 = vrot.lane.b32.xlu1 %v944_v56, %s5636_s18  ;;  %v1607_v25 = vpop.xlane.xlu1 %1606 }
 0xda2   : > { %v1192_v23 = vpop.xlane.xlu0 %1191  ;;  %v1357_v63 = vmul.f32 %v5471_v61, %v7375_v3  ;;  %v5473_v15 = vpop.eup %5472 }
 0xda3   : > { %5482 = vrcp.f32 %v1192_v23  ;;  %v1358_v27 = vmul.f32 %v5473_v15, %v7378_v11  ;;  %v7387_v23 = vld [vmem:[#allocation41_spill] sm:$0xff] }
 0xda4   : > { %3495 = vrot.lane.b32.xlu0 %v1357_v63, %s5635_s17  ;;  %5484 = vrcp.f32 %v1195_v17  ;;  %v7381_v17 = vld [vmem:[#allocation33_spill] sm:$0xff]  ;;  %v7388_v63 = vld [vmem:[#allocation38_spill] sm:$0xff] }
 0xda5   : > { %v5475_v10 = vpop.eup %5474  ;;  %3477 = vrot.lane.b32.xlu1 %v946_v44, %s5636_s18  ;;  %v1613_v48 = vpop.xlane.xlu1 %1612 }
 0xda6   : > { %v1592_v26 = vpop.xlane.xlu0 %1591  ;;  %v1359_v29 = vmul.f32 %v5475_v10, %v7377_v52  ;;  %v5477_v51 = vpop.eup %5476 }
 0xda7   : > { %5486 = vrcp.f32 %v1592_v26  ;;  %v1360_v2 = vmul.f32 %v5477_v51, %v7380_v1  ;;  %v7389_v26 = vld [vmem:[#allocation43_spill] sm:$0xff] }
 0xda8   : > { %3499 = vrot.lane.b32.xlu0 %v1359_v29, %s5635_s17  ;;  %5488 = vrcp.f32 %v1595_v43  ;;  %v7390_v29 = vld [vmem:[#allocation40_spill] sm:$0xff] }
 0xda9   : > { %v5479_v46 = vpop.eup %5478  ;;  %3497 = vrot.lane.b32.xlu1 %v1358_v27, %s5635_s17  ;;  %v2013_v47 = vpop.xlane.xlu1 %2012 }
 0xdaa   : > { %v1598_v38 = vpop.xlane.xlu0 %1597  ;;  %v1361_v42 = vmul.f32 %v5479_v46, %v7379_v45  ;;  %v5481_v39 = vpop.eup %5480  ;;  %v7391_v45 = vld [vmem:[#allocation42_spill] sm:$0xff] }
 0xdab   : > { %5490 = vrcp.f32 %v1598_v38  ;;  %v1362_v50 = vmul.f32 %v5481_v39, %v7382_v12 }
 0xdac   : > { %3503 = vrot.lane.b32.xlu0 %v1361_v42, %s5635_s17  ;;  %5492 = vrcp.f32 %v1601_v16 }
 0xdad   : > { %v5483_v35 = vpop.eup %5482  ;;  %3501 = vrot.lane.b32.xlu1 %v1360_v2, %s5635_s17  ;;  %v6999_v6 = vpop.xlane.xlu1 %2018 }
 0xdae   : > { %v1604_v60 = vpop.xlane.xlu0 %1603  ;;  %v1363_v49 = vmul.f32 %v5483_v35, %v7381_v17  ;;  %v5485_v20 = vpop.eup %5484 }
 0xdaf   : > { %5494 = vrcp.f32 %v1604_v60  ;;  %v1364_v13 = vmul.f32 %v5485_v20, %v7384_v21 }
 0xdb0   : > { %3507 = vrot.lane.b32.xlu0 %v1363_v49, %s5635_s17  ;;  %5496 = vrcp.f32 %v1607_v25 }
 0xdb1   : > { %v5487_v33 = vpop.eup %5486  ;;  %3505 = vrot.lane.b32.xlu1 %v1362_v50, %s5635_s17  ;;  %v7005_v36 = vpop.xlane.xlu1 %2024 }
 0xdb2   : > { %v1610_v43 = vpop.xlane.xlu0 %1609  ;;  %v1775_v24 = vmul.f32 %v5487_v33, %v7383_v57  ;;  %v5489_v55 = vpop.eup %5488 }
 0xdb3   : > { %5498 = vrcp.f32 %v1610_v43  ;;  %v1776_v37 = vmul.f32 %v5489_v55, %v7386_v30  ;;  %v3262_v55 = vsel %vm303_vm2, %v6943_v0, 0.0 }
 0xdb4   : > { %3527 = vrot.lane.b32.xlu0 %v1775_v24, %s5634_s16  ;;  %5500 = vrcp.f32 %v1613_v48 }
 0xdb5   : > { %v5491_v19 = vpop.eup %5490  ;;  %3509 = vrot.lane.b32.xlu1 %v1364_v13, %s5635_s17  ;;  %v7011_v41 = vpop.xlane.xlu1 %2030 }
 0xdb6   : > { %v2010_v16 = vpop.xlane.xlu0 %2009  ;;  %v1777_v31 = vmul.f32 %v5491_v19, %v7385_v22  ;;  %v5493_v56 = vpop.eup %5492  ;;  %v7392_v22 = vld [vmem:[#allocation10_spill] sm:$0xff] }
 0xdb7   : > { %5502 = vrcp.f32 %v2010_v16  ;;  %v1778_v62 = vmul.f32 %v5493_v56, %v7388_v63 }
 0xdb8   : > { %3531 = vrot.lane.b32.xlu0 %v1777_v31, %s5634_s16  ;;  %5504 = vrcp.f32 %v2013_v47 }
 0xdb9   : > { %v5495_v53 = vpop.eup %5494  ;;  %3529 = vrot.lane.b32.xlu1 %v1776_v37, %s5634_s16  ;;  %v7017_v61 = vpop.xlane.xlu1 %2430  ;;  %v3268_v37 = vsel %vm303_vm2, %v6953_v14, 0.0  ;;  %v3265_v14 = vsel %vm303_vm2, %v6945_v28, 0.0 }
 0xdba   : > { %v7019_v25 = vpop.xlane.xlu0 %2015  ;;  %v1779_v3 = vmul.f32 %v5495_v53, %v7387_v23  ;;  %v5497_v44 = vpop.eup %5496  ;;  %v7393_v23 = vld [vmem:[#allocation12_spill] sm:$0xff] }
 0xdbb   : > { %v1780_v11 = vmul.f32 %v5497_v44, %v7390_v29  ;;  %v3280_v29 = vsel %vm303_vm2, %v6971_v7, 0.0 }
 0xdbc   : > { %3535 = vrot.lane.b32.xlu0 %v1779_v3, %s5634_s16 }
 0xdbd   : > { %v5499_v15 = vpop.eup %5498  ;;  %3533 = vrot.lane.b32.xlu1 %v1778_v62, %s5634_s16  ;;  %v7025_v10 = vpop.xlane.xlu1 %2436  ;;  %v3274_v62 = vsel %vm303_vm2, %v6961_v8, 0.0  ;;  %v3271_v8 = vsel %vm303_vm2, %v6955_v59, 0.0 }
 0xdbe   : > { %v7027_v48 = vpop.xlane.xlu0 %2021  ;;  %v1781_v52 = vmul.f32 %v5499_v15, %v7389_v26  ;;  %v5501_v27 = vpop.eup %5500  ;;  %v7394_v15 = vld [vmem:[#allocation14_spill] sm:$0xff] }
 0xdbf   : > { %v1782_v42 = vmul.f32 %v5501_v27, %v7391_v45  ;;  %v7396_v45 = vld [vmem:[#allocation11_spill] sm:$0xff] }
 0xdc0   : > { %3539 = vrot.lane.b32.xlu0 %v1781_v52, %s5634_s16 }
 0xdc1   : > { %v5503_v51 = vpop.eup %5502  ;;  %3537 = vrot.lane.b32.xlu1 %v1780_v11, %s5634_s16  ;;  %v7033_v46 = vpop.xlane.xlu1 %2442 }
 0xdc2   : > { %v7035_v47 = vpop.xlane.xlu0 %2027  ;;  %v2193_v38 = vmul.f32 %v5503_v51, %v6499_v58  ;;  %v5505_v1 = vpop.eup %5504  ;;  %v7395_v51 = vld [vmem:[#allocation16_spill] sm:$0xff] }
 0xdc3   : > { %v2194_v35 = vmul.f32 %v5505_v1, %v6497_v18  ;;  %v3277_v1 = vsel %vm303_vm2, %v6963_v5, 0.0 }
 0xdc4   : > { %3559 = vrot.lane.b32.xlu0 %v2193_v38, %s5633_s15 }
 0xdc5   : > { %3541 = vrot.lane.b32.xlu1 %v1782_v42, %s5634_s16  ;;  %v7041_v2 = vpop.xlane.xlu1 %2448 }
 0xdc6   : > { %v7043_v39 = vpop.xlane.xlu0 %2427 }
 0xdc9   : > { %3561 = vrot.lane.b32.xlu1 %v2194_v35, %s5633_s15  ;;  %v7047_v60 = vpop.xlane.xlu1 %2848 }
 0xdca   : > { %v7049_v17 = vpop.xlane.xlu0 %2433 }
 0xdcd   : > { %v7051_v58 = vpop.xlane.xlu1 %2854 }
 0xdce   : > { %v7053_v49 = vpop.xlane.xlu0 %2439 }
 0xdd1   : > { %v7055_v12 = vpop.xlane.xlu1 %2860 }
 0xdd2   : > { %v7057_v50 = vpop.xlane.xlu0 %2445 }
 0xdd5   : > { %v7059_v20 = vpop.xlane.xlu1 %2866 }
 0xdd6   : > { %v7061_v33 = vpop.xlane.xlu0 %2845 }
 0xdd9   : > { %v357_v43 = vpop.xlane.xlu1 %356 }
 0xdda   : > { %5506 = vrcp.f32 %v357_v43  ;;  %v7063_v18 = vpop.xlane.xlu0 %2851  ;;  %v7397_v43 = vld [vmem:[#allocation13_spill] sm:$0xff] }
 0xddd   : > { %v363_v57 = vpop.xlane.xlu1 %362 }
 0xdde   : > { %5508 = vrcp.f32 %v363_v57  ;;  %v7065_v24 = vpop.xlane.xlu0 %2857 }
 0xde1   : > { %v369_v21 = vpop.xlane.xlu1 %368 }
 0xde2   : > { %5510 = vrcp.f32 %v369_v21  ;;  %v7067_v13 = vpop.xlane.xlu0 %2863  ;;  %v3283_v21 = vsel %vm303_vm2, %v6969_v54, 0.0 }
 0xde3   : > { %3263 = vadd.xlane.f32.xlu0 %v3262_v55 }
 0xde4   : > { %v5507_v19 = vpop.eup %5506 }
 0xde5   : > { %v375_v16 = vpop.xlane.xlu1 %374  ;;  %v514_v31 = vmul.f32 %v5507_v19, %v7392_v22  ;;  %v7398_v19 = vld [vmem:[#allocation15_spill] sm:$0xff] }
 0xde6   : > { %5512 = vrcp.f32 %v375_v16  ;;  %v354_v30 = vpop.xlane.xlu0 %353 }
 0xde7   : > { %5514 = vrcp.f32 %v354_v30  ;;  %3269 = vadd.xlane.f32.xlu0 %v3268_v37 }
 0xde8   : > { %v5509_v56 = vpop.eup %5508 }
 0xde9   : > { %v3466_v53 = vpop.permute.xlu1 %3465  ;;  %v7075_v3 = vmul.f32 %v5509_v56, %v7393_v23  ;;  %v7401_v56 = vld [vmem:[#allocation46_spill] sm:$0xff]  ;;  %v7403_v23 = vld [vmem:[#allocation47_spill] sm:$0xff] }
 0xdea   : > { %v7078_v63 = vsel %vm141_vm0, %v514_v31, %v3466_v53  ;;  %v360_v0 = vpop.xlane.xlu0 %359 }
 0xdeb   : > { %5516 = vrcp.f32 %v360_v0  ;;  %3275 = vadd.xlane.f32.xlu0 %v3274_v62 }
 0xdec   : > { %v5511_v44 = vpop.eup %5510 }
 0xded   : > { %3266 = vadd.xlane.f32.xlu1 %v3265_v14  ;;  %v7085_v26 = vmul.f32 %v5511_v44, %v7394_v15  ;;  %v7404_v14 = vld [vmem:[#allocation52_spill] sm:$0xff] }
 0xdee   : > { %v366_v52 = vpop.xlane.xlu0 %365 }
 0xdef   : > { %5518 = vrcp.f32 %v366_v52  ;;  %3281 = vadd.xlane.f32.xlu0 %v3280_v29 }
 0xdf0   : > { %v5513_v11 = vpop.eup %5512 }
 0xdf1   : > { %v5515_v27 = vpop.eup %5514  ;;  %3272 = vadd.xlane.f32.xlu1 %v3271_v8  ;;  %v7092_v38 = vmul.f32 %v5513_v11, %v7395_v51  ;;  %v7405_v11 = vld [vmem:[#allocation49_spill] sm:$0xff] }
 0xdf2   : > { %v372_v28 = vpop.xlane.xlu0 %371  ;;  %v513_v42 = vmul.f32 %v5515_v27, %v7396_v45 }
 0xdf3   : > { %5520 = vrcp.f32 %v372_v28  ;;  %v7406_v28 = vld [vmem:[#allocation54_spill] sm:$0xff] }
 0xdf4   : > { %5522 = vrcp.f32 %v7019_v25  ;;  %v7399_v25 = vld [vmem:[#allocation17_spill] sm:$0xff] }
 0xdf5   : > { %v5517_v35 = vpop.eup %5516  ;;  %3278 = vadd.xlane.f32.xlu1 %v3277_v1  ;;  %5524 = vrcp.f32 %v7027_v48  ;;  %v7407_v1 = vld [vmem:[#allocation51_spill] sm:$0xff] }
 0xdf6   : > { %v3464_v7 = vpop.permute.xlu0 %3463  ;;  %v515_v57 = vmul.f32 %v5517_v35, %v7397_v43  ;;  %5526 = vrcp.f32 %v6999_v6  ;;  %v7400_v6 = vld [vmem:[#allocation48_spill] sm:$0xff] }
 0xdf7   : > { %v7100_v59 = vsel %vm141_vm0, %v513_v42, %v3464_v7  ;;  %5528 = vrcp.f32 %v7035_v47 }
 0xdf8   : > { %5530 = vrcp.f32 %v7005_v36 }
 0xdf9   : > { %v5519_v55 = vpop.eup %5518  ;;  %3284 = vadd.xlane.f32.xlu1 %v3283_v21  ;;  %5532 = vrcp.f32 %v7043_v39 }
 0xdfa   : > { %v517_v16 = vmul.f32 %v5519_v55, %v7398_v19  ;;  %5534 = vrcp.f32 %v7011_v41  ;;  %v7402_v41 = vld [vmem:[#allocation50_spill] sm:$0xff]  ;;  %v7409_v19 = vld [vmem:[#allocation53_spill] sm:$0xff] }
 0xdfb   : > { %5536 = vrcp.f32 %v7049_v17 }
 0xdfc   : > { %5538 = vrcp.f32 %v7017_v61 }
 0xdfd   : > { %v5521_v5 = vpop.eup %5520  ;;  %5540 = vrcp.f32 %v7053_v49 }
 0xdfe   : > { %v519_v22 = vmul.f32 %v5521_v5, %v7399_v25  ;;  %v5523_v31 = vpop.eup %5522  ;;  %5542 = vrcp.f32 %v7025_v10  ;;  %v7410_v25 = vld [vmem:[#allocation58_spill] sm:$0xff] }
 0xdff   : > { %v2195_v54 = vmul.f32 %v5523_v31, %v6503_v32  ;;  %v5525_v30 = vpop.eup %5524  ;;  %5544 = vrcp.f32 %v7057_v50 }
 0xe00   : > { %v5527_v48 = vpop.eup %5526  ;;  %v2197_v47 = vmul.f32 %v5525_v30, %v7400_v6  ;;  %5546 = vrcp.f32 %v7033_v46 }
 0xe01   : > { %v5529_v37 = vpop.eup %5528  ;;  %v2196_v36 = vmul.f32 %v5527_v48, %v7401_v56  ;;  %5548 = vrcp.f32 %v7061_v33  ;;  %v7412_v56 = vld [vmem:[#allocation57_spill] sm:$0xff] }
 0xe02   : > { %v5531_v53 = vpop.eup %5530  ;;  %v2199_v39 = vmul.f32 %v5529_v37, %v7402_v41  ;;  %5550 = vrcp.f32 %v7041_v2 }
 0xe03   : > { %v5533_v17 = vpop.eup %5532  ;;  %v2198_v0 = vmul.f32 %v5531_v53, %v7403_v23  ;;  %5552 = vrcp.f32 %v7063_v18 }
 0xe04   : > { %v5535_v62 = vpop.eup %5534  ;;  %v2611_v15 = vmul.f32 %v5533_v17, %v7404_v14  ;;  %5554 = vrcp.f32 %v7047_v60 }
 0xe05   : > { %3563 = vrot.lane.b32.xlu0 %v2195_v54, %s5633_s15  ;;  %v5537_v52 = vpop.eup %5536  ;;  %v2200_v8 = vmul.f32 %v5535_v62, %v7405_v11  ;;  %5556 = vrcp.f32 %v7065_v24  ;;  %v7411_v54 = vld [vmem:[#allocation55_spill] sm:$0xff] }
 0xe06   : > { %v5539_v27 = vpop.eup %5538  ;;  %v2613_v45 = vmul.f32 %v5537_v52, %v7406_v28  ;;  %5558 = vrcp.f32 %v7051_v58 }
 0xe07   : > { %v5541_v42 = vpop.eup %5540  ;;  %v2612_v35 = vmul.f32 %v5539_v27, %v7407_v1  ;;  %5560 = vrcp.f32 %v7067_v13 }
 0xe08   : > { %v5543_v7 = vpop.eup %5542  ;;  %5562 = vrcp.f32 %v7055_v12 }
 0xe09   : > { %3567 = vrot.lane.b32.xlu0 %v2197_v47, %s5633_s15  ;;  %5564 = vrcp.f32 %v7059_v20 }
 0xe0a   : > { %3565 = vrot.lane.b32.xlu1 %v2196_v36, %s5633_s15 }
 0xe0b   : > { %v3468_v32 = vpop.permute.xlu1 %3467 }
 0xe0c   : > { %v3681_v61 = vsel %vm141_vm0, %v515_v57, %v3468_v32  ;;  %v7408_v57 = vld [vmem:[#allocation56_spill] sm:$0xff] }
 0xe0d   : > { %3571 = vrot.lane.b32.xlu0 %v2199_v39, %s5633_s15  ;;  %v2615_v21 = vmul.f32 %v5541_v42, %v7408_v57  ;;  %v7416_v42 = vld [vmem:[#allocation61_spill] sm:$0xff] }
 0xe0e   : > { %3569 = vrot.lane.b32.xlu1 %v2198_v0, %s5633_s15  ;;  %v3472_v49 = vpop.permute.xlu0 %3471 }
 0xe0f   : > { %v3470_v44 = vpop.permute.xlu1 %3469  ;;  %v3683_v10 = vsel %vm141_vm0, %v517_v16, %v3472_v49  ;;  %v2614_v16 = vmul.f32 %v5543_v7, %v7409_v19 }
 0xe10   : > { %v3682_v29 = vsel %vm141_vm0, %v7075_v3, %v3470_v44  ;;  %v7413_v44 = vld [vmem:[#allocation59_spill] sm:$0xff] }
 0xe11   : > { %3591 = vrot.lane.b32.xlu0 %v2611_v15, %s5632_s14 }
 0xe12   : > { %3573 = vrot.lane.b32.xlu1 %v2200_v8, %s5633_s15  ;;  %v3476_v50 = vpop.permute.xlu0 %3475 }
 0xe13   : > { %v3474_v46 = vpop.permute.xlu1 %3473  ;;  %v3685_v51 = vsel %vm141_vm0, %v519_v22, %v3476_v50 }
 0xe14   : > { %v3684_v3 = vsel %vm141_vm0, %v7085_v26, %v3474_v46  ;;  %v5545_v26 = vpop.eup %5544 }
 0xe15   : > { %3595 = vrot.lane.b32.xlu0 %v2613_v45, %s5632_s14  ;;  %v5547_v5 = vpop.eup %5546  ;;  %v2617_v22 = vmul.f32 %v5545_v26, %v7410_v25 }
 0xe16   : > { %3593 = vrot.lane.b32.xlu1 %v2612_v35, %s5632_s14  ;;  %v3496_v2 = vpop.permute.xlu0 %3495  ;;  %v5549_v31 = vpop.eup %5548  ;;  %v2616_v30 = vmul.f32 %v5547_v5, %v7411_v54 }
 0xe17   : > { %v3478_v33 = vpop.permute.xlu1 %3477  ;;  %v3688_v43 = vsel %vm3687_vm3, %v7100_v59, %v3496_v2  ;;  %v5551_v48 = vpop.eup %5550  ;;  %v3029_v47 = vmul.f32 %v5549_v31, %v6779_v9 }
 0xe18   : > { %v3686_v55 = vsel %vm141_vm0, %v7092_v38, %v3478_v33  ;;  %v5553_v37 = vpop.eup %5552  ;;  %v2618_v36 = vmul.f32 %v5551_v48, %v7412_v56 }
 0xe19   : > { %3599 = vrot.lane.b32.xlu0 %v2615_v21, %s5632_s14  ;;  %v5555_v53 = vpop.eup %5554  ;;  %v3031_v41 = vmul.f32 %v5553_v37, %v6783_v4 }
 0xe1a   : > { %3597 = vrot.lane.b32.xlu1 %v2614_v16, %s5632_s14  ;;  %v3500_v60 = vpop.permute.xlu0 %3499  ;;  %v5557_v39 = vpop.eup %5556  ;;  %v3030_v17 = vmul.f32 %v5555_v53, %v6777_v34 }
 0xe1b   : > { %v3498_v18 = vpop.permute.xlu1 %3497  ;;  %v3690_v59 = vsel %vm3687_vm3, %v3681_v61, %v3500_v60  ;;  %v5559_v61 = vpop.eup %5558  ;;  %v3033_v62 = vmul.f32 %v5557_v39, %v6787_v40  ;;  %v7415_v40 = vld [vmem:[#allocation60_spill] sm:$0xff] }
 0xe1c   : > { %v3689_v38 = vsel %vm3687_vm3, %v7078_v63, %v3498_v18  ;;  %v5561_v49 = vpop.eup %5560 }
 0xe1d   : > { %3603 = vrot.lane.b32.xlu0 %v2617_v22, %s5632_s14  ;;  %v5563_v14 = vpop.eup %5562 }
 0xe1e   : > { %3601 = vrot.lane.b32.xlu1 %v2616_v30, %s5632_s14  ;;  %v3504_v24 = vpop.permute.xlu0 %3503  ;;  %v3034_v27 = vmul.f32 %v5563_v14, %v7415_v40  ;;  %v5565_v50 = vpop.eup %5564 }
 0xe1f   : > { %v3502_v58 = vpop.permute.xlu1 %3501  ;;  %v3692_v6 = vsel %vm3687_vm3, %v3683_v10, %v3504_v24  ;;  %v3032_v10 = vmul.f32 %v5559_v61, %v7413_v44 }
 0xe20   : > { %v3691_v63 = vsel %vm3687_vm3, %v3682_v29, %v3502_v58  ;;  %v7414_v29 = vld [vmem:[#allocation62_spill] sm:$0xff] }
 0xe21   : > { %3623 = vrot.lane.b32.xlu0 %v3029_v47, %s5631_s13  ;;  %v3035_v11 = vmul.f32 %v5561_v49, %v7414_v29 }
 0xe22   : > { %3605 = vrot.lane.b32.xlu1 %v2618_v36, %s5632_s14  ;;  %v3508_v13 = vpop.permute.xlu0 %3507 }
 0xe23   : > { %v3506_v32 = vpop.permute.xlu1 %3505  ;;  %v3694_v12 = vsel %vm3687_vm3, %v3685_v51, %v3508_v13 }
 0xe24   : > { %v3693_v9 = vsel %vm3687_vm3, %v3684_v3, %v3506_v32  ;;  %v3036_v3 = vmul.f32 %v5565_v50, %v7416_v42 }
 0xe25   : > { %3627 = vrot.lane.b32.xlu0 %v3031_v41, %s5631_s13 }
 0xe26   : > { %3625 = vrot.lane.b32.xlu1 %v3030_v17, %s5631_s13  ;;  %v3528_v23 = vpop.permute.xlu0 %3527 }
 0xe27   : > { %v3510_v0 = vpop.permute.xlu1 %3509  ;;  %v3697_v20 = vsel %vm3696_vm4, %v3688_v43, %v3528_v23 }
 0xe28   : > { %v3695_v4 = vsel %vm3687_vm3, %v3686_v55, %v3510_v0 }
 0xe29   : > { %3631 = vrot.lane.b32.xlu0 %v3033_v62, %s5631_s13 }
 0xe2a   : > { %3629 = vrot.lane.b32.xlu1 %v3032_v10, %s5631_s13  ;;  %v3532_v34 = vpop.permute.xlu0 %3531 }
 0xe2b   : > { %v3530_v15 = vpop.permute.xlu1 %3529  ;;  %v7186_v52 = vsel %vm3696_vm4, %v3690_v59, %v3532_v34 }
 0xe2c   : > { %v3698_v8 = vsel %vm3696_vm4, %v3689_v38, %v3530_v15 }
 0xe2d   : > { %3635 = vrot.lane.b32.xlu0 %v3035_v11, %s5631_s13 }
 0xe2e   : > { %3633 = vrot.lane.b32.xlu1 %v3034_v27, %s5631_s13  ;;  %v3536_v46 = vpop.permute.xlu0 %3535 }
 0xe2f   : > { %v3534_v51 = vpop.permute.xlu1 %3533  ;;  %v7194_v28 = vsel %vm3696_vm4, %v3692_v6, %v3536_v46 }
 0xe30   : > { %v7197_v45 = vsel %vm3696_vm4, %v3691_v63, %v3534_v51 }
 0xe32   : > { %3637 = vrot.lane.b32.xlu1 %v3036_v3, %s5631_s13  ;;  %v3540_v1 = vpop.permute.xlu0 %3539 }
 0xe33   : > { %v3538_v35 = vpop.permute.xlu1 %3537  ;;  %v7202_v7 = vsel %vm3696_vm4, %v3694_v12, %v3540_v1 }
 0xe34   : > { %v7205_v2 = vsel %vm3696_vm4, %v3693_v9, %v3538_v35 }
 0xe36   : > { %v3560_v33 = vpop.permute.xlu0 %3559 }
 0xe37   : > { %v3542_v43 = vpop.permute.xlu1 %3541  ;;  %v7208_v57 = vsel %vm303_vm2, %v3697_v20, %v3560_v33 }
 0xe38   : > { %v7211_v21 = vsel %vm3696_vm4, %v3695_v4, %v3542_v43 }
 0xe3b   : > { %v3562_v26 = vpop.permute.xlu1 %3561 }
 0xe3c   : > { %v7214_v55 = vsel %vm303_vm2, %v3698_v8, %v3562_v26 }
 0xe56   : > { %v4700_v19 = vpop.f32.mrb[56].mxu0 }
 0xe57   : > { %v3400_v16 = vpop.f32.mrb[57].mxu0 }
 0xe5e   : > { %v4703_v5 = vpop.f32.mrb[58].mxu0 }
 0xe5f   : > { %v3410_v60 = vpop.f32.mrb[59].mxu0 }
 0xe62   : > { %v4706_v18 = vpop.f32.mrb[60].mxu0 }
 0xe63   : > { %v3420_v59 = vpop.f32.mrb[61].mxu0 }
 0xe6a   : > { %v4709_v25 = vpop.f32.mrb[62].mxu0 }
 0xe6b   : > { %v3430_v22 = vpop.f32.mrb[63].mxu0 }
 0xe70   : > { %v3264_v31 = vpop.xlane.xlu0 %3263 }
 0xe71   : > { %5566 = vrcp.f32 %v3264_v31 }
 0xe74   : > { %v3270_v38 = vpop.xlane.xlu0 %3269 }
 0xe75   : > { %5568 = vrcp.f32 %v3270_v38 }
 0xe78   : > { %v3276_v54 = vpop.xlane.xlu0 %3275 }
 0xe79   : > { %5570 = vrcp.f32 %v3276_v54 }
 0xe7a   : > { %v3267_v30 = vpop.xlane.xlu1 %3266 }
 0xe7b   : > { %v5567_v48 = vpop.eup %5566  ;;  %5572 = vrcp.f32 %v3267_v30 }
 0xe7c   : > { %v3282_v24 = vpop.xlane.xlu0 %3281  ;;  %v3447_v58 = vmul.f32 %v5567_v48, %v3400_v16 }
 0xe7d   : > { %5574 = vrcp.f32 %v3282_v24 }
 0xe7e   : > { %v3273_v6 = vpop.xlane.xlu1 %3272  ;;  %3655 = vrot.lane.b32.xlu0 %v3447_v58, %s5630_s12 }
 0xe7f   : > { %v5569_v47 = vpop.eup %5568  ;;  %5576 = vrcp.f32 %v3273_v6 }
 0xe80   : > { %v3449_v37 = vmul.f32 %v5569_v47, %v3410_v60  ;;  %v3564_v20 = vpop.permute.xlu0 %3563 }
 0xe81   : > { %v3707_v16 = vsel %vm303_vm2, %v7186_v52, %v3564_v20 }
 0xe82   : > { %v3279_v63 = vpop.xlane.xlu1 %3278  ;;  %3659 = vrot.lane.b32.xlu0 %v3449_v37, %s5630_s12 }
 0xe83   : > { %v5571_v56 = vpop.eup %5570  ;;  %5578 = vrcp.f32 %v3279_v63 }
 0xe84   : > { %v3451_v36 = vmul.f32 %v5571_v56, %v3420_v59  ;;  %v3568_v62 = vpop.permute.xlu0 %3567 }
 0xe85   : > { %v5573_v53 = vpop.eup %5572  ;;  %v3709_v59 = vsel %vm303_vm2, %v7194_v28, %v3568_v62 }
 0xe86   : > { %v3285_v13 = vpop.xlane.xlu1 %3284  ;;  %3663 = vrot.lane.b32.xlu0 %v3451_v36, %s5630_s12  ;;  %v3448_v32 = vmul.f32 %v5573_v53, %v4700_v19 }
 0xe87   : > { %v5575_v12 = vpop.eup %5574  ;;  %5580 = vrcp.f32 %v3285_v13 }
 0xe88   : > { %3657 = vrot.lane.b32.xlu1 %v3448_v32, %s5630_s12  ;;  %v3453_v41 = vmul.f32 %v5575_v12, %v3430_v22  ;;  %v3572_v4 = vpop.permute.xlu0 %3571 }
 0xe89   : > { %v5577_v39 = vpop.eup %5576  ;;  %v3711_v30 = vsel %vm303_vm2, %v7202_v7, %v3572_v4 }
 0xe8a   : > { %3667 = vrot.lane.b32.xlu0 %v3453_v41, %s5630_s12  ;;  %v3450_v9 = vmul.f32 %v5577_v39, %v4703_v5  ;;  %v3566_v49 = vpop.permute.xlu1 %3565 }
 0xe8b   : > { %v3708_v6 = vsel %vm303_vm2, %v7197_v45, %v3566_v49 }
 0xe8c   : > { %3661 = vrot.lane.b32.xlu1 %v3450_v9, %s5630_s12  ;;  %v3592_v10 = vpop.permute.xlu0 %3591 }
 0xe8d   : > { %v5579_v17 = vpop.eup %5578  ;;  %v3714_v35 = vsel %vm3713_vm5, %v7208_v57, %v3592_v10 }
 0xe8e   : > { %v3452_v61 = vmul.f32 %v5579_v17, %v4706_v18  ;;  %v3570_v44 = vpop.permute.xlu1 %3569 }
 0xe8f   : > { %v3710_v53 = vsel %vm303_vm2, %v7205_v2, %v3570_v44 }
 0xe90   : > { %3665 = vrot.lane.b32.xlu1 %v3452_v61, %s5630_s12  ;;  %v3596_v34 = vpop.permute.xlu0 %3595 }
 0xe91   : > { %v5581_v23 = vpop.eup %5580  ;;  %v3716_v57 = vsel %vm3713_vm5, %v3707_v16, %v3596_v34 }
 0xe92   : > { %v3454_v0 = vmul.f32 %v5581_v23, %v4709_v25  ;;  %v3574_v14 = vpop.permute.xlu1 %3573 }
 0xe93   : > { %v3712_v41 = vsel %vm303_vm2, %v7211_v21, %v3574_v14 }
 0xe94   : > { %3669 = vrot.lane.b32.xlu1 %v3454_v0, %s5630_s12  ;;  %v3600_v29 = vpop.permute.xlu0 %3599 }
 0xe95   : > { %v3718_v22 = vsel %vm3713_vm5, %v3709_v59, %v3600_v29 }
 0xe96   : > { %v3594_v15 = vpop.permute.xlu1 %3593 }
 0xe97   : > { %v3715_v38 = vsel %vm3713_vm5, %v7214_v55, %v3594_v15 }
 0xe98   : > { %v3604_v8 = vpop.permute.xlu0 %3603 }
 0xe99   : > { %v3720_v24 = vsel %vm3713_vm5, %v3711_v30, %v3604_v8 }
 0xe9a   : > { %v3598_v11 = vpop.permute.xlu1 %3597 }
 0xe9b   : > { %v3717_v37 = vsel %vm3713_vm5, %v3708_v6, %v3598_v11 }
 0xe9c   : > { %v3624_v27 = vpop.permute.xlu0 %3623 }
 0xe9d   : > { %v3723_v33 = vsel %vm3722_vm6, %v3714_v35, %v3624_v27 }
 0xe9e   : > { %v3602_v40 = vpop.permute.xlu1 %3601 }
 0xe9f   : > { %v3719_v45 = vsel %vm3713_vm5, %v3710_v53, %v3602_v40 }
 0xea0   : > { %v3628_v46 = vpop.permute.xlu0 %3627 }
 0xea1   : > { %v3725_v5 = vsel %vm3722_vm6, %v3716_v57, %v3628_v46 }
 0xea2   : > { %v3606_v50 = vpop.permute.xlu1 %3605 }
 0xea3   : > { %v3721_v39 = vsel %vm3713_vm5, %v3712_v41, %v3606_v50 }
 0xea4   : > { %v3632_v42 = vpop.permute.xlu0 %3631 }
 0xea5   : > { %v3727_v31 = vsel %vm3722_vm6, %v3718_v22, %v3632_v42 }
 0xea6   : > { %v3626_v51 = vpop.permute.xlu1 %3625 }
 0xea7   : > { %v3724_v48 = vsel %vm3722_vm6, %v3715_v38, %v3626_v51 }
 0xea8   : > { %v3636_v1 = vpop.permute.xlu0 %3635 }
 0xea9   : > { %v3729_v47 = vsel %vm3722_vm6, %v3720_v24, %v3636_v1 }
 0xeaa   : > { %v3630_v3 = vpop.permute.xlu1 %3629 }
 0xeab   : > { %v3726_v63 = vsel %vm3722_vm6, %v3717_v37, %v3630_v3 }
 0xeae   : > { %v3634_v43 = vpop.permute.xlu1 %3633 }
 0xeaf   : > { %v3728_v13 = vsel %vm3722_vm6, %v3719_v45, %v3634_v43 }
 0xeb2   : > { %v3638_v25 = vpop.permute.xlu1 %3637 }
 0xeb3   : > { %v3730_v9 = vsel %vm3722_vm6, %v3721_v39, %v3638_v25 }
 0xef0   : > { %v3656_v26 = vpop.permute.xlu0 %3655 }
 0xef1   : > { %v3732_v19 = vsel %vm3731_vm7, %v3723_v33, %v3656_v26 }
 0xef2   : > { %3740 = vst [vmem:[%s7230_s22] sm:$0xff] %v3732_v19 }
 0xef4   : > { %v3660_v60 = vpop.permute.xlu0 %3659 }
 0xef5   : > { %v3734_v18 = vsel %vm3731_vm7, %v3725_v5, %v3660_v60 }
 0xef6   : > { %3742 = vst [vmem:[%s7230_s22 + $0x10] sm:$0xff] %v3734_v18 }
 0xef8   : > { %v3664_v52 = vpop.permute.xlu0 %3663 }
 0xef9   : > { %v3736_v54 = vsel %vm3731_vm7, %v3727_v31, %v3664_v52 }
 0xefa   : > { %3744 = vst [vmem:[%s7230_s22 + $0x20] sm:$0xff] %v3736_v54  ;;  %v3658_v28 = vpop.permute.xlu1 %3657 }
 0xefb   : > { %v3733_v58 = vsel %vm3731_vm7, %v3724_v48, %v3658_v28 }
 0xefc   : > { %3741 = vst [vmem:[%s7230_s22 + $0x8] sm:$0xff] %v3733_v58  ;;  %v3668_v55 = vpop.permute.xlu0 %3667 }
 0xefd   : > { %v3738_v7 = vsel %vm3731_vm7, %v3729_v47, %v3668_v55 }
 0xefe   : > { %3746 = vst [vmem:[%s7230_s22 + $0x30] sm:$0xff] %v3738_v7  ;;  %v3662_v56 = vpop.permute.xlu1 %3661 }
 0xeff   : > { %v3735_v36 = vsel %vm3731_vm7, %v3726_v63, %v3662_v56 }
 0xf00   : > { %3743 = vst [vmem:[%s7230_s22 + $0x18] sm:$0xff] %v3735_v36 }
 0xf02   : > { %v3666_v32 = vpop.permute.xlu1 %3665 }
 0xf03   : > { %v3737_v12 = vsel %vm3731_vm7, %v3728_v13, %v3666_v32 }
 0xf04   : > { %3745 = vst [vmem:[%s7230_s22 + $0x28] sm:$0xff] %v3737_v12 }
 0xf06   : > { %v3670_v17 = vpop.permute.xlu1 %3669 }
 0xf07   : > { %v3739_v61 = vsel %vm3731_vm7, %v3730_v9, %v3670_v17 }
 0xf08   : > { %3747 = vst [vmem:[%s7230_s22 + $0x38] sm:$0xff] %v3739_v61 }
 0xf09 PF: > { %s11_s6 = sadd.s32 1, %s5628_s6  }
 0xf0a   : > { %p8_p4 = scmp.ge.s32.totalorder %s11_s6, 4  }
 0xf0c   :  { %10 = sbr.rel (!%p8_p4) target bundleno = 1 (0x1), region = 54 }

</bundles_post_ra>
